<compile_context>
chip_gen: v7x
topology: tpu7x:2x2x1
jax: 0.10.0
libtpu: 0.0.40
codegen_flags: <defaults>
</compile_context>

<pallas_src>
import math
from functools import partial

import jax
import jax.numpy as jnp
from jax import lax
from jax.experimental import pallas as pl
from jax.experimental.pallas import tpu as pltpu

# ---------------- small hyper-params consistent with the module ----------------
FEAT_DIM   = 16    # feat_dim     (80 in the original)
EMBED_DIM  = 16    # embed_dim    (192 in the original)
NUM_BLOCKS = 2     # num_blocks   (6 in the original)
D_MODEL    = 32    # output_size  (256 in the original)
N_HEADS    = 4     # attention heads
D_K        = D_MODEL // N_HEADS
FFN_DIM    = 64    # linear_units (2048 in the original)
CNN_KERNEL = 15    # cnn_module_kernel (wenet default)
BOTTLENECK = 32    # ASTP bottleneck_dim (128 in the original)
BATCH      = 2
SEQ        = 16    # input frames
LN_EPS     = 1e-5
BN_EPS     = 1e-5

CONV_PAD = (CNN_KERNEL - 1) // 2
PAD_LO   = ((CONV_PAD + 7) // 8) * 8          # sublane-aligned left pad in the conv scratch
VEC_W    = max(3 * D_MODEL, FFN_DIM)          # lane width of the packed small-vector array

# rows of the packed per-block vector array (one row per small (1, X) parameter)
(_LN1G, _LN1B, _FM_B1, _FM_B2, _LN2G, _LN2B, _QKV_B, _PBU, _PBV, _OUT_B,
 _LN3G, _LN3B, _PW1A_B, _PW1G_B, _BN_S, _BN_SH, _PW2_B,
 _LN4G, _LN4B, _FF_B1, _FF_B2, _LN5G, _LN5B, _N_VEC) = range(24)

_BLOCK_MATS = ("fm_w1", "fm_w2", "qkv_w", "pos_w", "out_w",
               "pw1a_w", "pw1g_w", "pw2_w", "ff_w1", "ff_w2")


# =============================== Pallas kernels ===============================

def _matmul_kernel(x_ref, w_ref, b_ref, o_ref, *, activation, out_scale):
    """y = act(x @ W + b) * out_scale; W is bf16 (K, N), accumulation in f32."""
    y = lax.dot_general(x_ref[...].astype(jnp.bfloat16), w_ref[...],
                        (((1,), (0,)), ((), ())),
                        preferred_element_type=jnp.float32) + b_ref[...]
    if activation == "relu":
        y = jnp.maximum(y, 0.0)
    if out_scale != 1.0:                       # skip the VPU mul when identity
        y = y * out_scale
    o_ref[...] = y


def _conformer_block_kernel(
        x_ref, pos_ref, vec_ref,
        fm_w1, fm_w2, qkv_w, pos_w, out_w,
        pw1a_w, pw1g_w, pw2_w, ff_w1, ff_w2,
        dw_ref,
        o_ref,
        lhs_ref, rhs_ref, att_ref, pad_ref):
    """Entire Conformer encoder layer for one batch element (block shape (1,T,D))."""
    _, T, D = x_ref.shape
    FFN = fm_w1.shape[1]
    H, dk = N_HEADS, D_K
    K = dw_ref.shape[0]

    def vec(row, width):                         # one packed small vector, (1, width)
        return vec_ref[row:row + 1, :width]

    def mm(a, w):                                # value @ bf16-weight-ref, f32 accum
        return lax.dot_general(a.astype(jnp.bfloat16), w[...],
                               (((1,), (0,)), ((), ())),
                               preferred_element_type=jnp.float32)

    def mm_nt(a, b):                             # a @ b.T, bf16 operands, f32 accum
        return lax.dot_general(a.astype(jnp.bfloat16), b.astype(jnp.bfloat16),
                               (((1,), (1,)), ((), ())),
                               preferred_element_type=jnp.float32)

    def ln(a, g_row, b_row):
        mu = jnp.mean(a, axis=-1, keepdims=True)
        var = jnp.mean(jnp.square(a - mu), axis=-1, keepdims=True)
        return (a - mu) * lax.rsqrt(var + LN_EPS) * vec(g_row, D) + vec(b_row, D)

    def sigmoid(a):
        return 1.0 / (1.0 + jnp.exp(-a))

    def swish(a):
        return a * sigmoid(a)

    x = x_ref[0]                                 # (T, D) f32

    # ---- macaron feed-forward (half-step residual) ----
    h = swish(mm(ln(x, _LN1G, _LN1B), fm_w1) + vec(_FM_B1, FFN))
    x = x + 0.5 * (mm(h, fm_w2) + vec(_FM_B2, D))

    # ---- relative-position multi-head self-attention ----
    h = ln(x, _LN2G, _LN2B)
    qkv = mm(h, qkv_w) + vec(_QKV_B, 3 * D)      # fused q/k/v projection (T, 3D)
    q = qkv[:, :D]
    k = qkv[:, D:2 * D]
    v = qkv[:, 2 * D:]
    p = mm(pos_ref[...], pos_w)                  # linear_pos (no bias), (T, D)
    # q-columns of qkv and pbu/pbv are pre-scaled by 1/sqrt(dk) offline; the bias
    # adds are hoisted out of the head loop (no per-head broadcast_in_dim).
    qu = q + vec(_PBU, D)
    qv = q + vec(_PBV, D)
    # Assemble head-interleaved [qu_h | qv_h] and [k_h | p_h] in VMEM so each head
    # needs a single score matmul with contraction width 2*dk.
    for hh in range(H):
        lo, hi = hh * dk, (hh + 1) * dk
        lhs_ref[:, 2 * lo:2 * lo + dk] = qu[:, lo:hi]
        lhs_ref[:, 2 * lo + dk:2 * hi] = qv[:, lo:hi]
        rhs_ref[:, 2 * lo:2 * lo + dk] = k[:, lo:hi]
        rhs_ref[:, 2 * lo + dk:2 * hi] = p[:, lo:hi]
    for hh in range(H):
        c0, c1 = 2 * hh * dk, 2 * (hh + 1) * dk
        s = mm_nt(lhs_ref[:, c0:c1], rhs_ref[:, c0:c1])       # (T, T), scale pre-folded
        s = s - jnp.max(s, axis=-1, keepdims=True)
        e = jnp.exp(s)
        aw = e * (1.0 / jnp.sum(e, axis=-1, keepdims=True))   # exact normalisation
        oh = lax.dot_general(aw.astype(jnp.bfloat16),
                             v[:, hh * dk:(hh + 1) * dk].astype(jnp.bfloat16),
                             (((1,), (0,)), ((), ())),
                             preferred_element_type=jnp.float32)
        att_ref[:, hh * dk:(hh + 1) * dk] = oh                # lane-offset head concat
    x = x + mm(att_ref[...], out_w) + vec(_OUT_B, D)          # one full-K projection

    # ---- convolution module ----
    h = ln(x, _LN3G, _LN3B)
    a = ((mm(h, pw1a_w) + vec(_PW1A_B, D))
         * sigmoid(mm(h, pw1g_w) + vec(_PW1G_B, D)))          # GLU as two matmuls
    # 'same' pad scratch: aligned store of the T rows, zero only the pad rows.
    pad_ref[0:PAD_LO, :] = jnp.zeros((PAD_LO, D), jnp.float32)
    pad_ref[PAD_LO + T:PAD_LO + T + CONV_PAD, :] = jnp.zeros((CONV_PAD, D), jnp.float32)
    pad_ref[PAD_LO:PAD_LO + T, :] = a

    def tap(kk, acc):
        w_k = dw_ref[pl.ds(kk, 1), :]                         # (1, D) tap weights
        seg = pad_ref[pl.ds(kk + (PAD_LO - CONV_PAD), T), :]  # (T, D) shifted window
        return acc + w_k * seg

    acc = lax.fori_loop(0, K, tap, jnp.zeros((T, D), jnp.float32), unroll=True)
    acc = acc * vec(_BN_S, D) + vec(_BN_SH, D)   # dw bias + eval-BN folded offline
    x = x + mm(swish(acc), pw2_w) + vec(_PW2_B, D)

    # ---- feed-forward (half-step residual) + final LayerNorm ----
    h = swish(mm(ln(x, _LN4G, _LN4B), ff_w1) + vec(_FF_B1, FFN))
    x = x + 0.5 * (mm(h, ff_w2) + vec(_FF_B2, D))
    o_ref[0] = ln(x, _LN5G, _LN5B)


def _astp_head_kernel(*refs, num_blocks):
    """MFA concat (assembled in VMEM) + ASTP pooling + folded BatchNorm1d + fc."""
    x_refs = refs[:num_blocks]
    (w1, b1, w2, b2, bn_s, bn_sh, fw, fb, o_ref, xcat) = refs[num_blocks:]
    _, T, D = x_refs[0].shape
    Dt = num_blocks * D

    for l in range(num_blocks):                  # in-VMEM MFA concat (no XLA concat)
        xcat[:, l * D:(l + 1) * D] = x_refs[l][0]
    x = xcat[...]                                # (T, Dt) f32

    def mm(a, w):
        return lax.dot_general(a.astype(jnp.bfloat16), w[...],
                               (((1,), (0,)), ((), ())),
                               preferred_element_type=jnp.float32)

    a = jnp.tanh(mm(x, w1) + b1[...])            # (T, bottleneck)
    e = mm(a, w2) + b2[...]                      # (T, Dt) attention logits
    e = e - jnp.max(e, axis=0, keepdims=True)    # softmax over time (sublanes)
    w = jnp.exp(e)
    w = w * (1.0 / jnp.sum(w, axis=0, keepdims=True))
    mean = jnp.sum(w * x, axis=0, keepdims=True)                 # (1, Dt)
    var = jnp.sum(w * x * x, axis=0, keepdims=True) - mean * mean
    std = jnp.sqrt(jnp.maximum(var, 1e-7))       # wespeaker ASTP clamp(min=1e-7)
    pm = mean * bn_s[:, :Dt] + bn_sh[:, :Dt]
    ps = std * bn_s[:, Dt:] + bn_sh[:, Dt:]
    # cat([mean, std]) @ Wfc == mean-half matmul + std-half matmul
    out = (lax.dot_general(pm.astype(jnp.bfloat16), fw[:Dt, :], (((1,), (0,)), ((), ())),
                           preferred_element_type=jnp.float32)
           + lax.dot_general(ps.astype(jnp.bfloat16), fw[Dt:, :], (((1,), (0,)), ((), ())),
                             preferred_element_type=jnp.float32)
           + fb[...])
    o_ref[0] = out                               # (1, EMBED)


# ============================= Pallas wrappers =================================

def matmul(x, w, b, activation="none", out_scale=1.0, tile_m=256):
    """Row-tiled fused matmul(+bias, +ReLU, +scale) for the subsampling stage."""
    M, Kd = x.shape
    N = w.shape[1]
    tm = min(tile_m, M)
    return pl.pallas_call(
        partial(_matmul_kernel, activation=activation, out_scale=out_scale),
        out_shape=jax.ShapeDtypeStruct((M, N), jnp.float32),
        grid=(pl.cdiv(M, tm),),
        in_specs=[pl.BlockSpec((tm, Kd), lambda i: (i, 0)),
                  pl.BlockSpec((Kd, N), lambda i: (0, 0)),
                  pl.BlockSpec((1, N), lambda i: (0, 0))],
        out_specs=pl.BlockSpec((tm, N), lambda i: (i, 0)),
        compiler_params=pltpu.CompilerParams(dimension_semantics=("parallel",)),
    )(x, w, b)


def conformer_block(x, pos_emb, blk):
    B, T, D = x.shape
    mats = [blk[n] for n in _BLOCK_MATS]
    args = [x, pos_emb, blk["vecs"]] + mats + [blk["dw_w"]]
    in_specs = ([pl.BlockSpec((1, T, D), lambda b: (b, 0, 0)),
                 pl.BlockSpec(pos_emb.shape, lambda b: (0, 0)),
                 pl.BlockSpec(blk["vecs"].shape, lambda b: (0, 0))]
                + [pl.BlockSpec(m.shape, lambda b: (0, 0)) for m in mats]
                + [pl.BlockSpec(blk["dw_w"].shape, lambda b: (0, 0))])
    return pl.pallas_call(
        _conformer_block_kernel,
        out_shape=jax.ShapeDtypeStruct((B, T, D), jnp.float32),
        grid=(B,),
        in_specs=in_specs,
        out_specs=pl.BlockSpec((1, T, D), lambda b: (b, 0, 0)),
        scratch_shapes=[pltpu.VMEM((T, 2 * D), jnp.float32),          # lhs  [q+u | q+v]
                        pltpu.VMEM((T, 2 * D), jnp.float32),          # rhs  [k | p]
                        pltpu.VMEM((T, D), jnp.float32),              # head concat
                        pltpu.VMEM((PAD_LO + T + CONV_PAD, D), jnp.float32)],  # conv pad
        compiler_params=pltpu.CompilerParams(
            dimension_semantics=("parallel",),
            vmem_limit_bytes=64 * 1024 * 1024),
    )(*args)


def astp_head(block_outs, hp):
    B, T, D = block_outs[0].shape
    E = hp["fb"].shape[-1]
    weights = [hp[n] for n in ("w1", "b1", "w2", "b2", "bn_s", "bn_sh", "fw", "fb")]
    in_specs = ([pl.BlockSpec((1, T, D), lambda b: (b, 0, 0)) for _ in block_outs]
                + [pl.BlockSpec(w.shape, lambda b: (0, 0)) for w in weights])
    out = pl.pallas_call(
        partial(_astp_head_kernel, num_blocks=len(block_outs)),
        out_shape=jax.ShapeDtypeStruct((B, 1, E), jnp.float32),
        grid=(B,),
        in_specs=in_specs,
        out_specs=pl.BlockSpec((1, 1, E), lambda b: (b, 0, 0)),
        scratch_shapes=[pltpu.VMEM((T, D * len(block_outs)), jnp.float32)],
        compiler_params=pltpu.CompilerParams(
            dimension_semantics=("parallel",),
            vmem_limit_bytes=64 * 1024 * 1024),
    )(*block_outs, *weights)
    return out.reshape(B, E)


# ================================ JAX glue =====================================

def _im2col(x, kh, kw, sh, sw):
    """NCHW -> (B*Ho*Wo, C*kh*kw) patches matching torch conv weight flattening."""
    B, C, H, W = x.shape
    Ho = (H - kh) // sh + 1
    Wo = (W - kw) // sw + 1
    cols = []
    for i in range(kh):
        for j in range(kw):
            cols.append(x[:, :, i:i + sh * (Ho - 1) + 1:sh, j:j + sw * (Wo - 1) + 1:sw])
    p = jnp.stack(cols, axis=2)                                # (B, C, kh*kw, Ho, Wo)
    p = jnp.transpose(p, (0, 3, 4, 1, 2)).reshape(B * Ho * Wo, C * kh * kw)
    return p, Ho, Wo


def _rel_pos_emb(T, d):
    pos = jnp.arange(T, dtype=jnp.float32)[:, None]
    div = jnp.exp(jnp.arange(0, d, 2, dtype=jnp.float32) * -(math.log(10000.0) / d))
    pe = jnp.zeros((T, d), jnp.float32)
    pe = pe.at[:, 0::2].set(jnp.sin(pos * div))
    pe = pe.at[:, 1::2].set(jnp.cos(pos * div))
    return pe                                                  # (T, d)


def conformer_forward(feat, params):
    B, T, F = feat.shape
    # lens = round(ones * T) -> every padding mask is all-True -> masking is a no-op.

    # ---- Conv2dSubsampling2: Conv2d(1,C,3,s=2)+ReLU, Conv2d(C,C,3,s=1)+ReLU, Linear ----
    x = feat[:, None, :, :]                                    # NCHW (B, 1, T, F)
    p, H1, W1 = _im2col(x, 3, 3, 2, 2)
    y = matmul(p, params["sub"]["conv1_w"], params["sub"]["conv1_b"], "relu")
    x = jnp.transpose(y.reshape(B, H1, W1, D_MODEL), (0, 3, 1, 2))
    p, H2, W2 = _im2col(x, 3, 3, 1, 1)
    y = matmul(p, params["sub"]["conv2_w"], params["sub"]["conv2_b"], "relu")
    x = jnp.transpose(y.reshape(B, H2, W2, D_MODEL), (0, 3, 1, 2))   # (B, C, T', F')
    Tp = H2
    x = jnp.transpose(x, (0, 2, 1, 3)).reshape(B * Tp, D_MODEL * W2)
    # final subsampling Linear with the RelPositionalEncoding sqrt(d_model) scale fused
    x = matmul(x, params["sub"]["out_w"], params["sub"]["out_b"],
               out_scale=math.sqrt(D_MODEL)).reshape(B, Tp, D_MODEL)
    pos_emb = _rel_pos_emb(Tp, D_MODEL)                        # (T', D)

    # ---- Conformer blocks, one fused pallas_call per block ----
    outs = []
    for blk in params["blocks"]:
        x = conformer_block(x, pos_emb, blk)
        outs.append(x)

    # ---- ASTP pooling + BatchNorm1d(eval, folded) + fc; MFA concat done in-kernel ----
    return astp_head(outs, params["head"])                     # (B, EMBED_DIM)


# ============================ deterministic init ===============================

def _fold_bn(g, b, rm, rv, eps=BN_EPS):
    s = g / jnp.sqrt(rv + eps)
    return s, b - rm * s


def _pack_rows(rows):
    out = jnp.zeros((len(rows), VEC_W), jnp.float32)
    for i, r in enumerate(rows):
        r = r.reshape(-1)
        out = out.at[i, :r.shape[0]].set(r)
    return out


def init_params(key):
    keys = iter(jax.random.split(key, 256))

    def rnd(shape, scale=0.05):
        return scale * jax.random.normal(next(keys), shape, dtype=jnp.float32)

    zeros = lambda s: jnp.zeros(s, jnp.float32)
    ones = lambda s: jnp.ones(s, jnp.float32)
    bf = lambda a: a.astype(jnp.bfloat16)

    f2 = (FEAT_DIM - 1) // 2 - 2                               # freq dim after subsampling
    # conv / linear weights stored pre-transposed as (K_in, N_out), bf16
    sub = dict(conv1_w=bf(rnd((1 * 3 * 3, D_MODEL))), conv1_b=rnd((1, D_MODEL)),
               conv2_w=bf(rnd((D_MODEL * 3 * 3, D_MODEL))), conv2_b=rnd((1, D_MODEL)),
               out_w=bf(rnd((D_MODEL * f2, D_MODEL))), out_b=rnd((1, D_MODEL)))

    inv_sqrt_dk = 1.0 / math.sqrt(D_K)
    blocks = []
    for _ in range(NUM_BLOCKS):
        # TODO(synk): BatchNorm1d implemented in eval mode (running stats folded);
        # training-mode batch statistics are not implemented.
        bn_s, bn_sh = _fold_bn(ones((1, D_MODEL)), zeros((1, D_MODEL)),
                               zeros((1, D_MODEL)), ones((1, D_MODEL)))
        dw_b = rnd((1, D_MODEL))
        bn_sh = dw_b * bn_s + bn_sh                            # fold dw-conv bias into BN shift

        qkv_w = rnd((D_MODEL, 3 * D_MODEL))
        qkv_b = rnd((1, 3 * D_MODEL))
        # fold the 1/sqrt(dk) attention scale into the q projection and rel-pos biases
        qkv_w = qkv_w.at[:, :D_MODEL].multiply(inv_sqrt_dk)
        qkv_b = qkv_b.at[:, :D_MODEL].multiply(inv_sqrt_dk)
        pbu = rnd((N_HEADS, D_K)) * inv_sqrt_dk
        pbv = rnd((N_HEADS, D_K)) * inv_sqrt_dk

        vecs = _pack_rows([
            ones((1, D_MODEL)), zeros((1, D_MODEL)),           # ln1 gamma / beta
            rnd((1, FFN_DIM)), rnd((1, D_MODEL)),              # macaron FFN biases
            ones((1, D_MODEL)), zeros((1, D_MODEL)),           # ln2
            qkv_b, pbu, pbv, rnd((1, D_MODEL)),                # qkv bias, pos biases, out bias
            ones((1, D_MODEL)), zeros((1, D_MODEL)),           # ln3
            rnd((1, D_MODEL)), rnd((1, D_MODEL)),              # GLU content / gate biases
            bn_s, bn_sh, rnd((1, D_MODEL)),                    # folded BN, pw2 bias
            ones((1, D_MODEL)), zeros((1, D_MODEL)),           # ln4
            rnd((1, FFN_DIM)), rnd((1, D_MODEL)),              # final FFN biases
            ones((1, D_MODEL)), zeros((1, D_MODEL)),           # ln5
        ])
        blocks.append(dict(
            vecs=vecs,
            dw_w=rnd((CNN_KERNEL, D_MODEL)),                   # depthwise taps (K, D), f32
            fm_w1=bf(rnd((D_MODEL, FFN_DIM))), fm_w2=bf(rnd((FFN_DIM, D_MODEL))),
            qkv_w=bf(qkv_w), pos_w=bf(rnd((D_MODEL, D_MODEL))),
            out_w=bf(rnd((D_MODEL, D_MODEL))),
            pw1a_w=bf(rnd((D_MODEL, D_MODEL))), pw1g_w=bf(rnd((D_MODEL, D_MODEL))),
            pw2_w=bf(rnd((D_MODEL, D_MODEL))),
            ff_w1=bf(rnd((D_MODEL, FFN_DIM))), ff_w2=bf(rnd((FFN_DIM, D_MODEL))),
        ))

    dtot = D_MODEL * NUM_BLOCKS
    h_bn_s, h_bn_sh = _fold_bn(ones((1, 2 * dtot)), zeros((1, 2 * dtot)),
                               zeros((1, 2 * dtot)), ones((1, 2 * dtot)))
    head = dict(w1=bf(rnd((dtot, BOTTLENECK))), b1=rnd((1, BOTTLENECK)),
                w2=bf(rnd((BOTTLENECK, dtot))), b2=rnd((1, dtot)),
                bn_s=h_bn_s, bn_sh=h_bn_sh,
                fw=bf(rnd((2 * dtot, EMBED_DIM))), fb=rnd((1, EMBED_DIM)))
    return dict(sub=sub, blocks=blocks, head=head)


# =================================== main ======================================

if __name__ == "__main__":
    root = jax.random.PRNGKey(0)
    pkey, dkey = jax.random.split(root)
    params = init_params(pkey)
    feat = jax.random.normal(dkey, (BATCH, SEQ, FEAT_DIM), dtype=jnp.float32)

    out = jax.jit(conformer_forward)(feat, params)
    out = jax.block_until_ready(out)
    assert out.shape == (BATCH, EMBED_DIM)
    assert bool(jnp.all(jnp.isfinite(out)))
    print("KERNEL_OK")
</pallas_src>

<mosaic_0001>
module attributes {stable_mosaic.version = 11 : i64} {
  func.func @_matmul_kernel(%arg0: i32, %arg1: memref<98x9xf32, #tpu.memory_space<vmem>>, %arg2: memref<9x32xbf16, #tpu.memory_space<vmem>>, %arg3: memref<1x32xf32, #tpu.memory_space<vmem>>, %arg4: memref<98x32xf32, #tpu.memory_space<vmem>>) attributes {dimension_semantics = [#tpu.dimension_semantics<parallel>], iteration_bounds = array<i64: 1>, scalar_prefetch = 0 : i64, scratch_operands = 0 : i64, tpu.core_type = #tpu.core_type<tc>, window_params = [{transform_indices = @transform_0, window_bounds = array<i64: 98, 9>}, {pipeline_mode = #tpu.pipeline_mode<synchronous>, transform_indices = @transform_1, window_bounds = array<i64: 9, 32>}, {pipeline_mode = #tpu.pipeline_mode<synchronous>, transform_indices = @transform_2, window_bounds = array<i64: 1, 32>}, {transform_indices = @transform_3, window_bounds = array<i64: 98, 32>}]} {
    %c0 = arith.constant 0 : index
    %c0_0 = arith.constant 0 : index
    %0 = vector.load %arg1[%c0, %c0_0] : memref<98x9xf32, #tpu.memory_space<vmem>>, vector<98x9xf32>
    %1 = arith.truncf %0 : vector<98x9xf32> to vector<98x9xbf16>
    %c0_1 = arith.constant 0 : index
    %c0_2 = arith.constant 0 : index
    %2 = vector.load %arg2[%c0_1, %c0_2] : memref<9x32xbf16, #tpu.memory_space<vmem>>, vector<9x32xbf16>
    %cst = arith.constant dense<0.000000e+00> : vector<98x32xf32>
    %3 = tpu.matmul %1, %2, %cst {dimension_numbers = #tpu.dot_dimension_numbers<[1], [0], [0], [1], [0, 0, 1, 1], [], []>} : vector<98x9xbf16>, vector<9x32xbf16>, vector<98x32xf32> -> vector<98x32xf32>
    %c0_3 = arith.constant 0 : index
    %c0_4 = arith.constant 0 : index
    %4 = vector.load %arg3[%c0_3, %c0_4] : memref<1x32xf32, #tpu.memory_space<vmem>>, vector<1x32xf32>
    %5 = vector.broadcast %4 : vector<1x32xf32> to vector<98x32xf32>
    %6 = arith.addf %3, %5 : vector<98x32xf32>
    %cst_5 = arith.constant 0.000000e+00 : f32
    %7 = vector.broadcast %cst_5 : f32 to vector<98x32xf32>
    %8 = arith.maximumf %6, %7 : vector<98x32xf32>
    %c0_6 = arith.constant 0 : index
    %c0_7 = arith.constant 0 : index
    %9 = vector.load %arg4[%c0_6, %c0_7] : memref<98x32xf32, #tpu.memory_space<vmem>>, vector<98x32xf32>
    tpu.vector_store %arg4[%c0_6, %c0_7], %8 {strides = array<i32>} : memref<98x32xf32, #tpu.memory_space<vmem>>, vector<98x32xf32>,
    return
  }
  func.func @transform_0(%arg0: i32) -> (i32, i32) {
    %c0_i32 = arith.constant 0 : i32
    %c0_i32_0 = arith.constant 0 : i32
    return %arg0, %c0_i32 : i32, i32
  }
  func.func @transform_1(%arg0: i32) -> (i32, i32) {
    %c0_i32 = arith.constant 0 : i32
    %c0_i32_0 = arith.constant 0 : i32
    %c0_i32_1 = arith.constant 0 : i32
    return %c0_i32, %c0_i32_0 : i32, i32
  }
  func.func @transform_2(%arg0: i32) -> (i32, i32) {
    %c0_i32 = arith.constant 0 : i32
    %c0_i32_0 = arith.constant 0 : i32
    %c0_i32_1 = arith.constant 0 : i32
    return %c0_i32, %c0_i32_0 : i32, i32
  }
  func.func @transform_3(%arg0: i32) -> (i32, i32) {
    %c0_i32 = arith.constant 0 : i32
    %c0_i32_0 = arith.constant 0 : i32
    return %arg0, %c0_i32 : i32, i32
  }
}

module attributes {stable_mosaic.version = 11 : i64} {
  func.func @_matmul_kernel(%arg0: i32, %arg1: memref<50x288xf32, #tpu.memory_space<vmem>>, %arg2: memref<288x32xbf16, #tpu.memory_space<vmem>>, %arg3: memref<1x32xf32, #tpu.memory_space<vmem>>, %arg4: memref<50x32xf32, #tpu.memory_space<vmem>>) attributes {dimension_semantics = [#tpu.dimension_semantics<parallel>], iteration_bounds = array<i64: 1>, scalar_prefetch = 0 : i64, scratch_operands = 0 : i64, tpu.core_type = #tpu.core_type<tc>, window_params = [{transform_indices = @transform_0, window_bounds = array<i64: 50, 288>}, {pipeline_mode = #tpu.pipeline_mode<synchronous>, transform_indices = @transform_1, window_bounds = array<i64: 288, 32>}, {pipeline_mode = #tpu.pipeline_mode<synchronous>, transform_indices = @transform_2, window_bounds = array<i64: 1, 32>}, {transform_indices = @transform_3, window_bounds = array<i64: 50, 32>}]} {
    %c0 = arith.constant 0 : index
    %c0_0 = arith.constant 0 : index
    %0 = vector.load %arg1[%c0, %c0_0] : memref<50x288xf32, #tpu.memory_space<vmem>>, vector<50x288xf32>
    %1 = arith.truncf %0 : vector<50x288xf32> to vector<50x288xbf16>
    %c0_1 = arith.constant 0 : index
    %c0_2 = arith.constant 0 : index
    %2 = vector.load %arg2[%c0_1, %c0_2] : memref<288x32xbf16, #tpu.memory_space<vmem>>, vector<288x32xbf16>
    %cst = arith.constant dense<0.000000e+00> : vector<50x32xf32>
    %3 = tpu.matmul %1, %2, %cst {dimension_numbers = #tpu.dot_dimension_numbers<[1], [0], [0], [1], [0, 0, 1, 1], [], []>} : vector<50x288xbf16>, vector<288x32xbf16>, vector<50x32xf32> -> vector<50x32xf32>
    %c0_3 = arith.constant 0 : index
    %c0_4 = arith.constant 0 : index
    %4 = vector.load %arg3[%c0_3, %c0_4] : memref<1x32xf32, #tpu.memory_space<vmem>>, vector<1x32xf32>
    %5 = vector.broadcast %4 : vector<1x32xf32> to vector<50x32xf32>
    %6 = arith.addf %3, %5 : vector<50x32xf32>
    %cst_5 = arith.constant 0.000000e+00 : f32
    %7 = vector.broadcast %cst_5 : f32 to vector<50x32xf32>
    %8 = arith.maximumf %6, %7 : vector<50x32xf32>
    %c0_6 = arith.constant 0 : index
    %c0_7 = arith.constant 0 : index
    %9 = vector.load %arg4[%c0_6, %c0_7] : memref<50x32xf32, #tpu.memory_space<vmem>>, vector<50x32xf32>
    tpu.vector_store %arg4[%c0_6, %c0_7], %8 {strides = array<i32>} : memref<50x32xf32, #tpu.memory_space<vmem>>, vector<50x32xf32>,
    return
  }
  func.func @transform_0(%arg0: i32) -> (i32, i32) {
    %c0_i32 = arith.constant 0 : i32
    %c0_i32_0 = arith.constant 0 : i32
    return %arg0, %c0_i32 : i32, i32
  }
  func.func @transform_1(%arg0: i32) -> (i32, i32) {
    %c0_i32 = arith.constant 0 : i32
    %c0_i32_0 = arith.constant 0 : i32
    %c0_i32_1 = arith.constant 0 : i32
    return %c0_i32, %c0_i32_0 : i32, i32
  }
  func.func @transform_2(%arg0: i32) -> (i32, i32) {
    %c0_i32 = arith.constant 0 : i32
    %c0_i32_0 = arith.constant 0 : i32
    %c0_i32_1 = arith.constant 0 : i32
    return %c0_i32, %c0_i32_0 : i32, i32
  }
  func.func @transform_3(%arg0: i32) -> (i32, i32) {
    %c0_i32 = arith.constant 0 : i32
    %c0_i32_0 = arith.constant 0 : i32
    return %arg0, %c0_i32 : i32, i32
  }
}

module attributes {stable_mosaic.version = 11 : i64} {
  func.func @_matmul_kernel(%arg0: i32, %arg1: memref<10x160xf32, #tpu.memory_space<vmem>>, %arg2: memref<160x32xbf16, #tpu.memory_space<vmem>>, %arg3: memref<1x32xf32, #tpu.memory_space<vmem>>, %arg4: memref<10x32xf32, #tpu.memory_space<vmem>>) attributes {dimension_semantics = [#tpu.dimension_semantics<parallel>], iteration_bounds = array<i64: 1>, scalar_prefetch = 0 : i64, scratch_operands = 0 : i64, tpu.core_type = #tpu.core_type<tc>, window_params = [{transform_indices = @transform_0, window_bounds = array<i64: 10, 160>}, {pipeline_mode = #tpu.pipeline_mode<synchronous>, transform_indices = @transform_1, window_bounds = array<i64: 160, 32>}, {pipeline_mode = #tpu.pipeline_mode<synchronous>, transform_indices = @transform_2, window_bounds = array<i64: 1, 32>}, {transform_indices = @transform_3, window_bounds = array<i64: 10, 32>}]} {
    %c0 = arith.constant 0 : index
    %c0_0 = arith.constant 0 : index
    %0 = vector.load %arg1[%c0, %c0_0] : memref<10x160xf32, #tpu.memory_space<vmem>>, vector<10x160xf32>
    %1 = arith.truncf %0 : vector<10x160xf32> to vector<10x160xbf16>
    %c0_1 = arith.constant 0 : index
    %c0_2 = arith.constant 0 : index
    %2 = vector.load %arg2[%c0_1, %c0_2] : memref<160x32xbf16, #tpu.memory_space<vmem>>, vector<160x32xbf16>
    %cst = arith.constant dense<0.000000e+00> : vector<10x32xf32>
    %3 = tpu.matmul %1, %2, %cst {dimension_numbers = #tpu.dot_dimension_numbers<[1], [0], [0], [1], [0, 0, 1, 1], [], []>} : vector<10x160xbf16>, vector<160x32xbf16>, vector<10x32xf32> -> vector<10x32xf32>
    %c0_3 = arith.constant 0 : index
    %c0_4 = arith.constant 0 : index
    %4 = vector.load %arg3[%c0_3, %c0_4] : memref<1x32xf32, #tpu.memory_space<vmem>>, vector<1x32xf32>
    %5 = vector.broadcast %4 : vector<1x32xf32> to vector<10x32xf32>
    %6 = arith.addf %3, %5 : vector<10x32xf32>
    %cst_5 = arith.constant 5.65685415 : f32
    %7 = vector.broadcast %cst_5 : f32 to vector<10x32xf32>
    %8 = arith.mulf %6, %7 : vector<10x32xf32>
    %c0_6 = arith.constant 0 : index
    %c0_7 = arith.constant 0 : index
    %9 = vector.load %arg4[%c0_6, %c0_7] : memref<10x32xf32, #tpu.memory_space<vmem>>, vector<10x32xf32>
    tpu.vector_store %arg4[%c0_6, %c0_7], %8 {strides = array<i32>} : memref<10x32xf32, #tpu.memory_space<vmem>>, vector<10x32xf32>,
    return
  }
  func.func @transform_0(%arg0: i32) -> (i32, i32) {
    %c0_i32 = arith.constant 0 : i32
    %c0_i32_0 = arith.constant 0 : i32
    return %arg0, %c0_i32 : i32, i32
  }
  func.func @transform_1(%arg0: i32) -> (i32, i32) {
    %c0_i32 = arith.constant 0 : i32
    %c0_i32_0 = arith.constant 0 : i32
    %c0_i32_1 = arith.constant 0 : i32
    return %c0_i32, %c0_i32_0 : i32, i32
  }
  func.func @transform_2(%arg0: i32) -> (i32, i32) {
    %c0_i32 = arith.constant 0 : i32
    %c0_i32_0 = arith.constant 0 : i32
    %c0_i32_1 = arith.constant 0 : i32
    return %c0_i32, %c0_i32_0 : i32, i32
  }
  func.func @transform_3(%arg0: i32) -> (i32, i32) {
    %c0_i32 = arith.constant 0 : i32
    %c0_i32_0 = arith.constant 0 : i32
    return %arg0, %c0_i32 : i32, i32
  }
}

module attributes {stable_mosaic.version = 11 : i64} {
  func.func @_astp_head_kernel(%arg0: i32, %arg1: memref<1x5x32xf32, #tpu.memory_space<vmem>>, %arg2: memref<1x5x32xf32, #tpu.memory_space<vmem>>, %arg3: memref<64x32xbf16, #tpu.memory_space<vmem>>, %arg4: memref<1x32xf32, #tpu.memory_space<vmem>>, %arg5: memref<32x64xbf16, #tpu.memory_space<vmem>>, %arg6: memref<1x64xf32, #tpu.memory_space<vmem>>, %arg7: memref<1x128xf32, #tpu.memory_space<vmem>>, %arg8: memref<1x128xf32, #tpu.memory_space<vmem>>, %arg9: memref<128x16xbf16, #tpu.memory_space<vmem>>, %arg10: memref<1x16xf32, #tpu.memory_space<vmem>>, %arg11: memref<1x1x16xf32, #tpu.memory_space<vmem>>, %arg12: memref<5x64xf32, #tpu.memory_space<vmem>>) attributes {dimension_semantics = [#tpu.dimension_semantics<parallel>], iteration_bounds = array<i64: 2>, scalar_prefetch = 0 : i64, scratch_operands = 1 : i64, tpu.core_type = #tpu.core_type<tc>, window_params = [{transform_indices = @transform_0, window_bounds = array<i64: 1, 5, 32>}, {transform_indices = @transform_1, window_bounds = array<i64: 1, 5, 32>}, {pipeline_mode = #tpu.pipeline_mode<synchronous>, transform_indices = @transform_2, window_bounds = array<i64: 64, 32>}, {pipeline_mode = #tpu.pipeline_mode<synchronous>, transform_indices = @transform_3, window_bounds = array<i64: 1, 32>}, {pipeline_mode = #tpu.pipeline_mode<synchronous>, transform_indices = @transform_4, window_bounds = array<i64: 32, 64>}, {pipeline_mode = #tpu.pipeline_mode<synchronous>, transform_indices = @transform_5, window_bounds = array<i64: 1, 64>}, {pipeline_mode = #tpu.pipeline_mode<synchronous>, transform_indices = @transform_6, window_bounds = array<i64: 1, 128>}, {pipeline_mode = #tpu.pipeline_mode<synchronous>, transform_indices = @transform_7, window_bounds = array<i64: 1, 128>}, {pipeline_mode = #tpu.pipeline_mode<synchronous>, transform_indices = @transform_8, window_bounds = array<i64: 128, 16>}, {pipeline_mode = #tpu.pipeline_mode<synchronous>, transform_indices = @transform_9, window_bounds = array<i64: 1, 16>}, {transform_indices = @transform_10, window_bounds = array<i64: 1, 1, 16>}]} {
    %c0 = arith.constant 0 : index
    %c0_0 = arith.constant 0 : index
    %c0_1 = arith.constant 0 : index
    %0 = vector.load %arg1[%c0, %c0_0, %c0_1] : memref<1x5x32xf32, #tpu.memory_space<vmem>>, vector<1x5x32xf32>
    %1 = vector.shape_cast %0 : vector<1x5x32xf32> to vector<5x32xf32>
    %c0_2 = arith.constant 0 : index
    %c0_3 = arith.constant 0 : index
    %2 = vector.load %arg12[%c0_2, %c0_3] : memref<5x64xf32, #tpu.memory_space<vmem>>, vector<5x32xf32>
    tpu.vector_store %arg12[%c0_2, %c0_3], %1 {strides = array<i32>} : memref<5x64xf32, #tpu.memory_space<vmem>>, vector<5x32xf32>,
    %c0_4 = arith.constant 0 : index
    %c0_5 = arith.constant 0 : index
    %c0_6 = arith.constant 0 : index
    %3 = vector.load %arg2[%c0_4, %c0_5, %c0_6] : memref<1x5x32xf32, #tpu.memory_space<vmem>>, vector<1x5x32xf32>
    %4 = vector.shape_cast %3 : vector<1x5x32xf32> to vector<5x32xf32>
    %c0_7 = arith.constant 0 : index
    %c32 = arith.constant 32 : index
    %5 = vector.load %arg12[%c0_7, %c32] : memref<5x64xf32, #tpu.memory_space<vmem>>, vector<5x32xf32>
    tpu.vector_store %arg12[%c0_7, %c32], %4 {strides = array<i32>} : memref<5x64xf32, #tpu.memory_space<vmem>>, vector<5x32xf32>,
    %c0_8 = arith.constant 0 : index
    %c0_9 = arith.constant 0 : index
    %6 = vector.load %arg12[%c0_8, %c0_9] : memref<5x64xf32, #tpu.memory_space<vmem>>, vector<5x64xf32>
    %7 = arith.truncf %6 : vector<5x64xf32> to vector<5x64xbf16>
    %c0_10 = arith.constant 0 : index
    %c0_11 = arith.constant 0 : index
    %8 = vector.load %arg3[%c0_10, %c0_11] : memref<64x32xbf16, #tpu.memory_space<vmem>>, vector<64x32xbf16>
    %cst = arith.constant dense<0.000000e+00> : vector<5x32xf32>
    %9 = tpu.matmul %7, %8, %cst {dimension_numbers = #tpu.dot_dimension_numbers<[1], [0], [0], [1], [0, 0, 1, 1], [], []>} : vector<5x64xbf16>, vector<64x32xbf16>, vector<5x32xf32> -> vector<5x32xf32>
    %c0_12 = arith.constant 0 : index
    %c0_13 = arith.constant 0 : index
    %10 = vector.load %arg4[%c0_12, %c0_13] : memref<1x32xf32, #tpu.memory_space<vmem>>, vector<1x32xf32>
    %11 = vector.broadcast %10 : vector<1x32xf32> to vector<5x32xf32>
    %12 = arith.addf %9, %11 : vector<5x32xf32>
    %13 = math.tanh %12 : vector<5x32xf32>
    %14 = arith.truncf %13 : vector<5x32xf32> to vector<5x32xbf16>
    %c0_14 = arith.constant 0 : index
    %c0_15 = arith.constant 0 : index
    %15 = vector.load %arg5[%c0_14, %c0_15] : memref<32x64xbf16, #tpu.memory_space<vmem>>, vector<32x64xbf16>
    %cst_16 = arith.constant dense<0.000000e+00> : vector<5x64xf32>
    %16 = tpu.matmul %14, %15, %cst_16 {dimension_numbers = #tpu.dot_dimension_numbers<[1], [0], [0], [1], [0, 0, 1, 1], [], []>} : vector<5x32xbf16>, vector<32x64xbf16>, vector<5x64xf32> -> vector<5x64xf32>
    %c0_17 = arith.constant 0 : index
    %c0_18 = arith.constant 0 : index
    %17 = vector.load %arg6[%c0_17, %c0_18] : memref<1x64xf32, #tpu.memory_space<vmem>>, vector<1x64xf32>
    %18 = vector.broadcast %17 : vector<1x64xf32> to vector<5x64xf32>
    %19 = arith.addf %16, %18 : vector<5x64xf32>
    %cst_19 = arith.constant dense<0xFF800000> : vector<64xf32>
    %20 = vector.multi_reduction <maximumf>, %19, %cst_19 [0] : vector<5x64xf32> to vector<64xf32>
    %21 = vector.shape_cast %20 : vector<64xf32> to vector<1x64xf32>
    %22 = vector.broadcast %21 : vector<1x64xf32> to vector<5x64xf32>
    %23 = arith.subf %19, %22 : vector<5x64xf32>
    %24 = math.exp %23 : vector<5x64xf32>
    %cst_20 = arith.constant dense<0.000000e+00> : vector<64xf32>
    %25 = vector.multi_reduction <add>, %24, %cst_20 [0] : vector<5x64xf32> to vector<64xf32>
    %26 = vector.shape_cast %25 : vector<64xf32> to vector<1x64xf32>
    %cst_21 = arith.constant 1.000000e+00 : f32
    %27 = vector.broadcast %cst_21 : f32 to vector<1x64xf32>
    %28 = arith.divf %27, %26 : vector<1x64xf32>
    %29 = vector.broadcast %28 : vector<1x64xf32> to vector<5x64xf32>
    %30 = arith.mulf %24, %29 : vector<5x64xf32>
    %31 = arith.mulf %30, %6 : vector<5x64xf32>
    %cst_22 = arith.constant dense<0.000000e+00> : vector<64xf32>
    %32 = vector.multi_reduction <add>, %31, %cst_22 [0] : vector<5x64xf32> to vector<64xf32>
    %33 = vector.shape_cast %32 : vector<64xf32> to vector<1x64xf32>
    %34 = arith.mulf %30, %6 : vector<5x64xf32>
    %35 = arith.mulf %34, %6 : vector<5x64xf32>
    %cst_23 = arith.constant dense<0.000000e+00> : vector<64xf32>
    %36 = vector.multi_reduction <add>, %35, %cst_23 [0] : vector<5x64xf32> to vector<64xf32>
    %37 = vector.shape_cast %36 : vector<64xf32> to vector<1x64xf32>
    %38 = arith.mulf %33, %33 : vector<1x64xf32>
    %39 = arith.subf %37, %38 : vector<1x64xf32>
    %cst_24 = arith.constant 1.000000e-07 : f32
    %40 = vector.broadcast %cst_24 : f32 to vector<1x64xf32>
    %41 = arith.maximumf %39, %40 : vector<1x64xf32>
    %42 = math.sqrt %41 : vector<1x64xf32>
    %c0_25 = arith.constant 0 : index
    %c0_26 = arith.constant 0 : index
    %43 = vector.load %arg7[%c0_25, %c0_26] : memref<1x128xf32, #tpu.memory_space<vmem>>, vector<1x64xf32>
    %44 = arith.mulf %33, %43 : vector<1x64xf32>
    %c0_27 = arith.constant 0 : index
    %c0_28 = arith.constant 0 : index
    %45 = vector.load %arg8[%c0_27, %c0_28] : memref<1x128xf32, #tpu.memory_space<vmem>>, vector<1x64xf32>
    %46 = arith.addf %44, %45 : vector<1x64xf32>
    %c0_29 = arith.constant 0 : index
    %c64 = arith.constant 64 : index
    %47 = vector.load %arg7[%c0_29, %c64] : memref<1x128xf32, #tpu.memory_space<vmem>>, vector<1x64xf32>
    %48 = arith.mulf %42, %47 : vector<1x64xf32>
    %c0_30 = arith.constant 0 : index
    %c64_31 = arith.constant 64 : index
    %49 = vector.load %arg8[%c0_30, %c64_31] : memref<1x128xf32, #tpu.memory_space<vmem>>, vector<1x64xf32>
    %50 = arith.addf %48, %49 : vector<1x64xf32>
    %51 = arith.truncf %46 : vector<1x64xf32> to vector<1x64xbf16>
    %c0_32 = arith.constant 0 : index
    %c0_33 = arith.constant 0 : index
    %52 = vector.load %arg9[%c0_32, %c0_33] : memref<128x16xbf16, #tpu.memory_space<vmem>>, vector<64x16xbf16>
    %cst_34 = arith.constant dense<0.000000e+00> : vector<1x16xf32>
    %53 = tpu.matmul %51, %52, %cst_34 {dimension_numbers = #tpu.dot_dimension_numbers<[1], [0], [0], [1], [0, 0, 1, 1], [], []>} : vector<1x64xbf16>, vector<64x16xbf16>, vector<1x16xf32> -> vector<1x16xf32>
    %54 = arith.truncf %50 : vector<1x64xf32> to vector<1x64xbf16>
    %c64_35 = arith.constant 64 : index
    %c0_36 = arith.constant 0 : index
    %55 = vector.load %arg9[%c64_35, %c0_36] : memref<128x16xbf16, #tpu.memory_space<vmem>>, vector<64x16xbf16>
    %cst_37 = arith.constant dense<0.000000e+00> : vector<1x16xf32>
    %56 = tpu.matmul %54, %55, %cst_37 {dimension_numbers = #tpu.dot_dimension_numbers<[1], [0], [0], [1], [0, 0, 1, 1], [], []>} : vector<1x64xbf16>, vector<64x16xbf16>, vector<1x16xf32> -> vector<1x16xf32>
    %57 = arith.addf %53, %56 : vector<1x16xf32>
    %c0_38 = arith.constant 0 : index
    %c0_39 = arith.constant 0 : index
    %58 = vector.load %arg10[%c0_38, %c0_39] : memref<1x16xf32, #tpu.memory_space<vmem>>, vector<1x16xf32>
    %59 = arith.addf %57, %58 : vector<1x16xf32>
    %c0_40 = arith.constant 0 : index
    %c0_41 = arith.constant 0 : index
    %c0_42 = arith.constant 0 : index
    %60 = vector.load %arg11[%c0_40, %c0_41, %c0_42] : memref<1x1x16xf32, #tpu.memory_space<vmem>>, vector<1x1x16xf32>
    %61 = vector.shape_cast %60 : vector<1x1x16xf32> to vector<1x16xf32>
    %62 = vector.shape_cast %59 : vector<1x16xf32> to vector<1x1x16xf32>
    tpu.vector_store %arg11[%c0_40, %c0_41, %c0_42], %62 {strides = array<i32>} : memref<1x1x16xf32, #tpu.memory_space<vmem>>, vector<1x1x16xf32>,
    return
  }
  func.func @transform_0(%arg0: i32) -> (i32, i32, i32) {
    %c0_i32 = arith.constant 0 : i32
    %c0_i32_0 = arith.constant 0 : i32
    %c0_i32_1 = arith.constant 0 : i32
    return %arg0, %c0_i32, %c0_i32_0 : i32, i32, i32
  }
  func.func @transform_1(%arg0: i32) -> (i32, i32, i32) {
    %c0_i32 = arith.constant 0 : i32
    %c0_i32_0 = arith.constant 0 : i32
    %c0_i32_1 = arith.constant 0 : i32
    return %arg0, %c0_i32, %c0_i32_0 : i32, i32, i32
  }
  func.func @transform_2(%arg0: i32) -> (i32, i32) {
    %c0_i32 = arith.constant 0 : i32
    %c0_i32_0 = arith.constant 0 : i32
    %c0_i32_1 = arith.constant 0 : i32
    return %c0_i32, %c0_i32_0 : i32, i32
  }
  func.func @transform_3(%arg0: i32) -> (i32, i32) {
    %c0_i32 = arith.constant 0 : i32
    %c0_i32_0 = arith.constant 0 : i32
    %c0_i32_1 = arith.constant 0 : i32
    return %c0_i32, %c0_i32_0 : i32, i32
  }
  func.func @transform_4(%arg0: i32) -> (i32, i32) {
    %c0_i32 = arith.constant 0 : i32
    %c0_i32_0 = arith.constant 0 : i32
    %c0_i32_1 = arith.constant 0 : i32
    return %c0_i32, %c0_i32_0 : i32, i32
  }
  func.func @transform_5(%arg0: i32) -> (i32, i32) {
    %c0_i32 = arith.constant 0 : i32
    %c0_i32_0 = arith.constant 0 : i32
    %c0_i32_1 = arith.constant 0 : i32
    return %c0_i32, %c0_i32_0 : i32, i32
  }
  func.func @transform_6(%arg0: i32) -> (i32, i32) {
    %c0_i32 = arith.constant 0 : i32
    %c0_i32_0 = arith.constant 0 : i32
    %c0_i32_1 = arith.constant 0 : i32
    return %c0_i32, %c0_i32_0 : i32, i32
  }
  func.func @transform_7(%arg0: i32) -> (i32, i32) {
    %c0_i32 = arith.constant 0 : i32
    %c0_i32_0 = arith.constant 0 : i32
    %c0_i32_1 = arith.constant 0 : i32
    return %c0_i32, %c0_i32_0 : i32, i32
  }
  func.func @transform_8(%arg0: i32) -> (i32, i32) {
    %c0_i32 = arith.constant 0 : i32
    %c0_i32_0 = arith.constant 0 : i32
    %c0_i32_1 = arith.constant 0 : i32
    return %c0_i32, %c0_i32_0 : i32, i32
  }
  func.func @transform_9(%arg0: i32) -> (i32, i32) {
    %c0_i32 = arith.constant 0 : i32
    %c0_i32_0 = arith.constant 0 : i32
    %c0_i32_1 = arith.constant 0 : i32
    return %c0_i32, %c0_i32_0 : i32, i32
  }
  func.func @transform_10(%arg0: i32) -> (i32, i32, i32) {
    %c0_i32 = arith.constant 0 : i32
    %c0_i32_0 = arith.constant 0 : i32
    %c0_i32_1 = arith.constant 0 : i32
    return %arg0, %c0_i32, %c0_i32_0 : i32, i32, i32
  }
}

module attributes {stable_mosaic.version = 11 : i64} {
  func.func @_conformer_block_kernel(%arg0: i32, %arg1: memref<1x5x32xf32, #tpu.memory_space<vmem>>, %arg2: memref<5x32xf32, #tpu.memory_space<vmem>>, %arg3: memref<23x96xf32, #tpu.memory_space<vmem>>, %arg4: memref<32x64xbf16, #tpu.memory_space<vmem>>, %arg5: memref<64x32xbf16, #tpu.memory_space<vmem>>, %arg6: memref<32x96xbf16, #tpu.memory_space<vmem>>, %arg7: memref<32x32xbf16, #tpu.memory_space<vmem>>, %arg8: memref<32x32xbf16, #tpu.memory_space<vmem>>, %arg9: memref<32x32xbf16, #tpu.memory_space<vmem>>, %arg10: memref<32x32xbf16, #tpu.memory_space<vmem>>, %arg11: memref<32x32xbf16, #tpu.memory_space<vmem>>, %arg12: memref<32x64xbf16, #tpu.memory_space<vmem>>, %arg13: memref<64x32xbf16, #tpu.memory_space<vmem>>, %arg14: memref<15x32xf32, #tpu.memory_space<vmem>>, %arg15: memref<1x5x32xf32, #tpu.memory_space<vmem>>, %arg16: memref<5x64xf32, #tpu.memory_space<vmem>>, %arg17: memref<5x64xf32, #tpu.memory_space<vmem>>, %arg18: memref<5x32xf32, #tpu.memory_space<vmem>>, %arg19: memref<20x32xf32, #tpu.memory_space<vmem>>) attributes {dimension_semantics = [#tpu.dimension_semantics<parallel>], iteration_bounds = array<i64: 2>, scalar_prefetch = 0 : i64, scratch_operands = 4 : i64, tpu.core_type = #tpu.core_type<tc>, window_params = [{transform_indices = @transform_0, window_bounds = array<i64: 1, 5, 32>}, {pipeline_mode = #tpu.pipeline_mode<synchronous>, transform_indices = @transform_1, window_bounds = array<i64: 5, 32>}, {pipeline_mode = #tpu.pipeline_mode<synchronous>, transform_indices = @transform_2, window_bounds = array<i64: 23, 96>}, {pipeline_mode = #tpu.pipeline_mode<synchronous>, transform_indices = @transform_3, window_bounds = array<i64: 32, 64>}, {pipeline_mode = #tpu.pipeline_mode<synchronous>, transform_indices = @transform_4, window_bounds = array<i64: 64, 32>}, {pipeline_mode = #tpu.pipeline_mode<synchronous>, transform_indices = @transform_5, window_bounds = array<i64: 32, 96>}, {pipeline_mode = #tpu.pipeline_mode<synchronous>, transform_indices = @transform_6, window_bounds = array<i64: 32, 32>}, {pipeline_mode = #tpu.pipeline_mode<synchronous>, transform_indices = @transform_7, window_bounds = array<i64: 32, 32>}, {pipeline_mode = #tpu.pipeline_mode<synchronous>, transform_indices = @transform_8, window_bounds = array<i64: 32, 32>}, {pipeline_mode = #tpu.pipeline_mode<synchronous>, transform_indices = @transform_9, window_bounds = array<i64: 32, 32>}, {pipeline_mode = #tpu.pipeline_mode<synchronous>, transform_indices = @transform_10, window_bounds = array<i64: 32, 32>}, {pipeline_mode = #tpu.pipeline_mode<synchronous>, transform_indices = @transform_11, window_bounds = array<i64: 32, 64>}, {pipeline_mode = #tpu.pipeline_mode<synchronous>, transform_indices = @transform_12, window_bounds = array<i64: 64, 32>}, {pipeline_mode = #tpu.pipeline_mode<synchronous>, transform_indices = @transform_13, window_bounds = array<i64: 15, 32>}, {transform_indices = @transform_14, window_bounds = array<i64: 1, 5, 32>}]} {
    %c0 = arith.constant 0 : index
    %c0_0 = arith.constant 0 : index
    %c0_1 = arith.constant 0 : index
    %0 = vector.load %arg1[%c0, %c0_0, %c0_1] : memref<1x5x32xf32, #tpu.memory_space<vmem>>, vector<1x5x32xf32>
    %1 = vector.shape_cast %0 : vector<1x5x32xf32> to vector<5x32xf32>
    %cst = arith.constant dense<0.000000e+00> : vector<5xf32>
    %2 = vector.multi_reduction <add>, %1, %cst [1] : vector<5x32xf32> to vector<5xf32>
    %3 = vector.shape_cast %2 : vector<5xf32> to vector<5x1xf32>
    %cst_2 = arith.constant 3.200000e+01 : f32
    %4 = vector.broadcast %cst_2 : f32 to vector<5x1xf32>
    %5 = arith.divf %3, %4 : vector<5x1xf32>
    %6 = vector.broadcast %5 : vector<5x1xf32> to vector<5x32xf32>
    %7 = arith.subf %1, %6 : vector<5x32xf32>
    %8 = arith.mulf %7, %7 : vector<5x32xf32>
    %cst_3 = arith.constant dense<0.000000e+00> : vector<5xf32>
    %9 = vector.multi_reduction <add>, %8, %cst_3 [1] : vector<5x32xf32> to vector<5xf32>
    %10 = vector.shape_cast %9 : vector<5xf32> to vector<5x1xf32>
    %cst_4 = arith.constant 3.200000e+01 : f32
    %11 = vector.broadcast %cst_4 : f32 to vector<5x1xf32>
    %12 = arith.divf %10, %11 : vector<5x1xf32>
    %13 = vector.broadcast %5 : vector<5x1xf32> to vector<5x32xf32>
    %14 = arith.subf %1, %13 : vector<5x32xf32>
    %cst_5 = arith.constant 9.99999974E-6 : f32
    %15 = vector.broadcast %cst_5 : f32 to vector<5x1xf32>
    %16 = arith.addf %12, %15 : vector<5x1xf32>
    %17 = math.rsqrt %16 : vector<5x1xf32>
    %18 = vector.broadcast %17 : vector<5x1xf32> to vector<5x32xf32>
    %19 = arith.mulf %14, %18 : vector<5x32xf32>
    %c0_6 = arith.constant 0 : index
    %c0_7 = arith.constant 0 : index
    %20 = vector.load %arg3[%c0_6, %c0_7] : memref<23x96xf32, #tpu.memory_space<vmem>>, vector<1x32xf32>
    %21 = vector.broadcast %20 : vector<1x32xf32> to vector<5x32xf32>
    %22 = arith.mulf %19, %21 : vector<5x32xf32>
    %c1 = arith.constant 1 : index
    %c0_8 = arith.constant 0 : index
    %23 = vector.load %arg3[%c1, %c0_8] : memref<23x96xf32, #tpu.memory_space<vmem>>, vector<1x32xf32>
    %24 = vector.broadcast %23 : vector<1x32xf32> to vector<5x32xf32>
    %25 = arith.addf %22, %24 : vector<5x32xf32>
    %26 = arith.truncf %25 : vector<5x32xf32> to vector<5x32xbf16>
    %c0_9 = arith.constant 0 : index
    %c0_10 = arith.constant 0 : index
    %27 = vector.load %arg4[%c0_9, %c0_10] : memref<32x64xbf16, #tpu.memory_space<vmem>>, vector<32x64xbf16>
    %cst_11 = arith.constant dense<0.000000e+00> : vector<5x64xf32>
    %28 = tpu.matmul %26, %27, %cst_11 {dimension_numbers = #tpu.dot_dimension_numbers<[1], [0], [0], [1], [0, 0, 1, 1], [], []>} : vector<5x32xbf16>, vector<32x64xbf16>, vector<5x64xf32> -> vector<5x64xf32>
    %c2 = arith.constant 2 : index
    %c0_12 = arith.constant 0 : index
    %29 = vector.load %arg3[%c2, %c0_12] : memref<23x96xf32, #tpu.memory_space<vmem>>, vector<1x64xf32>
    %30 = vector.broadcast %29 : vector<1x64xf32> to vector<5x64xf32>
    %31 = arith.addf %28, %30 : vector<5x64xf32>
    %cst_13 = arith.constant 0.000000e+00 : f32
    %32 = vector.broadcast %cst_13 : f32 to vector<5x64xf32>
    %33 = arith.subf %32, %31 : vector<5x64xf32>
    %34 = math.exp %33 : vector<5x64xf32>
    %cst_14 = arith.constant 1.000000e+00 : f32
    %35 = vector.broadcast %cst_14 : f32 to vector<5x64xf32>
    %36 = arith.addf %35, %34 : vector<5x64xf32>
    %cst_15 = arith.constant 1.000000e+00 : f32
    %37 = vector.broadcast %cst_15 : f32 to vector<5x64xf32>
    %38 = arith.divf %37, %36 : vector<5x64xf32>
    %39 = arith.mulf %31, %38 : vector<5x64xf32>
    %40 = arith.truncf %39 : vector<5x64xf32> to vector<5x64xbf16>
    %c0_16 = arith.constant 0 : index
    %c0_17 = arith.constant 0 : index
    %41 = vector.load %arg5[%c0_16, %c0_17] : memref<64x32xbf16, #tpu.memory_space<vmem>>, vector<64x32xbf16>
    %cst_18 = arith.constant dense<0.000000e+00> : vector<5x32xf32>
    %42 = tpu.matmul %40, %41, %cst_18 {dimension_numbers = #tpu.dot_dimension_numbers<[1], [0], [0], [1], [0, 0, 1, 1], [], []>} : vector<5x64xbf16>, vector<64x32xbf16>, vector<5x32xf32> -> vector<5x32xf32>
    %c3 = arith.constant 3 : index
    %c0_19 = arith.constant 0 : index
    %43 = vector.load %arg3[%c3, %c0_19] : memref<23x96xf32, #tpu.memory_space<vmem>>, vector<1x32xf32>
    %44 = vector.broadcast %43 : vector<1x32xf32> to vector<5x32xf32>
    %45 = arith.addf %42, %44 : vector<5x32xf32>
    %cst_20 = arith.constant 5.000000e-01 : f32
    %46 = vector.broadcast %cst_20 : f32 to vector<5x32xf32>
    %47 = arith.mulf %46, %45 : vector<5x32xf32>
    %48 = arith.addf %1, %47 : vector<5x32xf32>
    %cst_21 = arith.constant dense<0.000000e+00> : vector<5xf32>
    %49 = vector.multi_reduction <add>, %48, %cst_21 [1] : vector<5x32xf32> to vector<5xf32>
    %50 = vector.shape_cast %49 : vector<5xf32> to vector<5x1xf32>
    %cst_22 = arith.constant 3.200000e+01 : f32
    %51 = vector.broadcast %cst_22 : f32 to vector<5x1xf32>
    %52 = arith.divf %50, %51 : vector<5x1xf32>
    %53 = vector.broadcast %52 : vector<5x1xf32> to vector<5x32xf32>
    %54 = arith.subf %48, %53 : vector<5x32xf32>
    %55 = arith.mulf %54, %54 : vector<5x32xf32>
    %cst_23 = arith.constant dense<0.000000e+00> : vector<5xf32>
    %56 = vector.multi_reduction <add>, %55, %cst_23 [1] : vector<5x32xf32> to vector<5xf32>
    %57 = vector.shape_cast %56 : vector<5xf32> to vector<5x1xf32>
    %cst_24 = arith.constant 3.200000e+01 : f32
    %58 = vector.broadcast %cst_24 : f32 to vector<5x1xf32>
    %59 = arith.divf %57, %58 : vector<5x1xf32>
    %60 = vector.broadcast %52 : vector<5x1xf32> to vector<5x32xf32>
    %61 = arith.subf %48, %60 : vector<5x32xf32>
    %cst_25 = arith.constant 9.99999974E-6 : f32
    %62 = vector.broadcast %cst_25 : f32 to vector<5x1xf32>
    %63 = arith.addf %59, %62 : vector<5x1xf32>
    %64 = math.rsqrt %63 : vector<5x1xf32>
    %65 = vector.broadcast %64 : vector<5x1xf32> to vector<5x32xf32>
    %66 = arith.mulf %61, %65 : vector<5x32xf32>
    %c4 = arith.constant 4 : index
    %c0_26 = arith.constant 0 : index
    %67 = vector.load %arg3[%c4, %c0_26] : memref<23x96xf32, #tpu.memory_space<vmem>>, vector<1x32xf32>
    %68 = vector.broadcast %67 : vector<1x32xf32> to vector<5x32xf32>
    %69 = arith.mulf %66, %68 : vector<5x32xf32>
    %c5 = arith.constant 5 : index
    %c0_27 = arith.constant 0 : index
    %70 = vector.load %arg3[%c5, %c0_27] : memref<23x96xf32, #tpu.memory_space<vmem>>, vector<1x32xf32>
    %71 = vector.broadcast %70 : vector<1x32xf32> to vector<5x32xf32>
    %72 = arith.addf %69, %71 : vector<5x32xf32>
    %73 = arith.truncf %72 : vector<5x32xf32> to vector<5x32xbf16>
    %c0_28 = arith.constant 0 : index
    %c0_29 = arith.constant 0 : index
    %74 = vector.load %arg6[%c0_28, %c0_29] : memref<32x96xbf16, #tpu.memory_space<vmem>>, vector<32x96xbf16>
    %cst_30 = arith.constant dense<0.000000e+00> : vector<5x96xf32>
    %75 = tpu.matmul %73, %74, %cst_30 {dimension_numbers = #tpu.dot_dimension_numbers<[1], [0], [0], [1], [0, 0, 1, 1], [], []>} : vector<5x32xbf16>, vector<32x96xbf16>, vector<5x96xf32> -> vector<5x96xf32>
    %c6 = arith.constant 6 : index
    %c0_31 = arith.constant 0 : index
    %76 = vector.load %arg3[%c6, %c0_31] : memref<23x96xf32, #tpu.memory_space<vmem>>, vector<1x96xf32>
    %77 = vector.broadcast %76 : vector<1x96xf32> to vector<5x96xf32>
    %78 = arith.addf %75, %77 : vector<5x96xf32>
    %79 = vector.extract_strided_slice %78 {offsets = [0, 0], sizes = [5, 32], strides = [1, 1]} : vector<5x96xf32> to vector<5x32xf32>
    %80 = vector.extract_strided_slice %78 {offsets = [0, 32], sizes = [5, 32], strides = [1, 1]} : vector<5x96xf32> to vector<5x32xf32>
    %81 = vector.extract_strided_slice %78 {offsets = [0, 64], sizes = [5, 32], strides = [1, 1]} : vector<5x96xf32> to vector<5x32xf32>
    %c0_32 = arith.constant 0 : index
    %c0_33 = arith.constant 0 : index
    %82 = vector.load %arg2[%c0_32, %c0_33] : memref<5x32xf32, #tpu.memory_space<vmem>>, vector<5x32xf32>
    %83 = arith.truncf %82 : vector<5x32xf32> to vector<5x32xbf16>
    %c0_34 = arith.constant 0 : index
    %c0_35 = arith.constant 0 : index
    %84 = vector.load %arg7[%c0_34, %c0_35] : memref<32x32xbf16, #tpu.memory_space<vmem>>, vector<32x32xbf16>
    %cst_36 = arith.constant dense<0.000000e+00> : vector<5x32xf32>
    %85 = tpu.matmul %83, %84, %cst_36 {dimension_numbers = #tpu.dot_dimension_numbers<[1], [0], [0], [1], [0, 0, 1, 1], [], []>} : vector<5x32xbf16>, vector<32x32xbf16>, vector<5x32xf32> -> vector<5x32xf32>
    %c7 = arith.constant 7 : index
    %c0_37 = arith.constant 0 : index
    %86 = vector.load %arg3[%c7, %c0_37] : memref<23x96xf32, #tpu.memory_space<vmem>>, vector<1x32xf32>
    %87 = vector.broadcast %86 : vector<1x32xf32> to vector<5x32xf32>
    %88 = arith.addf %79, %87 : vector<5x32xf32>
    %c8 = arith.constant 8 : index
    %c0_38 = arith.constant 0 : index
    %89 = vector.load %arg3[%c8, %c0_38] : memref<23x96xf32, #tpu.memory_space<vmem>>, vector<1x32xf32>
    %90 = vector.broadcast %89 : vector<1x32xf32> to vector<5x32xf32>
    %91 = arith.addf %79, %90 : vector<5x32xf32>
    %92 = vector.extract_strided_slice %88 {offsets = [0, 0], sizes = [5, 8], strides = [1, 1]} : vector<5x32xf32> to vector<5x8xf32>
    %c0_39 = arith.constant 0 : index
    %c0_40 = arith.constant 0 : index
    %93 = vector.load %arg16[%c0_39, %c0_40] : memref<5x64xf32, #tpu.memory_space<vmem>>, vector<5x8xf32>
    tpu.vector_store %arg16[%c0_39, %c0_40], %92 {strides = array<i32>} : memref<5x64xf32, #tpu.memory_space<vmem>>, vector<5x8xf32>,
    %94 = vector.extract_strided_slice %91 {offsets = [0, 0], sizes = [5, 8], strides = [1, 1]} : vector<5x32xf32> to vector<5x8xf32>
    %c0_41 = arith.constant 0 : index
    %c8_42 = arith.constant 8 : index
    %95 = vector.load %arg16[%c0_41, %c8_42] : memref<5x64xf32, #tpu.memory_space<vmem>>, vector<5x8xf32>
    tpu.vector_store %arg16[%c0_41, %c8_42], %94 {strides = array<i32>} : memref<5x64xf32, #tpu.memory_space<vmem>>, vector<5x8xf32>,
    %96 = vector.extract_strided_slice %80 {offsets = [0, 0], sizes = [5, 8], strides = [1, 1]} : vector<5x32xf32> to vector<5x8xf32>
    %c0_43 = arith.constant 0 : index
    %c0_44 = arith.constant 0 : index
    %97 = vector.load %arg17[%c0_43, %c0_44] : memref<5x64xf32, #tpu.memory_space<vmem>>, vector<5x8xf32>
    tpu.vector_store %arg17[%c0_43, %c0_44], %96 {strides = array<i32>} : memref<5x64xf32, #tpu.memory_space<vmem>>, vector<5x8xf32>,
    %98 = vector.extract_strided_slice %85 {offsets = [0, 0], sizes = [5, 8], strides = [1, 1]} : vector<5x32xf32> to vector<5x8xf32>
    %c0_45 = arith.constant 0 : index
    %c8_46 = arith.constant 8 : index
    %99 = vector.load %arg17[%c0_45, %c8_46] : memref<5x64xf32, #tpu.memory_space<vmem>>, vector<5x8xf32>
    tpu.vector_store %arg17[%c0_45, %c8_46], %98 {strides = array<i32>} : memref<5x64xf32, #tpu.memory_space<vmem>>, vector<5x8xf32>,
    %100 = vector.extract_strided_slice %88 {offsets = [0, 8], sizes = [5, 8], strides = [1, 1]} : vector<5x32xf32> to vector<5x8xf32>
    %c0_47 = arith.constant 0 : index
    %c16 = arith.constant 16 : index
    %101 = vector.load %arg16[%c0_47, %c16] : memref<5x64xf32, #tpu.memory_space<vmem>>, vector<5x8xf32>
    tpu.vector_store %arg16[%c0_47, %c16], %100 {strides = array<i32>} : memref<5x64xf32, #tpu.memory_space<vmem>>, vector<5x8xf32>,
    %102 = vector.extract_strided_slice %91 {offsets = [0, 8], sizes = [5, 8], strides = [1, 1]} : vector<5x32xf32> to vector<5x8xf32>
    %c0_48 = arith.constant 0 : index
    %c24 = arith.constant 24 : index
    %103 = vector.load %arg16[%c0_48, %c24] : memref<5x64xf32, #tpu.memory_space<vmem>>, vector<5x8xf32>
    tpu.vector_store %arg16[%c0_48, %c24], %102 {strides = array<i32>} : memref<5x64xf32, #tpu.memory_space<vmem>>, vector<5x8xf32>,
    %104 = vector.extract_strided_slice %80 {offsets = [0, 8], sizes = [5, 8], strides = [1, 1]} : vector<5x32xf32> to vector<5x8xf32>
    %c0_49 = arith.constant 0 : index
    %c16_50 = arith.constant 16 : index
    %105 = vector.load %arg17[%c0_49, %c16_50] : memref<5x64xf32, #tpu.memory_space<vmem>>, vector<5x8xf32>
    tpu.vector_store %arg17[%c0_49, %c16_50], %104 {strides = array<i32>} : memref<5x64xf32, #tpu.memory_space<vmem>>, vector<5x8xf32>,
    %106 = vector.extract_strided_slice %85 {offsets = [0, 8], sizes = [5, 8], strides = [1, 1]} : vector<5x32xf32> to vector<5x8xf32>
    %c0_51 = arith.constant 0 : index
    %c24_52 = arith.constant 24 : index
    %107 = vector.load %arg17[%c0_51, %c24_52] : memref<5x64xf32, #tpu.memory_space<vmem>>, vector<5x8xf32>
    tpu.vector_store %arg17[%c0_51, %c24_52], %106 {strides = array<i32>} : memref<5x64xf32, #tpu.memory_space<vmem>>, vector<5x8xf32>,
    %108 = vector.extract_strided_slice %88 {offsets = [0, 16], sizes = [5, 8], strides = [1, 1]} : vector<5x32xf32> to vector<5x8xf32>
    %c0_53 = arith.constant 0 : index
    %c32 = arith.constant 32 : index
    %109 = vector.load %arg16[%c0_53, %c32] : memref<5x64xf32, #tpu.memory_space<vmem>>, vector<5x8xf32>
    tpu.vector_store %arg16[%c0_53, %c32], %108 {strides = array<i32>} : memref<5x64xf32, #tpu.memory_space<vmem>>, vector<5x8xf32>,
    %110 = vector.extract_strided_slice %91 {offsets = [0, 16], sizes = [5, 8], strides = [1, 1]} : vector<5x32xf32> to vector<5x8xf32>
    %c0_54 = arith.constant 0 : index
    %c40 = arith.constant 40 : index
    %111 = vector.load %arg16[%c0_54, %c40] : memref<5x64xf32, #tpu.memory_space<vmem>>, vector<5x8xf32>
    tpu.vector_store %arg16[%c0_54, %c40], %110 {strides = array<i32>} : memref<5x64xf32, #tpu.memory_space<vmem>>, vector<5x8xf32>,
    %112 = vector.extract_strided_slice %80 {offsets = [0, 16], sizes = [5, 8], strides = [1, 1]} : vector<5x32xf32> to vector<5x8xf32>
    %c0_55 = arith.constant 0 : index
    %c32_56 = arith.constant 32 : index
    %113 = vector.load %arg17[%c0_55, %c32_56] : memref<5x64xf32, #tpu.memory_space<vmem>>, vector<5x8xf32>
    tpu.vector_store %arg17[%c0_55, %c32_56], %112 {strides = array<i32>} : memref<5x64xf32, #tpu.memory_space<vmem>>, vector<5x8xf32>,
    %114 = vector.extract_strided_slice %85 {offsets = [0, 16], sizes = [5, 8], strides = [1, 1]} : vector<5x32xf32> to vector<5x8xf32>
    %c0_57 = arith.constant 0 : index
    %c40_58 = arith.constant 40 : index
    %115 = vector.load %arg17[%c0_57, %c40_58] : memref<5x64xf32, #tpu.memory_space<vmem>>, vector<5x8xf32>
    tpu.vector_store %arg17[%c0_57, %c40_58], %114 {strides = array<i32>} : memref<5x64xf32, #tpu.memory_space<vmem>>, vector<5x8xf32>,
    %116 = vector.extract_strided_slice %88 {offsets = [0, 24], sizes = [5, 8], strides = [1, 1]} : vector<5x32xf32> to vector<5x8xf32>
    %c0_59 = arith.constant 0 : index
    %c48 = arith.constant 48 : index
    %117 = vector.load %arg16[%c0_59, %c48] : memref<5x64xf32, #tpu.memory_space<vmem>>, vector<5x8xf32>
    tpu.vector_store %arg16[%c0_59, %c48], %116 {strides = array<i32>} : memref<5x64xf32, #tpu.memory_space<vmem>>, vector<5x8xf32>,
    %118 = vector.extract_strided_slice %91 {offsets = [0, 24], sizes = [5, 8], strides = [1, 1]} : vector<5x32xf32> to vector<5x8xf32>
    %c0_60 = arith.constant 0 : index
    %c56 = arith.constant 56 : index
    %119 = vector.load %arg16[%c0_60, %c56] : memref<5x64xf32, #tpu.memory_space<vmem>>, vector<5x8xf32>
    tpu.vector_store %arg16[%c0_60, %c56], %118 {strides = array<i32>} : memref<5x64xf32, #tpu.memory_space<vmem>>, vector<5x8xf32>,
    %120 = vector.extract_strided_slice %80 {offsets = [0, 24], sizes = [5, 8], strides = [1, 1]} : vector<5x32xf32> to vector<5x8xf32>
    %c0_61 = arith.constant 0 : index
    %c48_62 = arith.constant 48 : index
    %121 = vector.load %arg17[%c0_61, %c48_62] : memref<5x64xf32, #tpu.memory_space<vmem>>, vector<5x8xf32>
    tpu.vector_store %arg17[%c0_61, %c48_62], %120 {strides = array<i32>} : memref<5x64xf32, #tpu.memory_space<vmem>>, vector<5x8xf32>,
    %122 = vector.extract_strided_slice %85 {offsets = [0, 24], sizes = [5, 8], strides = [1, 1]} : vector<5x32xf32> to vector<5x8xf32>
    %c0_63 = arith.constant 0 : index
    %c56_64 = arith.constant 56 : index
    %123 = vector.load %arg17[%c0_63, %c56_64] : memref<5x64xf32, #tpu.memory_space<vmem>>, vector<5x8xf32>
    tpu.vector_store %arg17[%c0_63, %c56_64], %122 {strides = array<i32>} : memref<5x64xf32, #tpu.memory_space<vmem>>, vector<5x8xf32>,
    %c0_65 = arith.constant 0 : index
    %c0_66 = arith.constant 0 : index
    %124 = vector.load %arg16[%c0_65, %c0_66] : memref<5x64xf32, #tpu.memory_space<vmem>>, vector<5x16xf32>
    %c0_67 = arith.constant 0 : index
    %c0_68 = arith.constant 0 : index
    %125 = vector.load %arg17[%c0_67, %c0_68] : memref<5x64xf32, #tpu.memory_space<vmem>>, vector<5x16xf32>
    %126 = arith.truncf %124 : vector<5x16xf32> to vector<5x16xbf16>
    %127 = arith.truncf %125 : vector<5x16xf32> to vector<5x16xbf16>
    %cst_69 = arith.constant dense<0.000000e+00> : vector<5x5xf32>
    %128 = tpu.matmul %126, %127, %cst_69 {dimension_numbers = #tpu.dot_dimension_numbers<[1], [1], [0], [0], [0, 0, 1, 0], [], []>} : vector<5x16xbf16>, vector<5x16xbf16>, vector<5x5xf32> -> vector<5x5xf32>
    %cst_70 = arith.constant dense<0xFF800000> : vector<5xf32>
    %129 = vector.multi_reduction <maximumf>, %128, %cst_70 [1] : vector<5x5xf32> to vector<5xf32>
    %130 = vector.shape_cast %129 : vector<5xf32> to vector<5x1xf32>
    %131 = vector.broadcast %130 : vector<5x1xf32> to vector<5x5xf32>
    %132 = arith.subf %128, %131 : vector<5x5xf32>
    %133 = math.exp %132 : vector<5x5xf32>
    %cst_71 = arith.constant dense<0.000000e+00> : vector<5xf32>
    %134 = vector.multi_reduction <add>, %133, %cst_71 [1] : vector<5x5xf32> to vector<5xf32>
    %135 = vector.shape_cast %134 : vector<5xf32> to vector<5x1xf32>
    %cst_72 = arith.constant 1.000000e+00 : f32
    %136 = vector.broadcast %cst_72 : f32 to vector<5x1xf32>
    %137 = arith.divf %136, %135 : vector<5x1xf32>
    %138 = vector.broadcast %137 : vector<5x1xf32> to vector<5x5xf32>
    %139 = arith.mulf %133, %138 : vector<5x5xf32>
    %140 = arith.truncf %139 : vector<5x5xf32> to vector<5x5xbf16>
    %141 = vector.extract_strided_slice %81 {offsets = [0, 0], sizes = [5, 8], strides = [1, 1]} : vector<5x32xf32> to vector<5x8xf32>
    %142 = arith.truncf %141 : vector<5x8xf32> to vector<5x8xbf16>
    %cst_73 = arith.constant dense<0.000000e+00> : vector<5x8xf32>
    %143 = tpu.matmul %140, %142, %cst_73 {dimension_numbers = #tpu.dot_dimension_numbers<[1], [0], [0], [1], [0, 0, 1, 1], [], []>} : vector<5x5xbf16>, vector<5x8xbf16>, vector<5x8xf32> -> vector<5x8xf32>
    %c0_74 = arith.constant 0 : index
    %c0_75 = arith.constant 0 : index
    %144 = vector.load %arg18[%c0_74, %c0_75] : memref<5x32xf32, #tpu.memory_space<vmem>>, vector<5x8xf32>
    tpu.vector_store %arg18[%c0_74, %c0_75], %143 {strides = array<i32>} : memref<5x32xf32, #tpu.memory_space<vmem>>, vector<5x8xf32>,
    %c0_76 = arith.constant 0 : index
    %c16_77 = arith.constant 16 : index
    %145 = vector.load %arg16[%c0_76, %c16_77] : memref<5x64xf32, #tpu.memory_space<vmem>>, vector<5x16xf32>
    %c0_78 = arith.constant 0 : index
    %c16_79 = arith.constant 16 : index
    %146 = vector.load %arg17[%c0_78, %c16_79] : memref<5x64xf32, #tpu.memory_space<vmem>>, vector<5x16xf32>
    %147 = arith.truncf %145 : vector<5x16xf32> to vector<5x16xbf16>
    %148 = arith.truncf %146 : vector<5x16xf32> to vector<5x16xbf16>
    %cst_80 = arith.constant dense<0.000000e+00> : vector<5x5xf32>
    %149 = tpu.matmul %147, %148, %cst_80 {dimension_numbers = #tpu.dot_dimension_numbers<[1], [1], [0], [0], [0, 0, 1, 0], [], []>} : vector<5x16xbf16>, vector<5x16xbf16>, vector<5x5xf32> -> vector<5x5xf32>
    %cst_81 = arith.constant dense<0xFF800000> : vector<5xf32>
    %150 = vector.multi_reduction <maximumf>, %149, %cst_81 [1] : vector<5x5xf32> to vector<5xf32>
    %151 = vector.shape_cast %150 : vector<5xf32> to vector<5x1xf32>
    %152 = vector.broadcast %151 : vector<5x1xf32> to vector<5x5xf32>
    %153 = arith.subf %149, %152 : vector<5x5xf32>
    %154 = math.exp %153 : vector<5x5xf32>
    %cst_82 = arith.constant dense<0.000000e+00> : vector<5xf32>
    %155 = vector.multi_reduction <add>, %154, %cst_82 [1] : vector<5x5xf32> to vector<5xf32>
    %156 = vector.shape_cast %155 : vector<5xf32> to vector<5x1xf32>
    %cst_83 = arith.constant 1.000000e+00 : f32
    %157 = vector.broadcast %cst_83 : f32 to vector<5x1xf32>
    %158 = arith.divf %157, %156 : vector<5x1xf32>
    %159 = vector.broadcast %158 : vector<5x1xf32> to vector<5x5xf32>
    %160 = arith.mulf %154, %159 : vector<5x5xf32>
    %161 = arith.truncf %160 : vector<5x5xf32> to vector<5x5xbf16>
    %162 = vector.extract_strided_slice %81 {offsets = [0, 8], sizes = [5, 8], strides = [1, 1]} : vector<5x32xf32> to vector<5x8xf32>
    %163 = arith.truncf %162 : vector<5x8xf32> to vector<5x8xbf16>
    %cst_84 = arith.constant dense<0.000000e+00> : vector<5x8xf32>
    %164 = tpu.matmul %161, %163, %cst_84 {dimension_numbers = #tpu.dot_dimension_numbers<[1], [0], [0], [1], [0, 0, 1, 1], [], []>} : vector<5x5xbf16>, vector<5x8xbf16>, vector<5x8xf32> -> vector<5x8xf32>
    %c0_85 = arith.constant 0 : index
    %c8_86 = arith.constant 8 : index
    %165 = vector.load %arg18[%c0_85, %c8_86] : memref<5x32xf32, #tpu.memory_space<vmem>>, vector<5x8xf32>
    tpu.vector_store %arg18[%c0_85, %c8_86], %164 {strides = array<i32>} : memref<5x32xf32, #tpu.memory_space<vmem>>, vector<5x8xf32>,
    %c0_87 = arith.constant 0 : index
    %c32_88 = arith.constant 32 : index
    %166 = vector.load %arg16[%c0_87, %c32_88] : memref<5x64xf32, #tpu.memory_space<vmem>>, vector<5x16xf32>
    %c0_89 = arith.constant 0 : index
    %c32_90 = arith.constant 32 : index
    %167 = vector.load %arg17[%c0_89, %c32_90] : memref<5x64xf32, #tpu.memory_space<vmem>>, vector<5x16xf32>
    %168 = arith.truncf %166 : vector<5x16xf32> to vector<5x16xbf16>
    %169 = arith.truncf %167 : vector<5x16xf32> to vector<5x16xbf16>
    %cst_91 = arith.constant dense<0.000000e+00> : vector<5x5xf32>
    %170 = tpu.matmul %168, %169, %cst_91 {dimension_numbers = #tpu.dot_dimension_numbers<[1], [1], [0], [0], [0, 0, 1, 0], [], []>} : vector<5x16xbf16>, vector<5x16xbf16>, vector<5x5xf32> -> vector<5x5xf32>
    %cst_92 = arith.constant dense<0xFF800000> : vector<5xf32>
    %171 = vector.multi_reduction <maximumf>, %170, %cst_92 [1] : vector<5x5xf32> to vector<5xf32>
    %172 = vector.shape_cast %171 : vector<5xf32> to vector<5x1xf32>
    %173 = vector.broadcast %172 : vector<5x1xf32> to vector<5x5xf32>
    %174 = arith.subf %170, %173 : vector<5x5xf32>
    %175 = math.exp %174 : vector<5x5xf32>
    %cst_93 = arith.constant dense<0.000000e+00> : vector<5xf32>
    %176 = vector.multi_reduction <add>, %175, %cst_93 [1] : vector<5x5xf32> to vector<5xf32>
    %177 = vector.shape_cast %176 : vector<5xf32> to vector<5x1xf32>
    %cst_94 = arith.constant 1.000000e+00 : f32
    %178 = vector.broadcast %cst_94 : f32 to vector<5x1xf32>
    %179 = arith.divf %178, %177 : vector<5x1xf32>
    %180 = vector.broadcast %179 : vector<5x1xf32> to vector<5x5xf32>
    %181 = arith.mulf %175, %180 : vector<5x5xf32>
    %182 = arith.truncf %181 : vector<5x5xf32> to vector<5x5xbf16>
    %183 = vector.extract_strided_slice %81 {offsets = [0, 16], sizes = [5, 8], strides = [1, 1]} : vector<5x32xf32> to vector<5x8xf32>
    %184 = arith.truncf %183 : vector<5x8xf32> to vector<5x8xbf16>
    %cst_95 = arith.constant dense<0.000000e+00> : vector<5x8xf32>
    %185 = tpu.matmul %182, %184, %cst_95 {dimension_numbers = #tpu.dot_dimension_numbers<[1], [0], [0], [1], [0, 0, 1, 1], [], []>} : vector<5x5xbf16>, vector<5x8xbf16>, vector<5x8xf32> -> vector<5x8xf32>
    %c0_96 = arith.constant 0 : index
    %c16_97 = arith.constant 16 : index
    %186 = vector.load %arg18[%c0_96, %c16_97] : memref<5x32xf32, #tpu.memory_space<vmem>>, vector<5x8xf32>
    tpu.vector_store %arg18[%c0_96, %c16_97], %185 {strides = array<i32>} : memref<5x32xf32, #tpu.memory_space<vmem>>, vector<5x8xf32>,
    %c0_98 = arith.constant 0 : index
    %c48_99 = arith.constant 48 : index
    %187 = vector.load %arg16[%c0_98, %c48_99] : memref<5x64xf32, #tpu.memory_space<vmem>>, vector<5x16xf32>
    %c0_100 = arith.constant 0 : index
    %c48_101 = arith.constant 48 : index
    %188 = vector.load %arg17[%c0_100, %c48_101] : memref<5x64xf32, #tpu.memory_space<vmem>>, vector<5x16xf32>
    %189 = arith.truncf %187 : vector<5x16xf32> to vector<5x16xbf16>
    %190 = arith.truncf %188 : vector<5x16xf32> to vector<5x16xbf16>
    %cst_102 = arith.constant dense<0.000000e+00> : vector<5x5xf32>
    %191 = tpu.matmul %189, %190, %cst_102 {dimension_numbers = #tpu.dot_dimension_numbers<[1], [1], [0], [0], [0, 0, 1, 0], [], []>} : vector<5x16xbf16>, vector<5x16xbf16>, vector<5x5xf32> -> vector<5x5xf32>
    %cst_103 = arith.constant dense<0xFF800000> : vector<5xf32>
    %192 = vector.multi_reduction <maximumf>, %191, %cst_103 [1] : vector<5x5xf32> to vector<5xf32>
    %193 = vector.shape_cast %192 : vector<5xf32> to vector<5x1xf32>
    %194 = vector.broadcast %193 : vector<5x1xf32> to vector<5x5xf32>
    %195 = arith.subf %191, %194 : vector<5x5xf32>
    %196 = math.exp %195 : vector<5x5xf32>
    %cst_104 = arith.constant dense<0.000000e+00> : vector<5xf32>
    %197 = vector.multi_reduction <add>, %196, %cst_104 [1] : vector<5x5xf32> to vector<5xf32>
    %198 = vector.shape_cast %197 : vector<5xf32> to vector<5x1xf32>
    %cst_105 = arith.constant 1.000000e+00 : f32
    %199 = vector.broadcast %cst_105 : f32 to vector<5x1xf32>
    %200 = arith.divf %199, %198 : vector<5x1xf32>
    %201 = vector.broadcast %200 : vector<5x1xf32> to vector<5x5xf32>
    %202 = arith.mulf %196, %201 : vector<5x5xf32>
    %203 = arith.truncf %202 : vector<5x5xf32> to vector<5x5xbf16>
    %204 = vector.extract_strided_slice %81 {offsets = [0, 24], sizes = [5, 8], strides = [1, 1]} : vector<5x32xf32> to vector<5x8xf32>
    %205 = arith.truncf %204 : vector<5x8xf32> to vector<5x8xbf16>
    %cst_106 = arith.constant dense<0.000000e+00> : vector<5x8xf32>
    %206 = tpu.matmul %203, %205, %cst_106 {dimension_numbers = #tpu.dot_dimension_numbers<[1], [0], [0], [1], [0, 0, 1, 1], [], []>} : vector<5x5xbf16>, vector<5x8xbf16>, vector<5x8xf32> -> vector<5x8xf32>
    %c0_107 = arith.constant 0 : index
    %c24_108 = arith.constant 24 : index
    %207 = vector.load %arg18[%c0_107, %c24_108] : memref<5x32xf32, #tpu.memory_space<vmem>>, vector<5x8xf32>
    tpu.vector_store %arg18[%c0_107, %c24_108], %206 {strides = array<i32>} : memref<5x32xf32, #tpu.memory_space<vmem>>, vector<5x8xf32>,
    %c0_109 = arith.constant 0 : index
    %c0_110 = arith.constant 0 : index
    %208 = vector.load %arg18[%c0_109, %c0_110] : memref<5x32xf32, #tpu.memory_space<vmem>>, vector<5x32xf32>
    %209 = arith.truncf %208 : vector<5x32xf32> to vector<5x32xbf16>
    %c0_111 = arith.constant 0 : index
    %c0_112 = arith.constant 0 : index
    %210 = vector.load %arg8[%c0_111, %c0_112] : memref<32x32xbf16, #tpu.memory_space<vmem>>, vector<32x32xbf16>
    %cst_113 = arith.constant dense<0.000000e+00> : vector<5x32xf32>
    %211 = tpu.matmul %209, %210, %cst_113 {dimension_numbers = #tpu.dot_dimension_numbers<[1], [0], [0], [1], [0, 0, 1, 1], [], []>} : vector<5x32xbf16>, vector<32x32xbf16>, vector<5x32xf32> -> vector<5x32xf32>
    %212 = arith.addf %48, %211 : vector<5x32xf32>
    %c9 = arith.constant 9 : index
    %c0_114 = arith.constant 0 : index
    %213 = vector.load %arg3[%c9, %c0_114] : memref<23x96xf32, #tpu.memory_space<vmem>>, vector<1x32xf32>
    %214 = vector.broadcast %213 : vector<1x32xf32> to vector<5x32xf32>
    %215 = arith.addf %212, %214 : vector<5x32xf32>
    %cst_115 = arith.constant dense<0.000000e+00> : vector<5xf32>
    %216 = vector.multi_reduction <add>, %215, %cst_115 [1] : vector<5x32xf32> to vector<5xf32>
    %217 = vector.shape_cast %216 : vector<5xf32> to vector<5x1xf32>
    %cst_116 = arith.constant 3.200000e+01 : f32
    %218 = vector.broadcast %cst_116 : f32 to vector<5x1xf32>
    %219 = arith.divf %217, %218 : vector<5x1xf32>
    %220 = vector.broadcast %219 : vector<5x1xf32> to vector<5x32xf32>
    %221 = arith.subf %215, %220 : vector<5x32xf32>
    %222 = arith.mulf %221, %221 : vector<5x32xf32>
    %cst_117 = arith.constant dense<0.000000e+00> : vector<5xf32>
    %223 = vector.multi_reduction <add>, %222, %cst_117 [1] : vector<5x32xf32> to vector<5xf32>
    %224 = vector.shape_cast %223 : vector<5xf32> to vector<5x1xf32>
    %cst_118 = arith.constant 3.200000e+01 : f32
    %225 = vector.broadcast %cst_118 : f32 to vector<5x1xf32>
    %226 = arith.divf %224, %225 : vector<5x1xf32>
    %227 = vector.broadcast %219 : vector<5x1xf32> to vector<5x32xf32>
    %228 = arith.subf %215, %227 : vector<5x32xf32>
    %cst_119 = arith.constant 9.99999974E-6 : f32
    %229 = vector.broadcast %cst_119 : f32 to vector<5x1xf32>
    %230 = arith.addf %226, %229 : vector<5x1xf32>
    %231 = math.rsqrt %230 : vector<5x1xf32>
    %232 = vector.broadcast %231 : vector<5x1xf32> to vector<5x32xf32>
    %233 = arith.mulf %228, %232 : vector<5x32xf32>
    %c10 = arith.constant 10 : index
    %c0_120 = arith.constant 0 : index
    %234 = vector.load %arg3[%c10, %c0_120] : memref<23x96xf32, #tpu.memory_space<vmem>>, vector<1x32xf32>
    %235 = vector.broadcast %234 : vector<1x32xf32> to vector<5x32xf32>
    %236 = arith.mulf %233, %235 : vector<5x32xf32>
    %c11 = arith.constant 11 : index
    %c0_121 = arith.constant 0 : index
    %237 = vector.load %arg3[%c11, %c0_121] : memref<23x96xf32, #tpu.memory_space<vmem>>, vector<1x32xf32>
    %238 = vector.broadcast %237 : vector<1x32xf32> to vector<5x32xf32>
    %239 = arith.addf %236, %238 : vector<5x32xf32>
    %240 = arith.truncf %239 : vector<5x32xf32> to vector<5x32xbf16>
    %c0_122 = arith.constant 0 : index
    %c0_123 = arith.constant 0 : index
    %241 = vector.load %arg9[%c0_122, %c0_123] : memref<32x32xbf16, #tpu.memory_space<vmem>>, vector<32x32xbf16>
    %cst_124 = arith.constant dense<0.000000e+00> : vector<5x32xf32>
    %242 = tpu.matmul %240, %241, %cst_124 {dimension_numbers = #tpu.dot_dimension_numbers<[1], [0], [0], [1], [0, 0, 1, 1], [], []>} : vector<5x32xbf16>, vector<32x32xbf16>, vector<5x32xf32> -> vector<5x32xf32>
    %c12 = arith.constant 12 : index
    %c0_125 = arith.constant 0 : index
    %243 = vector.load %arg3[%c12, %c0_125] : memref<23x96xf32, #tpu.memory_space<vmem>>, vector<1x32xf32>
    %244 = vector.broadcast %243 : vector<1x32xf32> to vector<5x32xf32>
    %245 = arith.addf %242, %244 : vector<5x32xf32>
    %246 = arith.truncf %239 : vector<5x32xf32> to vector<5x32xbf16>
    %c0_126 = arith.constant 0 : index
    %c0_127 = arith.constant 0 : index
    %247 = vector.load %arg10[%c0_126, %c0_127] : memref<32x32xbf16, #tpu.memory_space<vmem>>, vector<32x32xbf16>
    %cst_128 = arith.constant dense<0.000000e+00> : vector<5x32xf32>
    %248 = tpu.matmul %246, %247, %cst_128 {dimension_numbers = #tpu.dot_dimension_numbers<[1], [0], [0], [1], [0, 0, 1, 1], [], []>} : vector<5x32xbf16>, vector<32x32xbf16>, vector<5x32xf32> -> vector<5x32xf32>
    %c13 = arith.constant 13 : index
    %c0_129 = arith.constant 0 : index
    %249 = vector.load %arg3[%c13, %c0_129] : memref<23x96xf32, #tpu.memory_space<vmem>>, vector<1x32xf32>
    %250 = vector.broadcast %249 : vector<1x32xf32> to vector<5x32xf32>
    %251 = arith.addf %248, %250 : vector<5x32xf32>
    %cst_130 = arith.constant 0.000000e+00 : f32
    %252 = vector.broadcast %cst_130 : f32 to vector<5x32xf32>
    %253 = arith.subf %252, %251 : vector<5x32xf32>
    %254 = math.exp %253 : vector<5x32xf32>
    %cst_131 = arith.constant 1.000000e+00 : f32
    %255 = vector.broadcast %cst_131 : f32 to vector<5x32xf32>
    %256 = arith.addf %255, %254 : vector<5x32xf32>
    %cst_132 = arith.constant 1.000000e+00 : f32
    %257 = vector.broadcast %cst_132 : f32 to vector<5x32xf32>
    %258 = arith.divf %257, %256 : vector<5x32xf32>
    %259 = arith.mulf %245, %258 : vector<5x32xf32>
    %cst_133 = arith.constant 0.000000e+00 : f32
    %260 = vector.broadcast %cst_133 : f32 to vector<8x32xf32>
    %c0_134 = arith.constant 0 : index
    %c0_135 = arith.constant 0 : index
    %261 = vector.load %arg19[%c0_134, %c0_135] : memref<20x32xf32, #tpu.memory_space<vmem>>, vector<8x32xf32>
    tpu.vector_store %arg19[%c0_134, %c0_135], %260 {strides = array<i32>} : memref<20x32xf32, #tpu.memory_space<vmem>>, vector<8x32xf32>,
    %cst_136 = arith.constant 0.000000e+00 : f32
    %262 = vector.broadcast %cst_136 : f32 to vector<7x32xf32>
    %c13_137 = arith.constant 13 : index
    %c0_138 = arith.constant 0 : index
    %263 = vector.load %arg19[%c13_137, %c0_138] : memref<20x32xf32, #tpu.memory_space<vmem>>, vector<7x32xf32>
    tpu.vector_store %arg19[%c13_137, %c0_138], %262 {strides = array<i32>} : memref<20x32xf32, #tpu.memory_space<vmem>>, vector<7x32xf32>,
    %c8_139 = arith.constant 8 : index
    %c0_140 = arith.constant 0 : index
    %264 = vector.load %arg19[%c8_139, %c0_140] : memref<20x32xf32, #tpu.memory_space<vmem>>, vector<5x32xf32>
    tpu.vector_store %arg19[%c8_139, %c0_140], %259 {strides = array<i32>} : memref<20x32xf32, #tpu.memory_space<vmem>>, vector<5x32xf32>,
    %cst_141 = arith.constant 0.000000e+00 : f32
    %265 = vector.broadcast %cst_141 : f32 to vector<5x32xf32>
    %c0_i32 = arith.constant 0 : i32
    %266 = arith.index_cast %c0_i32 : i32 to index
    %c0_142 = arith.constant 0 : index
    %267 = vector.load %arg14[%266, %c0_142] : memref<15x32xf32, #tpu.memory_space<vmem>>, vector<1x32xf32>
    %c1_i32 = arith.constant 1 : i32
    %268 = arith.addi %c0_i32, %c1_i32 : i32
    %269 = arith.index_cast %268 : i32 to index
    %c0_143 = arith.constant 0 : index
    %270 = vector.load %arg19[%269, %c0_143] : memref<20x32xf32, #tpu.memory_space<vmem>>, vector<5x32xf32>
    %271 = vector.broadcast %267 : vector<1x32xf32> to vector<5x32xf32>
    %272 = arith.mulf %271, %270 : vector<5x32xf32>
    %273 = arith.addf %265, %272 : vector<5x32xf32>
    %c1_i32_144 = arith.constant 1 : i32
    %274 = arith.index_cast %c1_i32_144 : i32 to index
    %c0_145 = arith.constant 0 : index
    %275 = vector.load %arg14[%274, %c0_145] : memref<15x32xf32, #tpu.memory_space<vmem>>, vector<1x32xf32>
    %c1_i32_146 = arith.constant 1 : i32
    %276 = arith.addi %c1_i32_144, %c1_i32_146 : i32
    %277 = arith.index_cast %276 : i32 to index
    %c0_147 = arith.constant 0 : index
    %278 = vector.load %arg19[%277, %c0_147] : memref<20x32xf32, #tpu.memory_space<vmem>>, vector<5x32xf32>
    %279 = vector.broadcast %275 : vector<1x32xf32> to vector<5x32xf32>
    %280 = arith.mulf %279, %278 : vector<5x32xf32>
    %281 = arith.addf %273, %280 : vector<5x32xf32>
    %c2_i32 = arith.constant 2 : i32
    %282 = arith.index_cast %c2_i32 : i32 to index
    %c0_148 = arith.constant 0 : index
    %283 = vector.load %arg14[%282, %c0_148] : memref<15x32xf32, #tpu.memory_space<vmem>>, vector<1x32xf32>
    %c1_i32_149 = arith.constant 1 : i32
    %284 = arith.addi %c2_i32, %c1_i32_149 : i32
    %285 = arith.index_cast %284 : i32 to index
    %c0_150 = arith.constant 0 : index
    %286 = vector.load %arg19[%285, %c0_150] : memref<20x32xf32, #tpu.memory_space<vmem>>, vector<5x32xf32>
    %287 = vector.broadcast %283 : vector<1x32xf32> to vector<5x32xf32>
    %288 = arith.mulf %287, %286 : vector<5x32xf32>
    %289 = arith.addf %281, %288 : vector<5x32xf32>
    %c3_i32 = arith.constant 3 : i32
    %290 = arith.index_cast %c3_i32 : i32 to index
    %c0_151 = arith.constant 0 : index
    %291 = vector.load %arg14[%290, %c0_151] : memref<15x32xf32, #tpu.memory_space<vmem>>, vector<1x32xf32>
    %c1_i32_152 = arith.constant 1 : i32
    %292 = arith.addi %c3_i32, %c1_i32_152 : i32
    %293 = arith.index_cast %292 : i32 to index
    %c0_153 = arith.constant 0 : index
    %294 = vector.load %arg19[%293, %c0_153] : memref<20x32xf32, #tpu.memory_space<vmem>>, vector<5x32xf32>
    %295 = vector.broadcast %291 : vector<1x32xf32> to vector<5x32xf32>
    %296 = arith.mulf %295, %294 : vector<5x32xf32>
    %297 = arith.addf %289, %296 : vector<5x32xf32>
    %c4_i32 = arith.constant 4 : i32
    %298 = arith.index_cast %c4_i32 : i32 to index
    %c0_154 = arith.constant 0 : index
    %299 = vector.load %arg14[%298, %c0_154] : memref<15x32xf32, #tpu.memory_space<vmem>>, vector<1x32xf32>
    %c1_i32_155 = arith.constant 1 : i32
    %300 = arith.addi %c4_i32, %c1_i32_155 : i32
    %301 = arith.index_cast %300 : i32 to index
    %c0_156 = arith.constant 0 : index
    %302 = vector.load %arg19[%301, %c0_156] : memref<20x32xf32, #tpu.memory_space<vmem>>, vector<5x32xf32>
    %303 = vector.broadcast %299 : vector<1x32xf32> to vector<5x32xf32>
    %304 = arith.mulf %303, %302 : vector<5x32xf32>
    %305 = arith.addf %297, %304 : vector<5x32xf32>
    %c5_i32 = arith.constant 5 : i32
    %306 = arith.index_cast %c5_i32 : i32 to index
    %c0_157 = arith.constant 0 : index
    %307 = vector.load %arg14[%306, %c0_157] : memref<15x32xf32, #tpu.memory_space<vmem>>, vector<1x32xf32>
    %c1_i32_158 = arith.constant 1 : i32
    %308 = arith.addi %c5_i32, %c1_i32_158 : i32
    %309 = arith.index_cast %308 : i32 to index
    %c0_159 = arith.constant 0 : index
    %310 = vector.load %arg19[%309, %c0_159] : memref<20x32xf32, #tpu.memory_space<vmem>>, vector<5x32xf32>
    %311 = vector.broadcast %307 : vector<1x32xf32> to vector<5x32xf32>
    %312 = arith.mulf %311, %310 : vector<5x32xf32>
    %313 = arith.addf %305, %312 : vector<5x32xf32>
    %c6_i32 = arith.constant 6 : i32
    %314 = arith.index_cast %c6_i32 : i32 to index
    %c0_160 = arith.constant 0 : index
    %315 = vector.load %arg14[%314, %c0_160] : memref<15x32xf32, #tpu.memory_space<vmem>>, vector<1x32xf32>
    %c1_i32_161 = arith.constant 1 : i32
    %316 = arith.addi %c6_i32, %c1_i32_161 : i32
    %317 = arith.index_cast %316 : i32 to index
    %c0_162 = arith.constant 0 : index
    %318 = vector.load %arg19[%317, %c0_162] : memref<20x32xf32, #tpu.memory_space<vmem>>, vector<5x32xf32>
    %319 = vector.broadcast %315 : vector<1x32xf32> to vector<5x32xf32>
    %320 = arith.mulf %319, %318 : vector<5x32xf32>
    %321 = arith.addf %313, %320 : vector<5x32xf32>
    %c7_i32 = arith.constant 7 : i32
    %322 = arith.index_cast %c7_i32 : i32 to index
    %c0_163 = arith.constant 0 : index
    %323 = vector.load %arg14[%322, %c0_163] : memref<15x32xf32, #tpu.memory_space<vmem>>, vector<1x32xf32>
    %c1_i32_164 = arith.constant 1 : i32
    %324 = arith.addi %c7_i32, %c1_i32_164 : i32
    %325 = arith.index_cast %324 : i32 to index
    %c0_165 = arith.constant 0 : index
    %326 = vector.load %arg19[%325, %c0_165] : memref<20x32xf32, #tpu.memory_space<vmem>>, vector<5x32xf32>
    %327 = vector.broadcast %323 : vector<1x32xf32> to vector<5x32xf32>
    %328 = arith.mulf %327, %326 : vector<5x32xf32>
    %329 = arith.addf %321, %328 : vector<5x32xf32>
    %c8_i32 = arith.constant 8 : i32
    %330 = arith.index_cast %c8_i32 : i32 to index
    %c0_166 = arith.constant 0 : index
    %331 = vector.load %arg14[%330, %c0_166] : memref<15x32xf32, #tpu.memory_space<vmem>>, vector<1x32xf32>
    %c1_i32_167 = arith.constant 1 : i32
    %332 = arith.addi %c8_i32, %c1_i32_167 : i32
    %333 = arith.index_cast %332 : i32 to index
    %c0_168 = arith.constant 0 : index
    %334 = vector.load %arg19[%333, %c0_168] : memref<20x32xf32, #tpu.memory_space<vmem>>, vector<5x32xf32>
    %335 = vector.broadcast %331 : vector<1x32xf32> to vector<5x32xf32>
    %336 = arith.mulf %335, %334 : vector<5x32xf32>
    %337 = arith.addf %329, %336 : vector<5x32xf32>
    %c9_i32 = arith.constant 9 : i32
    %338 = arith.index_cast %c9_i32 : i32 to index
    %c0_169 = arith.constant 0 : index
    %339 = vector.load %arg14[%338, %c0_169] : memref<15x32xf32, #tpu.memory_space<vmem>>, vector<1x32xf32>
    %c1_i32_170 = arith.constant 1 : i32
    %340 = arith.addi %c9_i32, %c1_i32_170 : i32
    %341 = arith.index_cast %340 : i32 to index
    %c0_171 = arith.constant 0 : index
    %342 = vector.load %arg19[%341, %c0_171] : memref<20x32xf32, #tpu.memory_space<vmem>>, vector<5x32xf32>
    %343 = vector.broadcast %339 : vector<1x32xf32> to vector<5x32xf32>
    %344 = arith.mulf %343, %342 : vector<5x32xf32>
    %345 = arith.addf %337, %344 : vector<5x32xf32>
    %c10_i32 = arith.constant 10 : i32
    %346 = arith.index_cast %c10_i32 : i32 to index
    %c0_172 = arith.constant 0 : index
    %347 = vector.load %arg14[%346, %c0_172] : memref<15x32xf32, #tpu.memory_space<vmem>>, vector<1x32xf32>
    %c1_i32_173 = arith.constant 1 : i32
    %348 = arith.addi %c10_i32, %c1_i32_173 : i32
    %349 = arith.index_cast %348 : i32 to index
    %c0_174 = arith.constant 0 : index
    %350 = vector.load %arg19[%349, %c0_174] : memref<20x32xf32, #tpu.memory_space<vmem>>, vector<5x32xf32>
    %351 = vector.broadcast %347 : vector<1x32xf32> to vector<5x32xf32>
    %352 = arith.mulf %351, %350 : vector<5x32xf32>
    %353 = arith.addf %345, %352 : vector<5x32xf32>
    %c11_i32 = arith.constant 11 : i32
    %354 = arith.index_cast %c11_i32 : i32 to index
    %c0_175 = arith.constant 0 : index
    %355 = vector.load %arg14[%354, %c0_175] : memref<15x32xf32, #tpu.memory_space<vmem>>, vector<1x32xf32>
    %c1_i32_176 = arith.constant 1 : i32
    %356 = arith.addi %c11_i32, %c1_i32_176 : i32
    %357 = arith.index_cast %356 : i32 to index
    %c0_177 = arith.constant 0 : index
    %358 = vector.load %arg19[%357, %c0_177] : memref<20x32xf32, #tpu.memory_space<vmem>>, vector<5x32xf32>
    %359 = vector.broadcast %355 : vector<1x32xf32> to vector<5x32xf32>
    %360 = arith.mulf %359, %358 : vector<5x32xf32>
    %361 = arith.addf %353, %360 : vector<5x32xf32>
    %c12_i32 = arith.constant 12 : i32
    %362 = arith.index_cast %c12_i32 : i32 to index
    %c0_178 = arith.constant 0 : index
    %363 = vector.load %arg14[%362, %c0_178] : memref<15x32xf32, #tpu.memory_space<vmem>>, vector<1x32xf32>
    %c1_i32_179 = arith.constant 1 : i32
    %364 = arith.addi %c12_i32, %c1_i32_179 : i32
    %365 = arith.index_cast %364 : i32 to index
    %c0_180 = arith.constant 0 : index
    %366 = vector.load %arg19[%365, %c0_180] : memref<20x32xf32, #tpu.memory_space<vmem>>, vector<5x32xf32>
    %367 = vector.broadcast %363 : vector<1x32xf32> to vector<5x32xf32>
    %368 = arith.mulf %367, %366 : vector<5x32xf32>
    %369 = arith.addf %361, %368 : vector<5x32xf32>
    %c13_i32 = arith.constant 13 : i32
    %370 = arith.index_cast %c13_i32 : i32 to index
    %c0_181 = arith.constant 0 : index
    %371 = vector.load %arg14[%370, %c0_181] : memref<15x32xf32, #tpu.memory_space<vmem>>, vector<1x32xf32>
    %c1_i32_182 = arith.constant 1 : i32
    %372 = arith.addi %c13_i32, %c1_i32_182 : i32
    %373 = arith.index_cast %372 : i32 to index
    %c0_183 = arith.constant 0 : index
    %374 = vector.load %arg19[%373, %c0_183] : memref<20x32xf32, #tpu.memory_space<vmem>>, vector<5x32xf32>
    %375 = vector.broadcast %371 : vector<1x32xf32> to vector<5x32xf32>
    %376 = arith.mulf %375, %374 : vector<5x32xf32>
    %377 = arith.addf %369, %376 : vector<5x32xf32>
    %c14_i32 = arith.constant 14 : i32
    %378 = arith.index_cast %c14_i32 : i32 to index
    %c0_184 = arith.constant 0 : index
    %379 = vector.load %arg14[%378, %c0_184] : memref<15x32xf32, #tpu.memory_space<vmem>>, vector<1x32xf32>
    %c1_i32_185 = arith.constant 1 : i32
    %380 = arith.addi %c14_i32, %c1_i32_185 : i32
    %381 = arith.index_cast %380 : i32 to index
    %c0_186 = arith.constant 0 : index
    %382 = vector.load %arg19[%381, %c0_186] : memref<20x32xf32, #tpu.memory_space<vmem>>, vector<5x32xf32>
    %383 = vector.broadcast %379 : vector<1x32xf32> to vector<5x32xf32>
    %384 = arith.mulf %383, %382 : vector<5x32xf32>
    %385 = arith.addf %377, %384 : vector<5x32xf32>
    %c15_i32 = arith.constant 15 : i32
    %c14 = arith.constant 14 : index
    %c0_187 = arith.constant 0 : index
    %386 = vector.load %arg3[%c14, %c0_187] : memref<23x96xf32, #tpu.memory_space<vmem>>, vector<1x32xf32>
    %387 = vector.broadcast %386 : vector<1x32xf32> to vector<5x32xf32>
    %388 = arith.mulf %385, %387 : vector<5x32xf32>
    %c15 = arith.constant 15 : index
    %c0_188 = arith.constant 0 : index
    %389 = vector.load %arg3[%c15, %c0_188] : memref<23x96xf32, #tpu.memory_space<vmem>>, vector<1x32xf32>
    %390 = vector.broadcast %389 : vector<1x32xf32> to vector<5x32xf32>
    %391 = arith.addf %388, %390 : vector<5x32xf32>
    %cst_189 = arith.constant 0.000000e+00 : f32
    %392 = vector.broadcast %cst_189 : f32 to vector<5x32xf32>
    %393 = arith.subf %392, %391 : vector<5x32xf32>
    %394 = math.exp %393 : vector<5x32xf32>
    %cst_190 = arith.constant 1.000000e+00 : f32
    %395 = vector.broadcast %cst_190 : f32 to vector<5x32xf32>
    %396 = arith.addf %395, %394 : vector<5x32xf32>
    %cst_191 = arith.constant 1.000000e+00 : f32
    %397 = vector.broadcast %cst_191 : f32 to vector<5x32xf32>
    %398 = arith.divf %397, %396 : vector<5x32xf32>
    %399 = arith.mulf %391, %398 : vector<5x32xf32>
    %400 = arith.truncf %399 : vector<5x32xf32> to vector<5x32xbf16>
    %c0_192 = arith.constant 0 : index
    %c0_193 = arith.constant 0 : index
    %401 = vector.load %arg11[%c0_192, %c0_193] : memref<32x32xbf16, #tpu.memory_space<vmem>>, vector<32x32xbf16>
    %cst_194 = arith.constant dense<0.000000e+00> : vector<5x32xf32>
    %402 = tpu.matmul %400, %401, %cst_194 {dimension_numbers = #tpu.dot_dimension_numbers<[1], [0], [0], [1], [0, 0, 1, 1], [], []>} : vector<5x32xbf16>, vector<32x32xbf16>, vector<5x32xf32> -> vector<5x32xf32>
    %403 = arith.addf %215, %402 : vector<5x32xf32>
    %c16_195 = arith.constant 16 : index
    %c0_196 = arith.constant 0 : index
    %404 = vector.load %arg3[%c16_195, %c0_196] : memref<23x96xf32, #tpu.memory_space<vmem>>, vector<1x32xf32>
    %405 = vector.broadcast %404 : vector<1x32xf32> to vector<5x32xf32>
    %406 = arith.addf %403, %405 : vector<5x32xf32>
    %cst_197 = arith.constant dense<0.000000e+00> : vector<5xf32>
    %407 = vector.multi_reduction <add>, %406, %cst_197 [1] : vector<5x32xf32> to vector<5xf32>
    %408 = vector.shape_cast %407 : vector<5xf32> to vector<5x1xf32>
    %cst_198 = arith.constant 3.200000e+01 : f32
    %409 = vector.broadcast %cst_198 : f32 to vector<5x1xf32>
    %410 = arith.divf %408, %409 : vector<5x1xf32>
    %411 = vector.broadcast %410 : vector<5x1xf32> to vector<5x32xf32>
    %412 = arith.subf %406, %411 : vector<5x32xf32>
    %413 = arith.mulf %412, %412 : vector<5x32xf32>
    %cst_199 = arith.constant dense<0.000000e+00> : vector<5xf32>
    %414 = vector.multi_reduction <add>, %413, %cst_199 [1] : vector<5x32xf32> to vector<5xf32>
    %415 = vector.shape_cast %414 : vector<5xf32> to vector<5x1xf32>
    %cst_200 = arith.constant 3.200000e+01 : f32
    %416 = vector.broadcast %cst_200 : f32 to vector<5x1xf32>
    %417 = arith.divf %415, %416 : vector<5x1xf32>
    %418 = vector.broadcast %410 : vector<5x1xf32> to vector<5x32xf32>
    %419 = arith.subf %406, %418 : vector<5x32xf32>
    %cst_201 = arith.constant 9.99999974E-6 : f32
    %420 = vector.broadcast %cst_201 : f32 to vector<5x1xf32>
    %421 = arith.addf %417, %420 : vector<5x1xf32>
    %422 = math.rsqrt %421 : vector<5x1xf32>
    %423 = vector.broadcast %422 : vector<5x1xf32> to vector<5x32xf32>
    %424 = arith.mulf %419, %423 : vector<5x32xf32>
    %c17 = arith.constant 17 : index
    %c0_202 = arith.constant 0 : index
    %425 = vector.load %arg3[%c17, %c0_202] : memref<23x96xf32, #tpu.memory_space<vmem>>, vector<1x32xf32>
    %426 = vector.broadcast %425 : vector<1x32xf32> to vector<5x32xf32>
    %427 = arith.mulf %424, %426 : vector<5x32xf32>
    %c18 = arith.constant 18 : index
    %c0_203 = arith.constant 0 : index
    %428 = vector.load %arg3[%c18, %c0_203] : memref<23x96xf32, #tpu.memory_space<vmem>>, vector<1x32xf32>
    %429 = vector.broadcast %428 : vector<1x32xf32> to vector<5x32xf32>
    %430 = arith.addf %427, %429 : vector<5x32xf32>
    %431 = arith.truncf %430 : vector<5x32xf32> to vector<5x32xbf16>
    %c0_204 = arith.constant 0 : index
    %c0_205 = arith.constant 0 : index
    %432 = vector.load %arg12[%c0_204, %c0_205] : memref<32x64xbf16, #tpu.memory_space<vmem>>, vector<32x64xbf16>
    %cst_206 = arith.constant dense<0.000000e+00> : vector<5x64xf32>
    %433 = tpu.matmul %431, %432, %cst_206 {dimension_numbers = #tpu.dot_dimension_numbers<[1], [0], [0], [1], [0, 0, 1, 1], [], []>} : vector<5x32xbf16>, vector<32x64xbf16>, vector<5x64xf32> -> vector<5x64xf32>
    %c19 = arith.constant 19 : index
    %c0_207 = arith.constant 0 : index
    %434 = vector.load %arg3[%c19, %c0_207] : memref<23x96xf32, #tpu.memory_space<vmem>>, vector<1x64xf32>
    %435 = vector.broadcast %434 : vector<1x64xf32> to vector<5x64xf32>
    %436 = arith.addf %433, %435 : vector<5x64xf32>
    %cst_208 = arith.constant 0.000000e+00 : f32
    %437 = vector.broadcast %cst_208 : f32 to vector<5x64xf32>
    %438 = arith.subf %437, %436 : vector<5x64xf32>
    %439 = math.exp %438 : vector<5x64xf32>
    %cst_209 = arith.constant 1.000000e+00 : f32
    %440 = vector.broadcast %cst_209 : f32 to vector<5x64xf32>
    %441 = arith.addf %440, %439 : vector<5x64xf32>
    %cst_210 = arith.constant 1.000000e+00 : f32
    %442 = vector.broadcast %cst_210 : f32 to vector<5x64xf32>
    %443 = arith.divf %442, %441 : vector<5x64xf32>
    %444 = arith.mulf %436, %443 : vector<5x64xf32>
    %445 = arith.truncf %444 : vector<5x64xf32> to vector<5x64xbf16>
    %c0_211 = arith.constant 0 : index
    %c0_212 = arith.constant 0 : index
    %446 = vector.load %arg13[%c0_211, %c0_212] : memref<64x32xbf16, #tpu.memory_space<vmem>>, vector<64x32xbf16>
    %cst_213 = arith.constant dense<0.000000e+00> : vector<5x32xf32>
    %447 = tpu.matmul %445, %446, %cst_213 {dimension_numbers = #tpu.dot_dimension_numbers<[1], [0], [0], [1], [0, 0, 1, 1], [], []>} : vector<5x64xbf16>, vector<64x32xbf16>, vector<5x32xf32> -> vector<5x32xf32>
    %c20 = arith.constant 20 : index
    %c0_214 = arith.constant 0 : index
    %448 = vector.load %arg3[%c20, %c0_214] : memref<23x96xf32, #tpu.memory_space<vmem>>, vector<1x32xf32>
    %449 = vector.broadcast %448 : vector<1x32xf32> to vector<5x32xf32>
    %450 = arith.addf %447, %449 : vector<5x32xf32>
    %cst_215 = arith.constant 5.000000e-01 : f32
    %451 = vector.broadcast %cst_215 : f32 to vector<5x32xf32>
    %452 = arith.mulf %451, %450 : vector<5x32xf32>
    %453 = arith.addf %406, %452 : vector<5x32xf32>
    %cst_216 = arith.constant dense<0.000000e+00> : vector<5xf32>
    %454 = vector.multi_reduction <add>, %453, %cst_216 [1] : vector<5x32xf32> to vector<5xf32>
    %455 = vector.shape_cast %454 : vector<5xf32> to vector<5x1xf32>
    %cst_217 = arith.constant 3.200000e+01 : f32
    %456 = vector.broadcast %cst_217 : f32 to vector<5x1xf32>
    %457 = arith.divf %455, %456 : vector<5x1xf32>
    %458 = vector.broadcast %457 : vector<5x1xf32> to vector<5x32xf32>
    %459 = arith.subf %453, %458 : vector<5x32xf32>
    %460 = arith.mulf %459, %459 : vector<5x32xf32>
    %cst_218 = arith.constant dense<0.000000e+00> : vector<5xf32>
    %461 = vector.multi_reduction <add>, %460, %cst_218 [1] : vector<5x32xf32> to vector<5xf32>
    %462 = vector.shape_cast %461 : vector<5xf32> to vector<5x1xf32>
    %cst_219 = arith.constant 3.200000e+01 : f32
    %463 = vector.broadcast %cst_219 : f32 to vector<5x1xf32>
    %464 = arith.divf %462, %463 : vector<5x1xf32>
    %465 = vector.broadcast %457 : vector<5x1xf32> to vector<5x32xf32>
    %466 = arith.subf %453, %465 : vector<5x32xf32>
    %cst_220 = arith.constant 9.99999974E-6 : f32
    %467 = vector.broadcast %cst_220 : f32 to vector<5x1xf32>
    %468 = arith.addf %464, %467 : vector<5x1xf32>
    %469 = math.rsqrt %468 : vector<5x1xf32>
    %470 = vector.broadcast %469 : vector<5x1xf32> to vector<5x32xf32>
    %471 = arith.mulf %466, %470 : vector<5x32xf32>
    %c21 = arith.constant 21 : index
    %c0_221 = arith.constant 0 : index
    %472 = vector.load %arg3[%c21, %c0_221] : memref<23x96xf32, #tpu.memory_space<vmem>>, vector<1x32xf32>
    %473 = vector.broadcast %472 : vector<1x32xf32> to vector<5x32xf32>
    %474 = arith.mulf %471, %473 : vector<5x32xf32>
    %c22 = arith.constant 22 : index
    %c0_222 = arith.constant 0 : index
    %475 = vector.load %arg3[%c22, %c0_222] : memref<23x96xf32, #tpu.memory_space<vmem>>, vector<1x32xf32>
    %476 = vector.broadcast %475 : vector<1x32xf32> to vector<5x32xf32>
    %477 = arith.addf %474, %476 : vector<5x32xf32>
    %c0_223 = arith.constant 0 : index
    %c0_224 = arith.constant 0 : index
    %c0_225 = arith.constant 0 : index
    %478 = vector.load %arg15[%c0_223, %c0_224, %c0_225] : memref<1x5x32xf32, #tpu.memory_space<vmem>>, vector<1x5x32xf32>
    %479 = vector.shape_cast %478 : vector<1x5x32xf32> to vector<5x32xf32>
    %480 = vector.shape_cast %477 : vector<5x32xf32> to vector<1x5x32xf32>
    tpu.vector_store %arg15[%c0_223, %c0_224, %c0_225], %480 {strides = array<i32>} : memref<1x5x32xf32, #tpu.memory_space<vmem>>, vector<1x5x32xf32>,
    return
  }
  func.func @transform_0(%arg0: i32) -> (i32, i32, i32) {
    %c0_i32 = arith.constant 0 : i32
    %c0_i32_0 = arith.constant 0 : i32
    %c0_i32_1 = arith.constant 0 : i32
    return %arg0, %c0_i32, %c0_i32_0 : i32, i32, i32
  }
  func.func @transform_1(%arg0: i32) -> (i32, i32) {
    %c0_i32 = arith.constant 0 : i32
    %c0_i32_0 = arith.constant 0 : i32
    %c0_i32_1 = arith.constant 0 : i32
    return %c0_i32, %c0_i32_0 : i32, i32
  }
  func.func @transform_2(%arg0: i32) -> (i32, i32) {
    %c0_i32 = arith.constant 0 : i32
    %c0_i32_0 = arith.constant 0 : i32
    %c0_i32_1 = arith.constant 0 : i32
    return %c0_i32, %c0_i32_0 : i32, i32
  }
  func.func @transform_3(%arg0: i32) -> (i32, i32) {
    %c0_i32 = arith.constant 0 : i32
    %c0_i32_0 = arith.constant 0 : i32
    %c0_i32_1 = arith.constant 0 : i32
    return %c0_i32, %c0_i32_0 : i32, i32
  }
  func.func @transform_4(%arg0: i32) -> (i32, i32) {
    %c0_i32 = arith.constant 0 : i32
    %c0_i32_0 = arith.constant 0 : i32
    %c0_i32_1 = arith.constant 0 : i32
    return %c0_i32, %c0_i32_0 : i32, i32
  }
  func.func @transform_5(%arg0: i32) -> (i32, i32) {
    %c0_i32 = arith.constant 0 : i32
    %c0_i32_0 = arith.constant 0 : i32
    %c0_i32_1 = arith.constant 0 : i32
    return %c0_i32, %c0_i32_0 : i32, i32
  }
  func.func @transform_6(%arg0: i32) -> (i32, i32) {
    %c0_i32 = arith.constant 0 : i32
    %c0_i32_0 = arith.constant 0 : i32
    %c0_i32_1 = arith.constant 0 : i32
    return %c0_i32, %c0_i32_0 : i32, i32
  }
  func.func @transform_7(%arg0: i32) -> (i32, i32) {
    %c0_i32 = arith.constant 0 : i32
    %c0_i32_0 = arith.constant 0 : i32
    %c0_i32_1 = arith.constant 0 : i32
    return %c0_i32, %c0_i32_0 : i32, i32
  }
  func.func @transform_8(%arg0: i32) -> (i32, i32) {
    %c0_i32 = arith.constant 0 : i32
    %c0_i32_0 = arith.constant 0 : i32
    %c0_i32_1 = arith.constant 0 : i32
    return %c0_i32, %c0_i32_0 : i32, i32
  }
  func.func @transform_9(%arg0: i32) -> (i32, i32) {
    %c0_i32 = arith.constant 0 : i32
    %c0_i32_0 = arith.constant 0 : i32
    %c0_i32_1 = arith.constant 0 : i32
    return %c0_i32, %c0_i32_0 : i32, i32
  }
  func.func @transform_10(%arg0: i32) -> (i32, i32) {
    %c0_i32 = arith.constant 0 : i32
    %c0_i32_0 = arith.constant 0 : i32
    %c0_i32_1 = arith.constant 0 : i32
    return %c0_i32, %c0_i32_0 : i32, i32
  }
  func.func @transform_11(%arg0: i32) -> (i32, i32) {
    %c0_i32 = arith.constant 0 : i32
    %c0_i32_0 = arith.constant 0 : i32
    %c0_i32_1 = arith.constant 0 : i32
    return %c0_i32, %c0_i32_0 : i32, i32
  }
  func.func @transform_12(%arg0: i32) -> (i32, i32) {
    %c0_i32 = arith.constant 0 : i32
    %c0_i32_0 = arith.constant 0 : i32
    %c0_i32_1 = arith.constant 0 : i32
    return %c0_i32, %c0_i32_0 : i32, i32
  }
  func.func @transform_13(%arg0: i32) -> (i32, i32) {
    %c0_i32 = arith.constant 0 : i32
    %c0_i32_0 = arith.constant 0 : i32
    %c0_i32_1 = arith.constant 0 : i32
    return %c0_i32, %c0_i32_0 : i32, i32
  }
  func.func @transform_14(%arg0: i32) -> (i32, i32, i32) {
    %c0_i32 = arith.constant 0 : i32
    %c0_i32_0 = arith.constant 0 : i32
    %c0_i32_1 = arith.constant 0 : i32
    return %arg0, %c0_i32, %c0_i32_0 : i32, i32, i32
  }
}

</mosaic_0001>

<bundles_post_ra>
// kernel: conformer_forward.6
= control target key start
LH: loop header
LB: loop body
LE: loop exit
PB: predicated region body
PF: predicated region fallthrough
CT: control target
= control target key end

     0   :  { %vm71_vm0 = vcmask 1043456   ;;  %vm72_vm1 = vcmask 1044480   ;;  %v251_v0 = vmov 0.0   ;;  %v252_v2 = vmov 65535   ;;  %s399_s1 = inlined_call_operand.vmem [shape: bf16[9,32], index: 1, kind: input, shape index: {}]   ;;  %s400_s0 = inlined_call_operand.vmem [shape: f32[98,9], index: 0, kind: input, shape index: {}]   ;;  %s401_s2 = inlined_call_operand.vmem [shape: f32[1,32], index: 2, kind: input, shape index: {}]   ;;  %s402_s3 = inlined_call_operand.vmem [shape: f32[98,32], index: 3, kind: output, shape index: {}]  }
   0x1   :  { %215 = vmatprep.subr.bf16.mxu0 %v251_v0  ;;  %v250_v1 = vld [vmem:[%s399_s1] sm:$0x1f]   ;;  %245 = vmatprep.subr.bf16.mxu1 %v251_v0  ;;  %v73_v3 = vsel %vm71_vm0, 4294967295, %v252_v2  ;;  %v16_v5 = vld [vmem:[%s400_s0 + $0x8] sm:$0xff]  ;;  %vm253_vm2 = vmmov 0   ;;  %vm49_vm3 = vcmask 72704  }
   0x2   :  { %v15_v4 = vld [vmem:[%s400_s0] sm:$0xff]  ;;  %v74_v7 = vsel %vm72_vm1, %v73_v3, 0  ;;  %217 = vmatprep.mubr.msk.bf16.mxu0 %vm253_vm2, %v251_v0  ;;  %233 = vmatprep.mubr.msk.bf16.mxu1 %vm253_vm2, %v251_v0  ;;  %v24_v8 = vld [vmem:[%s400_s0 + $0x48] sm:$0xff]  ;;  %v17_v12 = vld [vmem:[%s400_s0 + $0x10] sm:$0xff]  ;;  %vm179_vm4 = vcmask 261120   ;;  %vm192_vm5 = vcmask 254976  }
   0x3   :  { %v23_v6 = vld [vmem:[%s400_s0 + $0x40] sm:$0xff]  ;;  %v76_v9 = vand.u32 %v250_v1, %v74_v7  ;;  %v28_v10 = vpack.c.bf16 %v16_v5, %v15_v4  ;;  %v18_v13 = vld [vmem:[%s400_s0 + $0x18] sm:$0xff]  ;;  %v25_v14 = vld [vmem:[%s400_s0 + $0x50] sm:$0xff] }
   0x4   :  { %v32_v11 = vpack.c.bf16 %v24_v8, %v23_v6  ;;  %v26_v15 = vld [vmem:[%s400_s0 + $0x58] sm:$0xff]  ;;  %v29_v16 = vpack.c.bf16 %v18_v13, %v17_v12  ;;  %v19_v18 = vld [vmem:[%s400_s0 + $0x20] sm:$0xff]  ;;  %v20_v19 = vld [vmem:[%s400_s0 + $0x28] sm:$0xff] }
   0x5   :  { %216 = vmatpush3.bf16.msra.mxu0 %v76_v9  ;;  %246 = vmatpush3.bf16.msra.mxu1 %v76_v9  ;;  %v33_v17 = vpack.c.bf16 %v26_v15, %v25_v14  ;;  %v27_v20 = vld [vmem:[%s400_s0 + $0x60] sm:$0x3]  ;;  %v30_v21 = vpack.c.bf16 %v20_v19, %v19_v18  ;;  %v21_v23 = vld [vmem:[%s400_s0 + $0x30] sm:$0xff]  ;;  %v22_v24 = vld [vmem:[%s400_s0 + $0x38] sm:$0xff] }
   0x6   :  { %v34_v22 = vpack.c.bf16 %v27_v20, %v27_v20  ;;  %v31_v25 = vpack.c.bf16 %v22_v24, %v21_v23  ;;  %v333_v26 = vld [vmem:[%s401_s2] ss:$0 sm:$0xff] }
   0x8   :  { %218 = vmatmul.mubr.msk.bf16.vlgmr.msra.gmra.mrb[0].mxu0 %vm49_vm3, %v28_v10  ;;  %234 = vmatmul.mubr.msk.bf16.vlgmr.msra.gmra.mrb[0].mxu1 %vm49_vm3, %v32_v11 }
   0x9   :  { %221 = vmatprep.mubr.msk.bf16.mxu0 %vm253_vm2, %v251_v0  ;;  %237 = vmatprep.mubr.msk.bf16.mxu1 %vm253_vm2, %v251_v0 }
  0x10   :  { %222 = vmatmul.mubr.msk.bf16.gmra.mrb[4].mxu0 %vm49_vm3, %v29_v16  ;;  %238 = vmatmul.mubr.msk.bf16.gmra.mrb[4].mxu1 %vm49_vm3, %v33_v17 }
  0x11   :  { %225 = vmatprep.mubr.msk.bf16.mxu0 %vm253_vm2, %v251_v0  ;;  %241 = vmatprep.mubr.msk.bf16.mxu1 %vm253_vm2, %v251_v0 }
  0x18   :  { %226 = vmatmul.mubr.msk.bf16.gmra.mrb[8].mxu0 %vm49_vm3, %v30_v21  ;;  %242 = vmatmul.mubr.msk.bf16.gmra.mrb[8].mxu1 %vm49_vm3, %v34_v22 }
  0x19   :  { %229 = vmatprep.mubr.msk.bf16.mxu0 %vm253_vm2, %v251_v0 }
  0x20   :  { %230 = vmatmul.mubr.msk.bf16.gmra.mrb[12].mxu0 %vm49_vm3, %v31_v25 }
  0xdb   :  { %v112_v27 = vpop.f32.mrb[0].mxu0  ;;  %v144_v28 = vpop.f32.mrb[0].mxu1 }
  0xdc   :  { %v113_v29 = vadd.f32 %v333_v26, %v112_v27  ;;  %v219_v30 = vpop.f32.mrb[1].mxu0  ;;  %v145_v31 = vadd.f32 %v333_v26, %v144_v28  ;;  %v235_v32 = vpop.f32.mrb[1].mxu1 }
  0xdd   :  { %v115_v33 = vpop.f32.mrb[2].mxu0  ;;  %v147_v34 = vpop.f32.mrb[2].mxu1 }
  0xde   :  { %v166_v35 = vmax.f32 %v113_v29, 0.0  ;;  %v116_v36 = vadd.f32 %v333_v26, %v115_v33  ;;  %v220_v37 = vpop.f32.mrb[3].mxu0  ;;  %v174_v38 = vmax.f32 %v145_v31, 0.0  ;;  %v148_v39 = vadd.f32 %v333_v26, %v147_v34  ;;  %v236_v40 = vpop.f32.mrb[3].mxu1 }
  0xe0   :  { %180 = vst.msk [vmem:[%s402_s3] sm:$0xff] %vm179_vm4, %v166_v35  ;;  %v167_v41 = vmax.f32 %v116_v36, 0.0  ;;  %188 = vst.msk [vmem:[%s402_s3 + $0x40] sm:$0xff] %vm179_vm4, %v174_v38  ;;  %v175_v42 = vmax.f32 %v148_v39, 0.0 }
  0xe2   :  { %181 = vst.msk [vmem:[%s402_s3 + $0x8] sm:$0xff] %vm179_vm4, %v167_v41  ;;  %189 = vst.msk [vmem:[%s402_s3 + $0x48] sm:$0xff] %vm179_vm4, %v175_v42 }
  0xe3   :  { %v120_v43 = vpop.f32.mrb[4].mxu0  ;;  %v152_v44 = vpop.f32.mrb[4].mxu1 }
  0xe4   :  { %v121_v45 = vadd.f32 %v333_v26, %v120_v43  ;;  %v223_v46 = vpop.f32.mrb[5].mxu0  ;;  %v153_v47 = vadd.f32 %v333_v26, %v152_v44  ;;  %v239_v48 = vpop.f32.mrb[5].mxu1 }
  0xe5   :  { %v123_v49 = vpop.f32.mrb[6].mxu0  ;;  %v155_v50 = vpop.f32.mrb[6].mxu1 }
  0xe6   :  { %v168_v51 = vmax.f32 %v121_v45, 0.0  ;;  %v124_v52 = vadd.f32 %v333_v26, %v123_v49  ;;  %v224_v53 = vpop.f32.mrb[7].mxu0  ;;  %v176_v54 = vmax.f32 %v153_v47, 0.0  ;;  %v156_v55 = vadd.f32 %v333_v26, %v155_v50  ;;  %v240_v56 = vpop.f32.mrb[7].mxu1 }
  0xe8   :  { %182 = vst.msk [vmem:[%s402_s3 + $0x10] sm:$0xff] %vm179_vm4, %v168_v51  ;;  %v169_v57 = vmax.f32 %v124_v52, 0.0  ;;  %190 = vst.msk [vmem:[%s402_s3 + $0x50] sm:$0xff] %vm179_vm4, %v176_v54  ;;  %v177_v58 = vmax.f32 %v156_v55, 0.0 }
  0xea   :  { %183 = vst.msk [vmem:[%s402_s3 + $0x18] sm:$0xff] %vm179_vm4, %v169_v57  ;;  %191 = vst.msk [vmem:[%s402_s3 + $0x58] sm:$0xff] %vm179_vm4, %v177_v58 }
  0xeb   :  { %v128_v59 = vpop.f32.mrb[8].mxu0  ;;  %v160_v60 = vpop.f32.mrb[8].mxu1 }
  0xec   :  { %v129_v61 = vadd.f32 %v333_v26, %v128_v59  ;;  %v227_v62 = vpop.f32.mrb[9].mxu0  ;;  %v161_v63 = vadd.f32 %v333_v26, %v160_v60  ;;  %v243_v0 = vpop.f32.mrb[9].mxu1 }
  0xed   :  { %v131_v1 = vpop.f32.mrb[10].mxu0  ;;  %v163_v2 = vpop.f32.mrb[10].mxu1 }
  0xee   :  { %v170_v3 = vmax.f32 %v129_v61, 0.0  ;;  %v132_v4 = vadd.f32 %v333_v26, %v131_v1  ;;  %v228_v5 = vpop.f32.mrb[11].mxu0  ;;  %v178_v6 = vmax.f32 %v161_v63, 0.0  ;;  %v244_v7 = vpop.f32.mrb[11].mxu1 }
  0xf0   :  { %184 = vst.msk [vmem:[%s402_s3 + $0x20] sm:$0xff] %vm179_vm4, %v170_v3  ;;  %v171_v8 = vmax.f32 %v132_v4, 0.0 }
  0xf1   :  { %193 = vst.msk [vmem:[%s402_s3 + $0x60] sm:$0x3] %vm192_vm5, %v178_v6 }
  0xf2   :  { %185 = vst.msk [vmem:[%s402_s3 + $0x28] sm:$0xff] %vm179_vm4, %v171_v8 }
  0xf3   :  { %v136_v9 = vpop.f32.mrb[12].mxu0 }
  0xf4   :  { %v137_v10 = vadd.f32 %v333_v26, %v136_v9  ;;  %v231_v11 = vpop.f32.mrb[13].mxu0 }
  0xf5   :  { %v139_v12 = vpop.f32.mrb[14].mxu0 }
  0xf6   :  { %v172_v13 = vmax.f32 %v137_v10, 0.0  ;;  %v140_v14 = vadd.f32 %v333_v26, %v139_v12  ;;  %v232_v15 = vpop.f32.mrb[15].mxu0 }
  0xf8   :  { %186 = vst.msk [vmem:[%s402_s3 + $0x30] sm:$0xff] %vm179_vm4, %v172_v13  ;;  %v173_v16 = vmax.f32 %v140_v14, 0.0 }
  0xfa   :  { %187 = vst.msk [vmem:[%s402_s3 + $0x38] sm:$0xff] %vm179_vm4, %v173_v16 }

// kernel: conformer_forward.7
= control target key start
LH: loop header
LB: loop body
LE: loop exit
PB: predicated region body
PF: predicated region fallthrough
CT: control target
= control target key end

     0   :  { %vm199_vm0 = vcmask 261120   ;;  %vm353_vm1 = vcmask 254976   ;;  %s645_s1 = inlined_call_operand.vmem [shape: bf16[288,32], index: 1, kind: input, shape index: {}]   ;;  %s646_s0 = inlined_call_operand.vmem [shape: f32[50,288], index: 0, kind: input, shape index: {}]   ;;  %s647_s2 = inlined_call_operand.vmem [shape: f32[1,32], index: 2, kind: input, shape index: {}]   ;;  %s648_s3 = inlined_call_operand.vmem [shape: f32[50,32], index: 3, kind: output, shape index: {}]  }
   0x1   :  { %v456_v0 = vld [vmem:[%s645_s1 + $0x40] sm:$0xff]   ;;  %v458_v2 = vld [vmem:[%s645_s1 + $0x48] sm:$0xff]   ;;  %v460_v4 = vld [vmem:[%s645_s1 + $0x50] sm:$0xff]  }
   0x2   :  { %v457_v1 = vld [vmem:[%s645_s1] sm:$0xff]   ;;  %382 = vmatprep.subr.bf16.mxu0 %v456_v0  ;;  %440 = vmatprep.subr.bf16.mxu1 %v456_v0  ;;  %v459_v3 = vld [vmem:[%s645_s1 + $0x8] sm:$0xff]   ;;  %v461_v5 = vld [vmem:[%s645_s1 + $0x10] sm:$0xff]  }
   0x3   :  { %383 = vmatpush3.bf16.msra.mxu0 %v457_v1  ;;  %448 = vmatpush3.bf16.msra.mxu1 %v457_v1  ;;  %v462_v6 = vld [vmem:[%s645_s1 + $0x58] sm:$0xff]   ;;  %v464_v8 = vld [vmem:[%s645_s1 + $0x60] sm:$0xff]   ;;  %v466_v10 = vld [vmem:[%s645_s1 + $0x68] sm:$0xff]  }
   0x4   :  { %384 = vmatprep.subr.bf16.mxu0 %v458_v2  ;;  %441 = vmatprep.subr.bf16.mxu1 %v458_v2  ;;  %v463_v7 = vld [vmem:[%s645_s1 + $0x18] sm:$0xff]   ;;  %v465_v9 = vld [vmem:[%s645_s1 + $0x20] sm:$0xff]   ;;  %v16_v11 = vld [vmem:[%s646_s0 + $0x8] sm:$0xff] }
   0x5   :  { %v19_v12 = vld [vmem:[%s646_s0 + $0x20] sm:$0xff]  ;;  %v34_v13 = vld [vmem:[%s646_s0 + $0x98] sm:$0x3]  ;;  %v467_v16 = vld [vmem:[%s645_s1 + $0x28] sm:$0xff]  }
   0x6   :  { %v37_v14 = vpack.c.bf16 %v19_v12, %v16_v11  ;;  %v46_v15 = vpack.c.bf16 %v34_v13, %v34_v13  ;;  %v468_v17 = vld [vmem:[%s645_s1 + $0x70] sm:$0xff]   ;;  %v470_v19 = vld [vmem:[%s645_s1 + $0x78] sm:$0xff]   ;;  %v15_v21 = vld [vmem:[%s646_s0] sm:$0xff] }
   0x7   :  { %385 = vmatpush3.bf16.msra.mxu0 %v459_v3  ;;  %449 = vmatpush3.bf16.msra.mxu1 %v459_v3  ;;  %v469_v18 = vld [vmem:[%s645_s1 + $0x30] sm:$0xff]   ;;  %v471_v20 = vld [vmem:[%s645_s1 + $0x38] sm:$0xff]   ;;  %v472_v24 = vld [vmem:[%s645_s1 + $0x80] sm:$0xff]  }
   0x8   :  { %386 = vmatprep.subr.bf16.mxu0 %v460_v4  ;;  %442 = vmatprep.subr.bf16.mxu1 %v460_v4  ;;  %v18_v22 = vld [vmem:[%s646_s0 + $0x18] sm:$0xff]  ;;  %v33_v23 = vld [vmem:[%s646_s0 + $0x90] sm:$0x3]  ;;  %v20_v28 = vld [vmem:[%s646_s0 + $0x28] sm:$0xff] }
   0x9   :  { %244 = vmatprep.mubr.bf16.mxu0 %v37_v14  ;;  %268 = vmatprep.mubr.bf16.mxu1 %v46_v15  ;;  %v22_v25 = vld [vmem:[%s646_s0 + $0x38] sm:$0xff]  ;;  %v25_v26 = vld [vmem:[%s646_s0 + $0x50] sm:$0xff]  ;;  %v36_v29 = vpack.c.bf16 %v18_v22, %v15_v21  ;;  %v45_v30 = vpack.c.bf16 %v33_v23, %v33_v23  ;;  %v473_v32 = vld [vmem:[%s645_s1 + $0x88] sm:$0xff]  }
   0xa   :  { %v17_v27 = vld [vmem:[%s646_s0 + $0x10] sm:$0xff]  ;;  %v40_v31 = vpack.c.bf16 %v25_v26, %v22_v25  ;;  %v24_v35 = vld [vmem:[%s646_s0 + $0x48] sm:$0xff]  ;;  %v23_v36 = vld [vmem:[%s646_s0 + $0x40] sm:$0xff] }
   0xb   :  { %387 = vmatpush3.bf16.msra.mxu0 %v461_v5  ;;  %450 = vmatpush3.bf16.msra.mxu1 %v461_v5  ;;  %v38_v33 = vpack.c.bf16 %v20_v28, %v17_v27  ;;  %v21_v34 = vld [vmem:[%s646_s0 + $0x30] sm:$0xff]  ;;  %v26_v37 = vld [vmem:[%s646_s0 + $0x58] sm:$0xff]  ;;  %v28_v38 = vld [vmem:[%s646_s0 + $0x68] sm:$0xff] }
   0xc   :  { %388 = vmatprep.subr.bf16.mxu0 %v462_v6  ;;  %443 = vmatprep.subr.bf16.mxu1 %v462_v6  ;;  %v31_v39 = vld [vmem:[%s646_s0 + $0x80] sm:$0xff]  ;;  %v29_v40 = vld [vmem:[%s646_s0 + $0x70] sm:$0xff]  ;;  %v32_v41 = vld [vmem:[%s646_s0 + $0x88] sm:$0xff]  ;;  %v39_v42 = vpack.c.bf16 %v24_v35, %v21_v34  ;;  %v41_v43 = vpack.c.bf16 %v26_v37, %v23_v36 }
   0xd   :  { %v43_v44 = vpack.c.bf16 %v31_v39, %v28_v38  ;;  %v44_v45 = vpack.c.bf16 %v32_v41, %v29_v40  ;;  %v27_v46 = vld [vmem:[%s646_s0 + $0x60] sm:$0xff]  ;;  %v30_v47 = vld [vmem:[%s646_s0 + $0x78] sm:$0xff] }
   0xe   :  { %v35_v48 = vld [vmem:[%s646_s0 + $0xa0] sm:$0x3]  ;;  %v42_v49 = vpack.c.bf16 %v30_v47, %v27_v46 }
   0xf   :  { %389 = vmatpush3.bf16.msra.mxu0 %v463_v7  ;;  %451 = vmatpush3.bf16.msra.mxu1 %v463_v7  ;;  %v47_v50 = vpack.c.bf16 %v35_v48, %v35_v48  ;;  %v359_v62 = vld [vmem:[%s647_s2] ss:$0 sm:$0xff] }
  0x10   :  { %390 = vmatprep.subr.bf16.mxu0 %v464_v8  ;;  %444 = vmatprep.subr.bf16.mxu1 %v464_v8 }
  0x13   :  { %391 = vmatpush3.bf16.msra.mxu0 %v465_v9  ;;  %452 = vmatpush3.bf16.msra.mxu1 %v465_v9 }
  0x14   :  { %392 = vmatprep.subr.bf16.mxu0 %v466_v10  ;;  %445 = vmatprep.subr.bf16.mxu1 %v466_v10 }
  0x17   :  { %393 = vmatpush3.bf16.msra.mxu0 %v467_v16  ;;  %453 = vmatpush3.bf16.msra.mxu1 %v467_v16 }
  0x18   :  { %394 = vmatprep.subr.bf16.mxu0 %v468_v17  ;;  %446 = vmatprep.subr.bf16.mxu1 %v468_v17 }
  0x1b   :  { %395 = vmatpush3.bf16.msra.mxu0 %v469_v18  ;;  %454 = vmatpush3.bf16.msra.mxu1 %v469_v18 }
  0x1c   :  { %396 = vmatprep.subr.bf16.mxu0 %v470_v19  ;;  %447 = vmatprep.subr.bf16.mxu1 %v470_v19 }
  0x1f   :  { %397 = vmatpush3.bf16.msra.mxu0 %v471_v20  ;;  %455 = vmatpush3.bf16.msra.mxu1 %v471_v20 }
  0x20   :  { %428 = vmatprep.subr.bf16.mxu1 %v472_v24 }
  0x22   :  { %245 = vmatmul.mubr.bf16.vlgmr.msra.gmra.mrb[0].mxu0 %v36_v29  ;;  %269 = vmatmul.mubr.bf16.vlgmr.msra.gmra.mrb[0].mxu1 %v45_v30 }
  0x23   :  { %429 = vmatpush3.bf16.msra.mxu1 %v472_v24  ;;  %252 = vmatprep.mubr.bf16.mxu0 %v40_v31 }
  0x24   :  { %430 = vmatprep.subr.bf16.mxu1 %v473_v32  ;;  %432 = vmatprep.mubr.msk.bf16.mxu1 %vm199_vm0, %v38_v33 }
  0x27   :  { %431 = vmatpush3.bf16.msra.mxu1 %v473_v32 }
  0x2a   :  { %253 = vmatmul.mubr.bf16.gmra.mrb[4].mxu0 %v39_v42  ;;  %433 = vmatmul.mubr.msk.bf16.vlgmr.msra.gmra.mrb[4].mxu1 %vm199_vm0, %v41_v43 }
  0x2b   :  { %260 = vmatprep.mubr.bf16.mxu0 %v43_v44  ;;  %436 = vmatprep.mubr.msk.bf16.mxu1 %vm199_vm0, %v44_v45 }
  0x32   :  { %261 = vmatmul.mubr.bf16.gmra.mrb[8].mxu0 %v42_v49  ;;  %437 = vmatmul.mubr.msk.bf16.gmra.mrb[8].mxu1 %vm199_vm0, %v47_v50 }
  0xf5   :  { %v398_v51 = vpop.f32.mrb[0].mxu0  ;;  %v416_v52 = vpop.f32.mrb[0].mxu1 }
  0xf6   :  { %v399_v53 = vpop.f32.mrb[1].mxu0  ;;  %v417_v54 = vpop.f32.mrb[1].mxu1 }
  0xf7   :  { %v400_v55 = vadd.f32 %v399_v53, %v398_v51  ;;  %v401_v56 = vpop.f32.mrb[2].mxu0  ;;  %v418_v57 = vadd.f32 %v417_v54, %v416_v52  ;;  %v419_v58 = vpop.f32.mrb[2].mxu1 }
  0xf8   :  { %v402_v59 = vpop.f32.mrb[3].mxu0  ;;  %v420_v60 = vpop.f32.mrb[3].mxu1 }
  0xf9   :  { %v403_v61 = vadd.f32 %v402_v59, %v401_v56  ;;  %v247_v1 = vadd.f32 %v400_v55, %v359_v62  ;;  %v271_v18 = vadd.f32 %v418_v57, %v359_v62 }
  0xfb   :  { %v250_v8 = vadd.f32 %v403_v61, %v359_v62 }
  0xfd   :  { %v404_v63 = vpop.f32.mrb[4].mxu0  ;;  %v434_v0 = vpop.f32.mrb[4].mxu1 }
  0xfe   :  { %v405_v2 = vpop.f32.mrb[5].mxu0  ;;  %v310_v3 = vpop.f32.mrb[5].mxu1 }
  0xff   :  { %v406_v4 = vadd.f32 %v405_v2, %v404_v63  ;;  %v311_v5 = vadd.f32 %v310_v3, %v247_v1  ;;  %v407_v6 = vpop.f32.mrb[6].mxu0  ;;  %v435_v7 = vpop.f32.mrb[6].mxu1 }
 0x100   :  { %v408_v9 = vpop.f32.mrb[7].mxu0  ;;  %v313_v10 = vpop.f32.mrb[7].mxu1 }
 0x101   :  { %v255_v11 = vadd.f32 %v406_v4, %v359_v62  ;;  %v340_v12 = vmax.f32 %v311_v5, 0.0  ;;  %v409_v13 = vadd.f32 %v408_v9, %v407_v6  ;;  %v314_v14 = vadd.f32 %v313_v10, %v250_v8 }
 0x103   :  { %v319_v15 = vadd.f32 %v434_v0, %v255_v11  ;;  %347 = vst.msk [vmem:[%s648_s3] sm:$0xff] %vm199_vm0, %v340_v12  ;;  %v258_v16 = vadd.f32 %v409_v13, %v359_v62  ;;  %v341_v17 = vmax.f32 %v314_v14, 0.0 }
 0x105   :  { %v342_v19 = vmax.f32 %v319_v15, 0.0  ;;  %v322_v20 = vadd.f32 %v435_v7, %v258_v16  ;;  %348 = vst.msk [vmem:[%s648_s3 + $0x8] sm:$0xff] %vm199_vm0, %v341_v17  ;;  %v410_v21 = vpop.f32.mrb[8].mxu0  ;;  %v438_v22 = vpop.f32.mrb[8].mxu1 }
 0x106   :  { %v335_v23 = vadd.f32 %v438_v22, %v271_v18  ;;  %v411_v24 = vpop.f32.mrb[9].mxu0  ;;  %v326_v25 = vpop.f32.mrb[9].mxu1 }
 0x107   :  { %349 = vst.msk [vmem:[%s648_s3 + $0x10] sm:$0xff] %vm199_vm0, %v342_v19  ;;  %v343_v26 = vmax.f32 %v322_v20, 0.0  ;;  %v412_v27 = vadd.f32 %v411_v24, %v410_v21  ;;  %v413_v28 = vpop.f32.mrb[10].mxu0  ;;  %v439_v29 = vpop.f32.mrb[10].mxu1 }
 0x108   :  { %v346_v30 = vmax.f32 %v335_v23, 0.0  ;;  %v414_v31 = vpop.f32.mrb[11].mxu0  ;;  %v329_v32 = vpop.f32.mrb[11].mxu1 }
 0x109   :  { %350 = vst.msk [vmem:[%s648_s3 + $0x18] sm:$0xff] %vm199_vm0, %v343_v26  ;;  %v263_v33 = vadd.f32 %v412_v27, %v359_v62  ;;  %v415_v34 = vadd.f32 %v414_v31, %v413_v28 }
 0x10a   :  { %354 = vst.msk [vmem:[%s648_s3 + $0x30] sm:$0x3] %vm353_vm1, %v346_v30 }
 0x10b   :  { %v327_v35 = vadd.f32 %v326_v25, %v263_v33  ;;  %v266_v36 = vadd.f32 %v415_v34, %v359_v62 }
 0x10d   :  { %v344_v37 = vmax.f32 %v327_v35, 0.0  ;;  %v330_v38 = vadd.f32 %v329_v32, %v266_v36 }
 0x10f   :  { %351 = vst.msk [vmem:[%s648_s3 + $0x20] sm:$0xff] %vm199_vm0, %v344_v37  ;;  %v345_v39 = vmax.f32 %v330_v38, 0.0 }
 0x111   :  { %352 = vst.msk [vmem:[%s648_s3 + $0x28] sm:$0xff] %vm199_vm0, %v345_v39 }

// kernel: conformer_forward.8
= control target key start
LH: loop header
LB: loop body
LE: loop exit
PB: predicated region body
PF: predicated region fallthrough
CT: control target
= control target key end

     0   :  { %v185_v0 = vmov 0   ;;  %vm108_vm0 = vcmask 261120   ;;  %vm156_vm1 = vcmask 254976   ;;  %s259_s1 = inlined_call_operand.vmem [shape: bf16[160,32], index: 1, kind: input, shape index: {}]   ;;  %s260_s0 = inlined_call_operand.vmem [shape: f32[10,160], index: 0, kind: input, shape index: {}]   ;;  %s261_s2 = inlined_call_operand.vmem [shape: f32[1,32], index: 2, kind: input, shape index: {}]   ;;  %s262_s3 = inlined_call_operand.vmem [shape: f32[10,32], index: 3, kind: output, shape index: {}]  }
   0x1   :  { %112 = vmatprep.subr.bf16.mxu0 %v185_v0  ;;  %v175_v1 = vld [vmem:[%s259_s1] sm:$0xff]   ;;  %v176_v2 = vld [vmem:[%s259_s1 + $0x8] sm:$0xff]   ;;  %v177_v3 = vld [vmem:[%s259_s1 + $0x10] sm:$0xff]  }
   0x2   :  { %113 = vmatpush1.bf16.msra.mxu0 %v175_v1  ;;  %v178_v4 = vld [vmem:[%s259_s1 + $0x18] sm:$0xff]   ;;  %v16_v5 = vld [vmem:[%s260_s0 + $0x8] sm:$0xff]  ;;  %v179_v8 = vld [vmem:[%s259_s1 + $0x20] sm:$0xff]  }
   0x3   :  { %114 = vmatprep.subr.bf16.mxu0 %v185_v0  ;;  %v18_v6 = vld [vmem:[%s260_s0 + $0x18] sm:$0x3]  ;;  %v180_v9 = vld [vmem:[%s259_s1 + $0x28] sm:$0xff]   ;;  %v181_v10 = vld [vmem:[%s259_s1 + $0x30] sm:$0xff]  }
   0x4   :  { %v20_v7 = vpack.c.bf16 %v18_v6, %v16_v5  ;;  %v182_v11 = vld [vmem:[%s259_s1 + $0x38] sm:$0xff]   ;;  %v183_v12 = vld [vmem:[%s259_s1 + $0x40] sm:$0xff]   ;;  %v184_v13 = vld [vmem:[%s259_s1 + $0x48] sm:$0xff]  }
   0x5   :  { %v15_v14 = vld [vmem:[%s260_s0] sm:$0xff]  ;;  %v17_v15 = vld [vmem:[%s260_s0 + $0x10] sm:$0x3] }
   0x6   :  { %115 = vmatpush1.bf16.msra.mxu0 %v176_v2  ;;  %173 = vmatprep.mubr.msk.bf16.mxu0 %vm108_vm0, %v20_v7  ;;  %v19_v16 = vpack.c.bf16 %v17_v15, %v15_v14  ;;  %v162_v17 = vld [vmem:[%s261_s2] ss:$0 sm:$0xff] }
   0x7   :  { %116 = vmatprep.subr.bf16.mxu0 %v185_v0 }
   0xa   :  { %117 = vmatpush1.bf16.msra.mxu0 %v177_v3 }
   0xb   :  { %118 = vmatprep.subr.bf16.mxu0 %v185_v0 }
   0xe   :  { %119 = vmatpush1.bf16.msra.mxu0 %v178_v4 }
   0xf   :  { %120 = vmatprep.subr.bf16.mxu0 %v185_v0 }
  0x12   :  { %121 = vmatpush1.bf16.msra.mxu0 %v179_v8 }
  0x13   :  { %122 = vmatprep.subr.bf16.mxu0 %v185_v0 }
  0x16   :  { %123 = vmatpush1.bf16.msra.mxu0 %v180_v9 }
  0x17   :  { %124 = vmatprep.subr.bf16.mxu0 %v185_v0 }
  0x1a   :  { %125 = vmatpush1.bf16.msra.mxu0 %v181_v10 }
  0x1b   :  { %126 = vmatprep.subr.bf16.mxu0 %v185_v0 }
  0x1e   :  { %127 = vmatpush1.bf16.msra.mxu0 %v182_v11 }
  0x1f   :  { %128 = vmatprep.subr.bf16.mxu0 %v185_v0 }
  0x22   :  { %129 = vmatpush1.bf16.msra.mxu0 %v183_v12 }
  0x23   :  { %130 = vmatprep.subr.bf16.mxu0 %v185_v0 }
  0x26   :  { %131 = vmatpush1.bf16.msra.mxu0 %v184_v13 }
  0x29   :  { %145 = vmatmul.mubr.bf16.vlgmr.msra.gmra.mrb[0].mxu0 %v19_v16 }
  0xfc   :  { %v146_v18 = vpop.f32.mrb[0].mxu0 }
  0xfd   :  { %v147_v19 = vadd.f32 %v162_v17, %v146_v18  ;;  %v148_v20 = vpop.f32.mrb[1].mxu0 }
  0xfe   :  { %v149_v21 = vpop.f32.mrb[2].mxu0 }
  0xff   :  { %v153_v22 = vmul.f32 5.656854, %v147_v19  ;;  %v150_v23 = vadd.f32 %v162_v17, %v149_v21  ;;  %v151_v24 = vpop.f32.mrb[3].mxu0 }
 0x101   :  { %155 = vst.msk [vmem:[%s262_s3] sm:$0xff] %vm108_vm0, %v153_v22  ;;  %v154_v25 = vmul.f32 5.656854, %v150_v23 }
 0x103   :  { %157 = vst.msk [vmem:[%s262_s3 + $0x8] sm:$0x3] %vm156_vm1, %v154_v25 }

// kernel: conformer_forward.11
= control target key start
LH: loop header
LB: loop body
LE: loop exit
PB: predicated region body
PF: predicated region fallthrough
CT: control target
= control target key end

     0   :  { %s2259_s0 = inlined_call_operand.hbm [shape: f32[2,5,32], index: 0, kind: input, shape index: {}]   ;;  %s2260_s1 = inlined_call_operand.hbm [shape: f32[2,5,32], index: 1, kind: input, shape index: {}]   ;;  %s2261_s2 = inlined_call_operand.hbm [shape: bf16[64,32], index: 2, kind: input, shape index: {}]   ;;  %s2262_s3 = inlined_call_operand.hbm [shape: f32[1,32], index: 3, kind: input, shape index: {}]   ;;  %s2263_s4 = inlined_call_operand.hbm [shape: bf16[32,64], index: 4, kind: input, shape index: {}]   ;;  %s2264_s5 = inlined_call_operand.hbm [shape: f32[1,64], index: 5, kind: input, shape index: {}]   ;;  %s2265_s6 = inlined_call_operand.hbm [shape: f32[1,128], index: 6, kind: input, shape index: {}]   ;;  %s2266_s7 = inlined_call_operand.hbm [shape: f32[1,128], index: 7, kind: input, shape index: {}]   ;;  %s2267_s8 = inlined_call_operand.hbm [shape: bf16[128,16], index: 8, kind: input, shape index: {}]   ;;  %s2268_s9 = inlined_call_operand.hbm [shape: f32[1,16], index: 9, kind: input, shape index: {}]   ;;  %s2269_s10 = inlined_call_operand.hbm [shape: f32[2,1,16], index: 10, kind: output, shape index: {}]  }
   0x1   :  { %2278 = sst [smem:[#allocation30_spill]] %s2261_s2 }
   0x2   :  { %2279 = sst [smem:[#allocation31_spill]] %s2262_s3 }
   0x3   :  { %2280 = sst [smem:[#allocation32_spill]] %s2263_s4 }
   0x4   :  { %2281 = sst [smem:[#allocation33_spill]] %s2264_s5 }
   0x5   :  { %2282 = sst [smem:[#allocation34_spill]] %s2265_s6 }
   0x6   :  { %2283 = sst [smem:[#allocation35_spill]] %s2269_s10 }
   0x7   :  { %15 = vsyncpa [#allocation4], 0 }
   0x8   :  { %17 = vsyncpa [#allocation4 + $0x1], 0 }
   0x9   :  { %18 = vsyncpa [#allocation7], 0 }
   0xa   :  { %20 = vsyncpa [#allocation7 + $0x1], 0 }
   0xb   :  { %21 = vsyncpa [#allocation10], 0 }
   0xc   :  { %22 = vsyncpa [#allocation13], 0 }
   0xd   :  { %23 = vsyncpa [#allocation16], 0 }
   0xe   :  { %24 = vsyncpa [#allocation19], 0 }
   0xf   :  { %25 = vsyncpa [#allocation5], 0 }
  0x10   :  { %27 = vsyncpa [#allocation5 + $0x1], 0  ;;  %s1804_s13 = smov 0   ;;  %s1806_s14 = smov 0  }
  0x11   :  { %s1808_s15 = smov 0   ;;  %s1810_s16 = smov 0  }
  0x12 LB: > { %s1732_s17 = smov [#allocation8]   ;;  %s1825_s19 = sadd.s32 4294967295, %s1730_s16   ;;  %s1730_s16 = sphi %s1810_s16, %s2320_s16   ;;  %s1726_s15 = sphi %s1808_s15, %s2319_s15   ;;  %s1722_s14 = sphi %s1806_s14, %s2318_s14   ;;  %s1718_s13 = sphi %s1804_s13, %s2317_s13  }
  0x13   : > { %s296_s18 = sshll.u32 %s1732_s17, 4  ;;  %p1086_p0 = scmp.ge.s32.totalorder %s1730_s16, 1  ;;  %s1830_s18 = int_to_ptr.vmem [resolvable:$true] %s296_s18 }
  0x14   : > { %p2274_p1 = scmp.eq.s32.totalorder %s1825_s19, 0  ;;  %p284_p2 = scmp.lt.s32.totalorder %s1730_s16, 3 }
  0x15   : > { %s1733_s21 = smov [#allocation9]   ;;  %s1734_s24 = smov [#allocation12]  }
  0x16   : > { %p1832_p3 = pnand %p1086_p0, %p284_p2  ;;  %s310_s22 = sshll.u32 %s1733_s21, 4  ;;  %s1845_s22 = int_to_ptr.vmem [resolvable:$true] %s310_s22 }
  0x17   : > { %s334_s25 = sshll.u32 %s1734_s24, 4  ;;  %s2287_s2 = sld [smem:[#allocation30_spill]]  ;;  %s1847_s25 = int_to_ptr.vmem [resolvable:$true] %s334_s25 }
  0x18   : > { %s2284_s20 = scalar_select %p1832_p3, 1, 0 }
  0x19   : > { %p1234_p5 = pneg %p1832_p3 }
  0x1a   : > { %2285 = sst [smem:[#allocation29_spill]] %s2284_s20 }
  0x1b   : > { %p1841_p6 = pnand %p1234_p5, %p2274_p1 }
  0x1d   : > { %s1356_s28 = scalar_lea.hbm %s2287_s2, 512  ;;  %p1857_p8 = pneg %p1841_p6 }
  0x1e   : > { %p1357_p7 = scmp.ne.s32.totalorder %s2287_s2, %s1356_s28  ;;  %p1363_p11 = scmp.lt.u32.totalorder %s1356_s28, %s2287_s2 }
  0x20   : > { %p1359_p9 = pnand %p1857_p8, %p1357_p7 }
  0x22   : > { %p1360_p10 = pneg %p1359_p9 }
  0x24   : > { %p1365_p12 = pnand %p1363_p11, %p1360_p10 }
  0x26   : > { %1368 = shalt.err (!%p1365_p12)
}
  0x27   : > { %s1369_s21 = scalar_lea.vmem %s1830_s18, 512  ;;  %p1377_p5 = scmp.lt.s32.totalorder %s1830_s18, %s1830_s18 }
  0x28   : > { %p1370_p13 = scmp.ne.s32.totalorder %s1830_s18, %s1369_s21  ;;  %p1378_p4 = scmp.lt.s32.totalorder %s1369_s21, %s1369_s21 }
  0x2a   : > { %p1372_p0 = pnand %p1370_p13, %p1857_p8  ;;  %p1379_p7 = por %p1378_p4, %p1377_p5 }
  0x2c   : > { %p1373_p2 = pneg %p1372_p0 }
  0x2e   : > { %p1380_p9 = pnand %p1379_p7, %p1373_p2 }
  0x30   : > { %1383 = shalt.err (!%p1380_p9)
}
  0x31   : > { %s2272_s24 = smov 64   ;;  %s1736_s26 = smov 4  }
  0x32   : > { %1237 = dma.hbm_to_vmem [thread:$0]  (!%p1841_p6), %s2287_s2, 512, %s1830_s18, [#allocation7], %s2272_s24, %s2272_s24, %s1736_s26  }
  0x33   : > { %s2289_s3 = sld [smem:[#allocation31_spill]] }
  0x39   : > { %s1384_s12 = scalar_lea.hbm %s2289_s3, 16 }
  0x3a   : > { %p1385_p4 = scmp.ne.s32.totalorder %s2289_s3, %s1384_s12  ;;  %p1391_p12 = scmp.lt.u32.totalorder %s1384_s12, %s2289_s3 }
  0x3c   : > { %p1387_p10 = pnand %p1385_p4, %p1857_p8 }
  0x3e   : > { %p1388_p11 = pneg %p1387_p10 }
  0x40   : > { %p1393_p13 = pnand %p1391_p12, %p1388_p11 }
  0x42   : > { %1396 = shalt.err (!%p1393_p13)
}
  0x43   : > { %s1397_s18 = scalar_lea.vmem %s1845_s22, 16  ;;  %s1404_s27 = scalar_lea.vmem %s1845_s22, 32 }
  0x44   : > { %p1398_p0 = scmp.ne.s32.totalorder %s1845_s22, %s1397_s18  ;;  %p1405_p7 = scmp.lt.s32.totalorder %s1845_s22, %s1845_s22 }
  0x45   : > { %p1406_p9 = scmp.lt.s32.totalorder %s1404_s27, %s1397_s18 }
  0x46   : > { %p1400_p2 = pnand %p1398_p0, %p1857_p8 }
  0x47   : > { %p1407_p4 = por %p1406_p9, %p1405_p7 }
  0x48   : > { %p1401_p5 = pneg %p1400_p2 }
  0x4a   : > { %p1408_p10 = pnand %p1407_p4, %p1401_p5 }
  0x4c   : > { %1411 = shalt.err (!%p1408_p10)
}
  0x4d   : > { %1240 = dma.hbm_to_vmem [thread:$0]  (!%p1841_p6), %s2289_s3, 16, %s1845_s22, [#allocation10]  }
  0x4e   : > { %s2290_s5 = sld [smem:[#allocation33_spill]] }
  0x54   : > { %s1412_s30 = scalar_lea.hbm %s2290_s5, 16 }
  0x55   : > { %p1413_p11 = scmp.ne.s32.totalorder %s2290_s5, %s1412_s30  ;;  %p1419_p0 = scmp.lt.u32.totalorder %s1412_s30, %s2290_s5 }
  0x57   : > { %p1415_p12 = pnand %p1413_p11, %p1857_p8 }
  0x59   : > { %p1416_p13 = pneg %p1415_p12 }
  0x5b   : > { %p1421_p2 = pnand %p1419_p0, %p1416_p13 }
  0x5d   : > { %1424 = shalt.err (!%p1421_p2)
}
  0x5e   : > { %s1425_s22 = scalar_lea.vmem %s1847_s25, 16  ;;  %s1432_s27 = scalar_lea.vmem %s1847_s25, 32 }
  0x5f   : > { %p1426_p5 = scmp.ne.s32.totalorder %s1847_s25, %s1425_s22  ;;  %p1433_p4 = scmp.lt.s32.totalorder %s1847_s25, %s1847_s25 }
  0x60   : > { %p1434_p10 = scmp.lt.s32.totalorder %s1432_s27, %s1425_s22 }
  0x61   : > { %p1428_p7 = pnand %p1426_p5, %p1857_p8 }
  0x62   : > { %p1435_p11 = por %p1434_p10, %p1433_p4 }
  0x63   : > { %p1429_p9 = pneg %p1428_p7 }
  0x65   : > { %p1436_p12 = pnand %p1435_p11, %p1429_p9 }
  0x67   : > { %1439 = shalt.err (!%p1436_p12)
}
  0x68   : > { %1246 = dma.hbm_to_vmem [thread:$0]  (!%p1841_p6), %s2290_s5, 16, %s1847_s25, [#allocation13]  }
  0x69   : > { %s1737_s28 = smov [#allocation15]   ;;  %s1738_s30 = smov [#allocation11]  }
  0x6a   : > { %s356_s29 = sshll.u32 %s1737_s28, 4  ;;  %s320_s12 = sshll.u32 %s1738_s30, 4  ;;  %s357_s29 = int_to_ptr.vmem [resolvable:$true] %s356_s29  ;;  %s321_s12 = int_to_ptr.vmem [resolvable:$true] %s320_s12 }
  0x6b   : > { %s1440_s18 = scalar_lea.hbm %s2266_s7, 16 }
  0x6c   : > { %p1441_p13 = scmp.ne.s32.totalorder %s2266_s7, %s1440_s18  ;;  %p1447_p5 = scmp.lt.u32.totalorder %s1440_s18, %s2266_s7 }
  0x6e   : > { %p1443_p0 = pnand %p1441_p13, %p1857_p8 }
  0x70   : > { %p1444_p2 = pneg %p1443_p0 }
  0x72   : > { %p1449_p7 = pnand %p1447_p5, %p1444_p2 }
  0x74   : > { %1452 = shalt.err (!%p1449_p7)
}
  0x75   : > { %s1453_s25 = scalar_lea.vmem %s357_s29, 16  ;;  %s1460_s20 = scalar_lea.vmem %s357_s29, 32 }
  0x76   : > { %p1454_p9 = scmp.ne.s32.totalorder %s357_s29, %s1453_s25  ;;  %p1461_p11 = scmp.lt.s32.totalorder %s357_s29, %s357_s29 }
  0x77   : > { %p1462_p12 = scmp.lt.s32.totalorder %s1460_s20, %s1453_s25 }
  0x78   : > { %p1456_p4 = pnand %p1454_p9, %p1857_p8 }
  0x79   : > { %p1463_p1 = por %p1462_p12, %p1461_p11 }
  0x7a   : > { %p1457_p10 = pneg %p1456_p4 }
  0x7c   : > { %p1464_p3 = pnand %p1463_p1, %p1457_p10 }
  0x7e   : > { %1467 = shalt.err (!%p1464_p3)
}
  0x7f   : > { %1252 = dma.hbm_to_vmem [thread:$0]  (!%p1841_p6), %s2266_s7, 16, %s357_s29, [#allocation16]  }
  0x80   : > { %s2291_s4 = sld [smem:[#allocation32_spill]] }
  0x86   : > { %s1468_s21 = scalar_lea.hbm %s2291_s4, 256 }
  0x87   : > { %p1469_p13 = scmp.ne.s32.totalorder %s2291_s4, %s1468_s21  ;;  %p1475_p3 = scmp.lt.u32.totalorder %s1468_s21, %s2291_s4 }
  0x89   : > { %p1471_p0 = pnand %p1469_p13, %p1857_p8 }
  0x8b   : > { %p1472_p1 = pneg %p1471_p0 }
  0x8d   : > { %p1477_p2 = pnand %p1475_p3, %p1472_p1 }
  0x8f   : > { %1480 = shalt.err (!%p1477_p2)
}
  0x90   : > { %s1481_s25 = scalar_lea.vmem %s321_s12, 256  ;;  %p1489_p4 = scmp.lt.s32.totalorder %s321_s12, %s321_s12 }
  0x91   : > { %p1482_p5 = scmp.ne.s32.totalorder %s321_s12, %s1481_s25  ;;  %p1490_p10 = scmp.lt.s32.totalorder %s1481_s25, %s1481_s25 }
  0x93   : > { %p1484_p7 = pnand %p1482_p5, %p1857_p8  ;;  %p1491_p11 = por %p1490_p10, %p1489_p4 }
  0x95   : > { %p1485_p9 = pneg %p1484_p7 }
  0x97   : > { %p1492_p12 = pnand %p1491_p11, %p1485_p9 }
  0x99   : > { %1495 = shalt.err (!%p1492_p12)
}
  0x9a   : > { %s2292_s29 = smov 64   ;;  %s1739_s30 = smov [#allocation14]  }
  0x9b   : > { %1243 = dma.hbm_to_vmem [thread:$0]  (!%p1841_p6), %s2291_s4, 256, %s321_s12, [#allocation10], %s2292_s29, %s2292_s29, %s1736_s26  }
  0x9c   : > { %s345_s24 = sshll.u32 %s1739_s30, 4  ;;  %s1740_s17 = smov [#allocation17]   ;;  %s346_s24 = int_to_ptr.vmem [resolvable:$true] %s345_s24 }
  0x9d   : > { %s366_s21 = sshll.u32 %s1740_s17, 4  ;;  %s2293_s6 = sld [smem:[#allocation34_spill]]  ;;  %s367_s21 = int_to_ptr.vmem [resolvable:$true] %s366_s21 }
  0xa3   : > { %s1496_s27 = scalar_lea.hbm %s2293_s6, 16 }
  0xa4   : > { %p1497_p13 = scmp.ne.s32.totalorder %s2293_s6, %s1496_s27  ;;  %p1503_p3 = scmp.lt.u32.totalorder %s1496_s27, %s2293_s6 }
  0xa6   : > { %p1499_p0 = pnand %p1497_p13, %p1857_p8 }
  0xa8   : > { %p1500_p1 = pneg %p1499_p0 }
  0xaa   : > { %p1505_p2 = pnand %p1503_p3, %p1500_p1 }
  0xac   : > { %1508 = shalt.err (!%p1505_p2)
}
  0xad   : > { %s1509_s12 = scalar_lea.vmem %s346_s24, 16  ;;  %s1516_s28 = scalar_lea.vmem %s346_s24, 32 }
  0xae   : > { %p1510_p5 = scmp.ne.s32.totalorder %s346_s24, %s1509_s12  ;;  %p1517_p4 = scmp.lt.s32.totalorder %s346_s24, %s346_s24 }
  0xaf   : > { %p1518_p10 = scmp.lt.s32.totalorder %s1516_s28, %s1509_s12 }
  0xb0   : > { %p1512_p7 = pnand %p1510_p5, %p1857_p8 }
  0xb1   : > { %p1519_p11 = por %p1518_p10, %p1517_p4 }
  0xb2   : > { %p1513_p9 = pneg %p1512_p7 }
  0xb4   : > { %p1520_p12 = pnand %p1519_p11, %p1513_p9 }
  0xb6   : > { %1523 = shalt.err (!%p1520_p12)
}
  0xb7   : > { %1249 = dma.hbm_to_vmem [thread:$0]  (!%p1841_p6), %s2293_s6, 16, %s346_s24, [#allocation13]  }
  0xb8   : > { %s1524_s22 = scalar_lea.hbm %s2267_s8, 1024 }
  0xb9   : > { %p1525_p13 = scmp.ne.s32.totalorder %s2267_s8, %s1524_s22  ;;  %p1531_p3 = scmp.lt.u32.totalorder %s1524_s22, %s2267_s8 }
  0xbb   : > { %p1527_p0 = pnand %p1525_p13, %p1857_p8 }
  0xbd   : > { %p1528_p1 = pneg %p1527_p0 }
  0xbf   : > { %p1533_p2 = pnand %p1531_p3, %p1528_p1 }
  0xc1   : > { %1536 = shalt.err (!%p1533_p2)
}
  0xc2   : > { %s1537_s12 = scalar_lea.vmem %s367_s21, 1024  ;;  %p1545_p4 = scmp.lt.s32.totalorder %s367_s21, %s367_s21 }
  0xc3   : > { %p1538_p5 = scmp.ne.s32.totalorder %s367_s21, %s1537_s12  ;;  %p1546_p10 = scmp.lt.s32.totalorder %s1537_s12, %s1537_s12 }
  0xc5   : > { %p1540_p7 = pnand %p1538_p5, %p1857_p8  ;;  %p1547_p11 = por %p1546_p10, %p1545_p4 }
  0xc7   : > { %p1541_p9 = pneg %p1540_p7 }
  0xc9   : > { %p1548_p12 = pnand %p1547_p11, %p1541_p9 }
  0xcb   : > { %1551 = shalt.err (!%p1548_p12)
}
  0xcc   : > { %1255 = dma.hbm_to_vmem [thread:$0]  (!%p1841_p6), %s2267_s8, 1024, %s367_s21, [#allocation16], %s2292_s29, %s2292_s29, %s1736_s26  }
  0xcd   : > { %s1741_s30 = smov [#allocation18]   ;;  %s1552_s22 = scalar_lea.hbm %s2268_s9, 16 }
  0xce   : > { %s380_s17 = sshll.u32 %s1741_s30, 4  ;;  %p1553_p13 = scmp.ne.s32.totalorder %s2268_s9, %s1552_s22  ;;  %s381_s17 = int_to_ptr.vmem [resolvable:$true] %s380_s17 }
  0xcf   : > { %p1559_p3 = scmp.lt.u32.totalorder %s1552_s22, %s2268_s9 }
  0xd0   : > { %p1555_p0 = pnand %p1553_p13, %p1857_p8 }
  0xd2   : > { %p1556_p1 = pneg %p1555_p0 }
  0xd4   : > { %p1561_p2 = pnand %p1559_p3, %p1556_p1 }
  0xd6   : > { %1564 = shalt.err (!%p1561_p2)
}
  0xd7   : > { %s1565_s26 = scalar_lea.vmem %s381_s17, 16  ;;  %s1572_s29 = scalar_lea.vmem %s381_s17, 32 }
  0xd8   : > { %p1566_p5 = scmp.ne.s32.totalorder %s381_s17, %s1565_s26  ;;  %p1573_p4 = scmp.lt.s32.totalorder %s381_s17, %s381_s17 }
  0xd9   : > { %p1574_p10 = scmp.lt.s32.totalorder %s1572_s29, %s1565_s26 }
  0xda   : > { %p1568_p7 = pnand %p1566_p5, %p1857_p8 }
  0xdb   : > { %p1575_p11 = por %p1574_p10, %p1573_p4 }
  0xdc   : > { %p1569_p9 = pneg %p1568_p7 }
  0xde   : > { %p1576_p12 = pnand %p1575_p11, %p1569_p9 }
  0xe0   : > { %1579 = shalt.err (!%p1576_p12)
}
  0xe1   : > { %1258 = dma.hbm_to_vmem [thread:$0]  (!%p1841_p6), %s2268_s9, 16, %s381_s17, [#allocation19]  }
  0xe2   : > { %s1085_s11 = sadd.s32 4294967294, %s1730_s16   ;;  %s2027_s23 = sadd.s32 1, %s1730_s16  }
  0xe3   : > { %s37_s24 = ssub.s32 %s1730_s16, %s2027_s23  ;;  %s40_s28 = sadd.s32 1, %s1726_s15 }
  0xe4   : > { %p38_p8 = scmp.eq.s32.totalorder %s37_s24, 0  ;;  %p47_p13 = scmp.ne.s32.totalorder %s1726_s15, %s1722_s14 }
  0xe5   : > { %p48_p0 = scmp.eq.s32.totalorder %s1730_s16, 0  ;;  %p53_p1 = scmp.ne.s32.totalorder %s1722_s14, %s1718_s13 }
  0xe6   : > { %s2038_s30 = scalar_select %p38_p8, %s1726_s15, %s40_s28  }
  0xe7   : > { %p2040_p3 = por %p48_p0, %p47_p13  ;;  %p2295_p2 = scmp.eq.s32.totalorder %s1825_s19, 0 }
  0xe8   : > { %p271_p5 = scmp.eq.s32.totalorder %s1825_s19, 1  ;;  %p277_p7 = scmp.eq.s32.totalorder %s1085_s11, 1 }
  0xe9   : > { %p2046_p6 = por %p2295_p2, %p53_p1  ;;  %p1278_p9 = scmp.lt.s32.totalorder %s1730_s16, 2 }
  0xea   : > { %s391_s18 = sand.u32 1, %s1726_s15   ;;  %p2053_p4 = por %p271_p5, %p47_p13 }
  0xeb   : > { %s2296_s17 = scalar_select %p2046_p6, 1, 0 }
  0xec   : > { %s2297_s22 = scalar_select %p2053_p4, 1, 0 }
  0xed   : > { %p2057_p10 = por %p277_p7, %p53_p1  ;;  %s2061_s10 = sshll.u32 %s391_s18, 3 }
  0xee   : > { %s1097_s25 = sshll.u32 %s1730_s16, 7  ;;  %s395_s21 = scalar_lea.vmem [#allocation3], %s2061_s10 }
  0xef   : > { %s2298_s27 = scalar_select %p2057_p10, 1, 0 }
  0xf0   : > { %s2067_s29 = scalar_lea.hbm %s2259_s0, %s1097_s25  ;;  %s402_s12 = sshll.u32 %s395_s21, 4  ;;  %s2070_s12 = int_to_ptr.vmem [resolvable:$true] %s402_s12 }
  0xf1   : > { %p2074_p11 = pnand %p1278_p9, %p2040_p3  ;;  %s2081_s20 = scalar_lea.hbm %s2260_s1, %s1097_s25 }
  0xf2   : > { %s409_s26 = sand.u32 1, %s1730_s16   ;;  %s392_s3 = scalar_lea.sflag [#allocation4], %s391_s18 }
  0xf3   : > { %s1580_s4 = scalar_lea.hbm %s2067_s29, 128  ;;  %p1582_p8 = pneg %p2074_p11 }
  0xf4   : > { %p1581_p12 = scmp.ne.s32.totalorder %s2067_s29, %s1580_s4  ;;  %s1585_s5 = scalar_lea.hbm %s2259_s0, 256 }
  0xf5   : > { %p1586_p1 = scmp.lt.u32.totalorder %s2067_s29, %s2259_s0  ;;  %p1587_p3 = scmp.lt.u32.totalorder %s1585_s5, %s1580_s4 }
  0xf6   : > { %p1583_p13 = pnand %p1582_p8, %p1581_p12  ;;  %p1589_p5 = scmp.lt.u32.totalorder %s1580_s4, %s2067_s29 }
  0xf7   : > { %p1588_p2 = por %p1587_p3, %p1586_p1 }
  0xf8   : > { %p1584_p0 = pneg %p1583_p13 }
  0xf9   : > { %p1590_p7 = por %p1589_p5, %p1588_p2 }
  0xfb   : > { %p1591_p9 = pnand %p1590_p7, %p1584_p0 }
  0xfd   : > { %1594 = shalt.err (!%p1591_p9)
}
  0xfe   : > { %s1595_s18 = scalar_lea.vmem %s2070_s12, 128  ;;  %s1742_s25 = smov [#allocation3]  }
  0xff   : > { %p1596_p12 = scmp.ne.s32.totalorder %s2070_s12, %s1595_s18  ;;  %s1600_s28 = sshll.u32 %s1742_s25, 4  ;;  %s1601_s28 = int_to_ptr.vmem [resolvable:$false] %s1600_s28 }
 0x100   : > { %s1602_s6 = scalar_lea.vmem %s1601_s28, 256  ;;  %p1603_p4 = scmp.lt.s32.totalorder %s2070_s12, %s1601_s28 }
 0x101   : > { %p1598_p13 = pnand %p1596_p12, %p1582_p8  ;;  %p1604_p1 = scmp.lt.s32.totalorder %s1602_s6, %s1595_s18 }
 0x103   : > { %p1599_p10 = pneg %p1598_p13  ;;  %p1605_p3 = por %p1604_p1, %p1603_p4 }
 0x105   : > { %p1606_p2 = pnand %p1605_p3, %p1599_p10 }
 0x107   : > { %1609 = shalt.err (!%p1606_p2)
}
 0x108   : > { %1262 = dma.hbm_to_vmem [thread:$0]  (!%p2074_p11), %s2067_s29, 128, %s2070_s12, %s392_s3  }
 0x109   : > { %s413_s4 = scalar_lea.vmem [#allocation6], %s2061_s10  ;;  %s410_s2 = scalar_lea.sflag [#allocation7], %s409_s26 }
 0x10a   : > { %s420_s5 = sshll.u32 %s413_s4, 4  ;;  %s1610_s21 = scalar_lea.hbm %s2081_s20, 128  ;;  %s421_s5 = int_to_ptr.vmem [resolvable:$true] %s420_s5 }
 0x10b   : > { %p1611_p4 = scmp.ne.s32.totalorder %s2081_s20, %s1610_s21  ;;  %s1615_s25 = scalar_lea.hbm %s2260_s1, 256 }
 0x10c   : > { %p1616_p5 = scmp.lt.u32.totalorder %s2081_s20, %s2260_s1  ;;  %p1617_p7 = scmp.lt.u32.totalorder %s1615_s25, %s1610_s21 }
 0x10d   : > { %p1613_p10 = pnand %p1611_p4, %p1582_p8  ;;  %p1619_p12 = scmp.lt.u32.totalorder %s1610_s21, %s2081_s20 }
 0x10e   : > { %p1618_p9 = por %p1617_p7, %p1616_p5 }
 0x10f   : > { %p1614_p0 = pneg %p1613_p10 }
 0x110   : > { %p1620_p13 = por %p1619_p12, %p1618_p9 }
 0x112   : > { %p1621_p1 = pnand %p1620_p13, %p1614_p0 }
 0x114   : > { %1624 = shalt.err (!%p1621_p1)
}
 0x115   : > { %s1625_s3 = scalar_lea.vmem %s421_s5, 128  ;;  %s1743_s10 = smov [#allocation6]  }
 0x116   : > { %p1626_p3 = scmp.ne.s32.totalorder %s421_s5, %s1625_s3  ;;  %s1630_s29 = sshll.u32 %s1743_s10, 4  ;;  %s1631_s29 = int_to_ptr.vmem [resolvable:$false] %s1630_s29 }
 0x117   : > { %s1632_s12 = scalar_lea.vmem %s1631_s29, 256  ;;  %p1633_p10 = scmp.lt.s32.totalorder %s421_s5, %s1631_s29 }
 0x118   : > { %p1628_p2 = pnand %p1626_p3, %p1582_p8  ;;  %p1634_p6 = scmp.lt.s32.totalorder %s1632_s12, %s1625_s3 }
 0x11a   : > { %p1629_p4 = pneg %p1628_p2  ;;  %p1635_p5 = por %p1634_p6, %p1633_p10 }
 0x11c   : > { %p1636_p7 = pnand %p1635_p5, %p1629_p4 }
 0x11e   : > { %1639 = shalt.err (!%p1636_p7)
}
 0x11f   : > { %1265 = dma.hbm_to_vmem [thread:$0]  (!%p2074_p11), %s2081_s20, 128, %s421_s5, %s410_s2  }
 0x120   : > { %s2300_s26 = sld [smem:[#allocation29_spill]] }
 0x126   : > { %p2301_p0 = scmp.ne.s32.totalorder %s2300_s26, 0 }
 0x127   : > { %s2134_s4 = sand.u32 (!%p2301_p0), 1, %s1722_s14   ;;  %p2302_p8 = scmp.ne.s32.totalorder (!%p2301_p0), %s2296_s17, 0 }
 0x128   : > { %429 = sbr.rel (%p2301_p0) target bundleno = 1218 (0x4c2), region = 60  ;;  %s1101_s21 = sshll.u32 (!%p2301_p0), %s2134_s4, 3 }
 0x129   : > { %s432_s24 = scalar_lea.sflag (!%p2301_p0), [#allocation4], %s2134_s4  ;;  %s435_s18 = scalar_lea.vmem (!%p2301_p0), [#allocation3], %s1101_s21 }
 0x12f   : > { %1685 = dma.done.wait (%p2302_p8), %s432_s24, 128  }
 0x130   : > { %1687 = vsyncadd (%p2302_p8), %s432_s24, 4294967168  ;;  %s440_s11 = sand.u32 1, %s1825_s19   ;;  %s444_s5 = scalar_lea.vmem [#allocation6], %s1101_s21 }
 0x131   : > { %s441_s20 = scalar_lea.sflag [#allocation7], %s440_s11 }
 0x132   : > { %1689 = dma.done.wait (%p2302_p8), %s441_s20, 128  }
 0x133   : > { %1691 = vsyncadd (%p2302_p8), %s441_s20, 4294967168  ;;  %p2303_p6 = scmp.eq.s32.totalorder %s1825_s19, 0 }
 0x135   : > { %1693 = dma.done.wait (%p2303_p6), [#allocation7], 512   ;;  %p2304_p11 = pmov %p2303_p6 }
 0x136   : > { %p2305_p9 = pmov %p2303_p6 }
 0x137   : > { %1695 = vsyncadd (%p2304_p11), [#allocation7], 4294966784 }
 0x138   : > { %1697 = dma.done.wait (%p2305_p9), [#allocation10], 272   ;;  %p2306_p12 = pmov %p2303_p6 }
 0x139   : > { %p2307_p13 = pmov %p2303_p6 }
 0x13a   : > { %1699 = vsyncadd (%p2306_p12), [#allocation10], 4294967024 }
 0x13b   : > { %1701 = dma.done.wait (%p2307_p13), [#allocation13], 32   ;;  %p2308_p1 = pmov %p2303_p6 }
 0x13d   : > { %1703 = vsyncadd (%p2308_p1), [#allocation13], 4294967264  ;;  %p2309_p3 = pmov %p2308_p1 }
 0x13e   : > { %p2310_p2 = pmov %p2308_p1 }
 0x13f   : > { %1705 = dma.done.wait (%p2309_p3), [#allocation16], 1040  }
 0x140   : > { %1707 = vsyncadd (%p2310_p2), [#allocation16], 4294966256  ;;  %p2311_p4 = pmov %p2308_p1 }
 0x141   : > { %p2312_p10 = pmov %p2308_p1 }
 0x142   : > { %1709 = dma.done.wait (%p2311_p4), [#allocation19], 16  }
 0x143   : > { %1711 = vsyncadd (%p2312_p10), [#allocation19], 4294967280  ;;  %v1744_v0 = vmov 0.0   ;;  %vm1745_vm0 = vmmov 0   ;;  %vm519_vm1 = vcmask 258048   ;;  %s1746_s17 = smov 32   ;;  %v734_v12 = vlaneseq }
 0x144   : > { %1152 = vmatprep.subr.bf16.mxu0 %v1744_v0  ;;  %1164 = vmatprep.subr.bf16.mxu1 %v1744_v0  ;;  %v521_v1 = vld [vmem:[%s444_s5] sm:$0x1f]  ;;  %v1334_v2 = vld [vmem:[#allocation8] sm:$0xff]   ;;  %v1335_v4 = vld [vmem:[#allocation8 + $0x8] sm:$0xff]   ;;  %vm526_vm2 = vcmask 520448   ;;  %vm569_vm3 = vcmask 523264  }
 0x145   : > { %1160 = vmatprep.mubr.msk.bf16.mxu0 %vm1745_vm0, %v1744_v0  ;;  %1168 = vmatprep.mubr.msk.bf16.mxu1 %vm1745_vm0, %v1744_v0  ;;  %v518_v3 = vld [vmem:[%s435_s18] sm:$0x1f]  ;;  %v1336_v5 = vld [vmem:[#allocation8 + $0x10] sm:$0xff]   ;;  %v1337_v6 = vld [vmem:[#allocation8 + $0x18] sm:$0xff]   ;;  %v735_v13 = vshrl.u32 %v734_v12, 7  ;;  %s1747_s2 = smov 64  }
 0x146   : > { %523 = vrot.lane.b32.xlu0 %v521_v1, %s1746_s17  ;;  %1153 = vmatpush3.bf16.msra.mxu0 %v1334_v2  ;;  %520 = vst.msk [vmem:[#allocation2] sm:$0x1f] %vm519_vm1, %v518_v3  ;;  %v1338_v10 = vld [vmem:[#allocation11] sm:$0xff]   ;;  %v1339_v11 = vld [vmem:[#allocation11 + $0x8] sm:$0xff]   ;;  %v2186_v14 = vld [vmem:[#allocation14] sm:$0x1] }
 0x147   : > { %1154 = vmatprep.subr.bf16.mxu0 %v1744_v0  ;;  %1165 = vmatpush3.bf16.msra.mxu1 %v1338_v10  ;;  %v2188_v15 = vld [vmem:[#allocation15] sm:$0x1]  ;;  %v736_v16 = vsub.s32 0, %v735_v13  ;;  %v1111_v19 = vld [vmem:[#allocation9] ss:$0 sm:$0xff]  ;;  %vm638_vm4 = vcmask 261120  }
 0x148   : > { %1166 = vmatprep.subr.bf16.mxu1 %v1744_v0  ;;  %v1340_v27 = vld [vmem:[#allocation17] sm:$0xff]   ;;  %v1341_v28 = vld [vmem:[#allocation17 + $0x8] sm:$0xff]   ;;  %v1342_v29 = vld [vmem:[#allocation17 + $0x10] sm:$0xff]   ;;  %vm682_vm5 = vcmask 520192   ;;  %s1131_s25 = sshll.u32 %s1825_s19, 4  ;;  %s516_s28 = scalar_lea.vmem [#allocation20], %s2134_s4 }
 0x149   : > { %v737_v17 = vrot.slane %v2186_v14, %v736_v16  ;;  %v746_v18 = vrot.slane %v2188_v15, %v736_v16  ;;  %v1343_v30 = vld [vmem:[#allocation17 + $0x18] sm:$0xff]   ;;  %v1344_v31 = vld [vmem:[#allocation17 + $0x20] sm:$0xff]   ;;  %v1345_v32 = vld [vmem:[#allocation17 + $0x28] sm:$0xff]   ;;  %s920_s6 = sshll.u32 %s516_s28, 4  ;;  %vm905_vm8 = vcmask 122880   ;;  %s2313_s29 = sld [smem:[#allocation35_spill]]  ;;  %s2217_s6 = int_to_ptr.vmem [resolvable:$true] %s920_s6 }
 0x14a   : > { %1155 = vmatpush3.bf16.msra.mxu0 %v1335_v4  ;;  %v1346_v33 = vld [vmem:[#allocation17 + $0x30] sm:$0xff]   ;;  %v1347_v34 = vld [vmem:[#allocation17 + $0x38] sm:$0xff]   ;;  %s908_s19 = scalar_lea.sflag [#allocation5], %s2134_s4  ;;  %s1640_s26 = scalar_lea.vmem %s2217_s6, 16 }
 0x14b   : > { %1156 = vmatprep.subr.bf16.mxu0 %v1744_v0  ;;  %1167 = vmatpush3.bf16.msra.mxu1 %v1339_v11  ;;  %v1117_v35 = vld [vmem:[#allocation12] ss:$0 sm:$0xff]  ;;  %p1641_p5 = scmp.ne.s32.totalorder %s2217_s6, %s1640_s26  ;;  %p2314_p7 = scmp.ne.s32.totalorder %s2297_s22, 0 }
 0x14c   : > { %1172 = vmatprep.subr.bf16.mxu1 %v1744_v0  ;;  %738 = vrot.lane.b32.xlu0 %v737_v17, %s1747_s2  ;;  %s1748_s21 = smov [#allocation20]  }
 0x14d   : > { %747 = vrot.lane.b32.xlu1 %v746_v18, %s1747_s2  ;;  %p1642_p0 = pnand %p1641_p5, %p2314_p7  ;;  %s1644_s24 = sshll.u32 %s1748_s21, 4  ;;  %s1645_s24 = int_to_ptr.vmem [resolvable:$false] %s1644_s24 }
 0x14e   : > { %1157 = vmatpush3.bf16.msra.mxu0 %v1336_v5  ;;  %s1646_s18 = scalar_lea.vmem %s1645_s24, 32  ;;  %p1647_p6 = scmp.lt.s32.totalorder %s2217_s6, %s1645_s24 }
 0x14f   : > { %1158 = vmatprep.subr.bf16.mxu0 %v1744_v0  ;;  %s2215_s12 = scalar_lea.hbm %s2313_s29, %s1131_s25  ;;  %p1643_p8 = pneg %p1642_p0 }
 0x150   : > { %p1648_p11 = scmp.lt.s32.totalorder %s1646_s18, %s1640_s26 }
 0x152   : > { %1159 = vmatpush3.bf16.msra.mxu0 %v1337_v6  ;;  %p1649_p9 = por %p1648_p11, %p1647_p6 }
 0x153   : > { %1184 = vmatprep.subr.bf16.mxu0 %v1744_v0 }
 0x154   : > { %p1650_p12 = pnand %p1649_p9, %p1643_p8 }
 0x1b8   : > { %v524_v7 = vpop.permute.xlu0 %523 }
 0x1b9   : > { %527 = vst.msk [vmem:[#allocation2] sm:$0x1f] %vm526_vm2, %v524_v7 }
 0x1c0   : > { %v2177_v8 = vld [vmem:[#allocation2] sm:$0x1f] }
 0x1c1   : > { %v529_v9 = vpack.c.bf16 %v2177_v8, %v2177_v8 }
 0x1c3   : > { %1161 = vmatmul.mubr.msk.bf16.vlgmr.msra.gmra.mrb[0].mxu0 %vm569_vm3, %v529_v9 }
 0x1c4   : > { %1192 = vmatprep.mubr.msk.bf16.mxu0 %vm1745_vm0, %v1744_v0  ;;  %1185 = vmatpush3.bf16.msra.mxu0 %v1340_v27 }
 0x1c5   : > { %1186 = vmatprep.subr.bf16.mxu0 %v1744_v0 }
 0x1c8   : > { %1187 = vmatpush3.bf16.msra.mxu0 %v1341_v28 }
 0x1c9   : > { %1188 = vmatprep.subr.bf16.mxu0 %v1744_v0 }
 0x1cc   : > { %1189 = vmatpush3.bf16.msra.mxu0 %v1342_v29 }
 0x1cd   : > { %1190 = vmatprep.subr.bf16.mxu0 %v1744_v0 }
 0x1d0   : > { %1191 = vmatpush3.bf16.msra.mxu0 %v1343_v30 }
 0x296   : > { %v607_v20 = vpop.f32.mrb[0].mxu0 }
 0x297   : > { %v608_v21 = vadd.f32 %v1111_v19, %v607_v20  ;;  %v1162_v22 = vpop.f32.mrb[1].mxu0 }
 0x298   : > { %v610_v23 = vpop.f32.mrb[2].mxu0  ;;  %v739_v22 = vpop.permute.xlu0 %738 }
 0x299   : > { %1348 = vtanh.f32 %v608_v21  ;;  %v1163_v24 = vpop.f32.mrb[3].mxu0 }
 0x2a3   : > { %v1349_v25 = vpop.eup %1348 }
 0x2a4   : > { %v614_v26 = vpack.c.bf16 %v1349_v25, %v1349_v25 }
 0x2a6   : > { %1169 = vmatmul.mubr.msk.bf16.vlgmr.msra.gmra.mrb[0].mxu1 %vm638_vm4, %v614_v26  ;;  %v748_v26 = vpop.permute.xlu1 %747 }
 0x2a7   : > { %1180 = vmatprep.mubr.msk.bf16.mxu1 %vm1745_vm0, %v1744_v0  ;;  %1173 = vmatpush3.bf16.msra.mxu1 %v1344_v31 }
 0x2a8   : > { %1174 = vmatprep.subr.bf16.mxu1 %v1744_v0 }
 0x2ab   : > { %1175 = vmatpush3.bf16.msra.mxu1 %v1345_v32 }
 0x2ac   : > { %1176 = vmatprep.subr.bf16.mxu1 %v1744_v0 }
 0x2af   : > { %1177 = vmatpush3.bf16.msra.mxu1 %v1346_v33  ;;  %v903_v33 = vld [vmem:[#allocation18] sm:$0x1] }
 0x2b0   : > { %1178 = vmatprep.subr.bf16.mxu1 %v1744_v0 }
 0x2b3   : > { %1179 = vmatpush3.bf16.msra.mxu1 %v1347_v34 }
 0x379   : > { %v676_v36 = vpop.f32.mrb[0].mxu1 }
 0x37a   : > { %v677_v37 = vadd.f32 %v1117_v35, %v676_v36  ;;  %v1170_v38 = vpop.f32.mrb[1].mxu1 }
 0x37b   : > { %v679_v39 = vpop.f32.mrb[2].mxu1 }
 0x37c   : > { %v683_v40 = vsel %vm682_vm5, %v677_v37, -inf  ;;  %v1171_v41 = vpop.f32.mrb[3].mxu1 }
 0x37d   : > { %v684_v42 = vrot.slane %v683_v40, 4 }
 0x37f   : > { %v685_v43 = vmax.f32 %v683_v40, %v684_v42 }
 0x381   : > { %v686_v44 = vrot.slane %v685_v43, 2 }
 0x383   : > { %v687_v45 = vmax.f32 %v685_v43, %v686_v44 }
 0x385   : > { %v688_v46 = vrot.slane %v687_v45, 1 }
 0x387   : > { %v689_v47 = vmax.f32 %v687_v45, %v688_v46 }
 0x389   : > { %v690_v48 = vsub.f32 %v677_v37, %v689_v47 }
 0x38b   : > { %v691_v49 = vmul.f32 1.442695, %v690_v48 }
 0x38d   : > { %1350 = vpow2.f32 %v691_v49 }
 0x397   : > { %v1351_v50 = vpop.eup %1350 }
 0x398   : > { %v693_v51 = vsel %vm682_vm5, %v1351_v50, 0.0 }
 0x399   : > { %v694_v52 = vrot.slane %v693_v51, 4 }
 0x39b   : > { %v695_v53 = vadd.f32 %v694_v52, %v693_v51 }
 0x39d   : > { %v696_v54 = vrot.slane %v695_v53, 2 }
 0x39f   : > { %v697_v55 = vadd.f32 %v696_v54, %v695_v53 }
 0x3a1   : > { %v698_v56 = vrot.slane %v697_v55, 1 }
 0x3a3   : > { %v699_v57 = vadd.f32 %v698_v56, %v697_v55 }
 0x3a5   : > { %1352 = vrcp.f32 %v699_v57 }
 0x3af   : > { %v1353_v58 = vpop.eup %1352 }
 0x3b0   : > { %v702_v59 = vmul.f32 %v1353_v58, %v1351_v50 }
 0x3b2   : > { %v703_v60 = vmul.f32 %v702_v59, %v2177_v8 }
 0x3b4   : > { %v704_v61 = vsel %vm682_vm5, %v703_v60, 0.0  ;;  %v711_v62 = vmul.f32 %v703_v60, %v2177_v8 }
 0x3b5   : > { %v705_v63 = vrot.slane %v704_v61, 4 }
 0x3b6   : > { %v712_v0 = vsel %vm682_vm5, %v711_v62, 0.0 }
 0x3b7   : > { %v706_v1 = vadd.f32 %v705_v63, %v704_v61  ;;  %v713_v2 = vrot.slane %v712_v0, 4 }
 0x3b9   : > { %v707_v3 = vrot.slane %v706_v1, 2  ;;  %v714_v4 = vadd.f32 %v713_v2, %v712_v0 }
 0x3bb   : > { %v708_v5 = vadd.f32 %v707_v3, %v706_v1  ;;  %v715_v6 = vrot.slane %v714_v4, 2 }
 0x3bd   : > { %v709_v7 = vrot.slane %v708_v5, 1  ;;  %v716_v9 = vadd.f32 %v715_v6, %v714_v4 }
 0x3bf   : > { %v710_v10 = vadd.f32 %v709_v7, %v708_v5  ;;  %v717_v11 = vrot.slane %v716_v9, 1 }
 0x3c1   : > { %v718_v12 = vadd.f32 %v717_v11, %v716_v9  ;;  %v719_v13 = vmul.f32 %v710_v10, %v710_v10  ;;  %v730_v16 = vmul.f32 %v2186_v14, %v710_v10 }
 0x3c3   : > { %v720_v17 = vsub.f32 %v718_v12, %v719_v13  ;;  %v732_v8 = vadd.f32 %v2188_v15, %v730_v16 }
 0x3c5   : > { %v721_v18 = vmax.f32 %v720_v17, 1e-07  ;;  %v751_v19 = vpack.c.bf16 %v732_v8, %v732_v8 }
 0x3c7   : > { %1193 = vmatmul.mubr.msk.bf16.vlgmr.msra.gmra.mrb[4].mxu0 %vm569_vm3, %v751_v19  ;;  %1354 = vrsqrt.f32 %v721_v18  ;;  %vm724_vm6 = vcmp.eq.f32.partialorder %v721_v18, inf  ;;  %v727_v23 = vand.u32 2147483648, %v721_v18  ;;  %vm726_vm7 = vcmp.eq.f32.partialorder %v721_v18, 0.0 }
 0x3d1   : > { %v1355_v20 = vpop.eup %1354 }
 0x3d2   : > { %v723_v21 = vmul.f32 %v1355_v20, %v721_v18 }
 0x3d4   : > { %v725_v24 = vsel %vm724_vm6, %v721_v18, %v723_v21 }
 0x3d5   : > { %v728_v25 = vsel %vm726_vm7, %v727_v23, %v725_v24 }
 0x3d6   : > { %v741_v14 = vmul.f32 %v739_v22, %v728_v25 }
 0x3d8   : > { %v750_v27 = vadd.f32 %v748_v26, %v741_v14 }
 0x3da   : > { %v760_v28 = vpack.c.bf16 %v750_v27, %v750_v27 }
 0x3dc   : > { %1181 = vmatmul.mubr.msk.bf16.vlgmr.msra.gmra.mrb[4].mxu1 %vm569_vm3, %v760_v28 }
 0x49a   : > { %v897_v15 = vpop.f32.mrb[4].mxu0 }
 0x49b   : > { %v1194_v29 = vpop.f32.mrb[5].mxu0 }
 0x49c   : > { %v900_v30 = vpop.f32.mrb[6].mxu0 }
 0x49d   : > { %v1195_v31 = vpop.f32.mrb[7].mxu0 }
 0x4af   : > { %v830_v32 = vpop.f32.mrb[4].mxu1 }
 0x4b0   : > { %v898_v34 = vadd.f32 %v897_v15, %v830_v32  ;;  %v1182_v35 = vpop.f32.mrb[5].mxu1 }
 0x4b1   : > { %v833_v36 = vpop.f32.mrb[6].mxu1 }
 0x4b2   : > { %v904_v37 = vadd.f32 %v903_v33, %v898_v34  ;;  %v1183_v38 = vpop.f32.mrb[7].mxu1 }
 0x4b4   : > { %906 = vst.msk [vmem:[%s516_s28] sm:$0x1] %vm905_vm8, %v904_v37 }
 0x4b5   : > { %1653 = shalt.err (!%p1650_p12)
}
 0x4b6   : > { %s1654_s4 = scalar_lea.hbm %s2215_s12, 16  ;;  %s1658_s5 = scalar_lea.hbm %s2313_s29, 32 }
 0x4b7   : > { %p1655_p13 = scmp.ne.s32.totalorder %s2215_s12, %s1654_s4  ;;  %p1659_p2 = scmp.lt.u32.totalorder %s2215_s12, %s2313_s29 }
 0x4b8   : > { %p1660_p4 = scmp.lt.u32.totalorder %s1658_s5, %s1654_s4  ;;  %p1662_p5 = scmp.lt.u32.totalorder %s1654_s4, %s2215_s12 }
 0x4b9   : > { %p1656_p1 = pnand %p1655_p13, %p2314_p7 }
 0x4ba   : > { %p1661_p10 = por %p1660_p4, %p1659_p2 }
 0x4bb   : > { %p1657_p3 = pneg %p1656_p1 }
 0x4bc   : > { %p1663_p0 = por %p1662_p5, %p1661_p10 }
 0x4be   : > { %p1664_p8 = pnand %p1663_p0, %p1657_p3 }
 0x4c0   : > { %1667 = shalt.err (!%p1664_p8)
}
 0x4c1   : > { %1232 = dma.vmem_to_hbm [thread:$0]  (%p2314_p7), %s2217_s6, 16, %s2215_s12, %s908_s19  }
 0x4c2 PF: > { %s932_s25 = sand.u32 1, %s1718_s13   ;;  %p2315_p6 = scmp.ne.s32.totalorder %s2298_s27, 0 }
 0x4c3   : > { %p2316_p11 = scmp.ge.s32.totalorder %s1730_s16, 2  ;;  %s933_s28 = scalar_lea.sflag [#allocation5], %s932_s25 }
 0x4c5   : > { %p1267_p9 = pnand %p2316_p11, %p2315_p6 }
 0x4c7   : > { %1713 = dma.done.wait (!%p1267_p9), %s933_s28, 16  }
 0x4c8   : > { %1715 = vsyncadd (!%p1267_p9), %s933_s28, 4294967280  ;;  %p30_p12 = scmp.ge.s32.totalorder %s2027_s23, 4   ;;  %s2317_s13 = smov %s1722_s14 }
 0x4c9   : > { %s2318_s14 = smov %s1726_s15  ;;  %s2319_s15 = smov %s2038_s30 }
 0x4ca   : > { %s2320_s16 = smov %s2027_s23  ;;  %32 = sbr.rel (!%p30_p12) target bundleno = 18 (0x12), region = 150 }
 0x4d1   :  { %937 = vsyncpa [#allocation4], 1 }
 0x4d2   :  { %939 = vsyncpa [#allocation4 + $0x1], 1 }
 0x4d3   :  { %940 = vsyncpa [#allocation7], 1 }
 0x4d4   :  { %942 = vsyncpa [#allocation7 + $0x1], 1 }
 0x4d5   :  { %943 = vsyncpa [#allocation10], 1 }
 0x4d6   :  { %944 = vsyncpa [#allocation13], 1 }
 0x4d7   :  { %945 = vsyncpa [#allocation16], 1 }
 0x4d8   :  { %946 = vsyncpa [#allocation19], 1 }
 0x4d9   :  { %947 = vsyncpa [#allocation5], 1 }
 0x4da   :  { %949 = vsyncpa [#allocation5 + $0x1], 1 }

// kernel: conformer_forward.9
= control target key start
LH: loop header
LB: loop body
LE: loop exit
PB: predicated region body
PF: predicated region fallthrough
CT: control target
= control target key end

     0   :  { %s4259_s0 = inlined_call_operand.hbm [shape: f32[2,5,32], index: 0, kind: input, shape index: {}]   ;;  %s4260_s1 = inlined_call_operand.hbm [shape: f32[5,32], index: 1, kind: input, shape index: {}]   ;;  %s4261_s2 = inlined_call_operand.hbm [shape: f32[23,96], index: 2, kind: input, shape index: {}]   ;;  %s4262_s3 = inlined_call_operand.hbm [shape: bf16[32,64], index: 3, kind: input, shape index: {}]   ;;  %s4263_s4 = inlined_call_operand.hbm [shape: bf16[64,32], index: 4, kind: input, shape index: {}]   ;;  %s4264_s5 = inlined_call_operand.hbm [shape: bf16[32,96], index: 5, kind: input, shape index: {}]   ;;  %s4265_s6 = inlined_call_operand.hbm [shape: bf16[32,32], index: 6, kind: input, shape index: {}]   ;;  %s4266_s7 = inlined_call_operand.hbm [shape: bf16[32,32], index: 7, kind: input, shape index: {}]   ;;  %s4267_s8 = inlined_call_operand.hbm [shape: bf16[32,32], index: 8, kind: input, shape index: {}]   ;;  %s4268_s9 = inlined_call_operand.hbm [shape: bf16[32,32], index: 9, kind: input, shape index: {}]   ;;  %s4269_s10 = inlined_call_operand.hbm [shape: bf16[32,32], index: 10, kind: input, shape index: {}]   ;;  %s4270_s11 = inlined_call_operand.hbm [shape: bf16[32,64], index: 11, kind: input, shape index: {}]   ;;  %s4271_s12 = inlined_call_operand.hbm [shape: bf16[64,32], index: 12, kind: input, shape index: {}]   ;;  %s4272_s13 = inlined_call_operand.hbm [shape: f32[15,32], index: 13, kind: input, shape index: {}]   ;;  %s4273_s14 = inlined_call_operand.hbm [shape: f32[2,5,32], index: 14, kind: output, shape index: {}]  }
   0x1   :  { %4288 = sst [smem:[#allocation42_spill]] %s4259_s0 }
   0x2   :  { %4289 = sst [smem:[#allocation43_spill]] %s4260_s1 }
   0x3   :  { %4290 = sst [smem:[#allocation44_spill]] %s4262_s3 }
   0x4   :  { %4291 = sst [smem:[#allocation45_spill]] %s4264_s5 }
   0x5   :  { %4292 = sst [smem:[#allocation46_spill]] %s4273_s14 }
   0x6   :  { %19 = vsyncpa [#allocation7], 0 }
   0x7   :  { %21 = vsyncpa [#allocation7 + $0x1], 0 }
   0x8   :  { %22 = vsyncpa [#allocation10], 0 }
   0x9   :  { %23 = vsyncpa [#allocation13], 0 }
   0xa   :  { %24 = vsyncpa [#allocation16], 0 }
   0xb   :  { %25 = vsyncpa [#allocation19], 0 }
   0xc   :  { %26 = vsyncpa [#allocation22], 0 }
   0xd   :  { %27 = vsyncpa [#allocation25], 0 }
   0xe   :  { %28 = vsyncpa [#allocation28], 0 }
   0xf   :  { %29 = vsyncpa [#allocation8], 0 }
  0x10   :  { %31 = vsyncpa [#allocation8 + $0x1], 0  ;;  %s3596_s29 = smov 0   ;;  %s3598_s30 = smov 0  }
  0x11   :  { %s3600_s15 = smov 0   ;;  %s3602_s16 = smov 0  }
  0x12 LB: > { %4293 = sst [smem:[#allocation39_spill]] %s3472_s29  ;;  %s3486_s17 = smov [#allocation9]   ;;  %s3484_s16 = sphi %s3602_s16, %s4338_s16   ;;  %s3480_s15 = sphi %s3600_s15, %s4337_s15   ;;  %s3476_s30 = sphi %s3598_s30, %s4336_s30   ;;  %s3472_s29 = sphi %s3596_s29, %s4335_s29  }
  0x13   : > { %s380_s18 = sshll.u32 %s3486_s17, 4  ;;  %s3617_s19 = sadd.s32 4294967295, %s3484_s16   ;;  %s381_s18 = int_to_ptr.vmem [resolvable:$true] %s380_s18 }
  0x14   : > { %4294 = sst [smem:[#allocation40_spill]] %s3617_s19  ;;  %p2430_p0 = scmp.ge.s32.totalorder %s3484_s16, 1 }
  0x15   : > { %p4276_p1 = scmp.eq.s32.totalorder %s3617_s19, 0  ;;  %p367_p2 = scmp.lt.s32.totalorder %s3484_s16, 3 }
  0x16   : > { %s3487_s21 = smov [#allocation12]   ;;  %s3488_s24 = smov [#allocation15]  }
  0x17   : > { %p3622_p3 = pnand %p2430_p0, %p367_p2  ;;  %s403_s22 = sshll.u32 %s3487_s21, 4  ;;  %s3629_s22 = int_to_ptr.vmem [resolvable:$true] %s403_s22 }
  0x18   : > { %s429_s25 = sshll.u32 %s3488_s24, 4  ;;  %s4298_s1 = sld [smem:[#allocation43_spill]]  ;;  %s3637_s25 = int_to_ptr.vmem [resolvable:$true] %s429_s25 }
  0x19   : > { %s4295_s20 = scalar_select %p3622_p3, 1, 0 }
  0x1a   : > { %p2789_p5 = pneg %p3622_p3 }
  0x1b   : > { %4296 = sst [smem:[#allocation41_spill]] %s4295_s20 }
  0x1c   : > { %p3633_p6 = pnand %p2789_p5, %p4276_p1 }
  0x1e   : > { %s2996_s28 = scalar_lea.hbm %s4298_s1, 128  ;;  %p3647_p8 = pneg %p3633_p6 }
  0x1f   : > { %p2997_p7 = scmp.ne.s32.totalorder %s4298_s1, %s2996_s28  ;;  %p3003_p11 = scmp.lt.u32.totalorder %s2996_s28, %s4298_s1 }
  0x21   : > { %p2999_p9 = pnand %p3647_p8, %p2997_p7 }
  0x23   : > { %p3000_p10 = pneg %p2999_p9 }
  0x25   : > { %p3005_p12 = pnand %p3003_p11, %p3000_p10 }
  0x27   : > { %3008 = shalt.err (!%p3005_p12)
}
  0x28   : > { %s3009_s26 = scalar_lea.vmem %s381_s18, 128  ;;  %p3017_p5 = scmp.lt.s32.totalorder %s381_s18, %s381_s18 }
  0x29   : > { %p3010_p13 = scmp.ne.s32.totalorder %s381_s18, %s3009_s26  ;;  %p3018_p4 = scmp.lt.s32.totalorder %s3009_s26, %s3009_s26 }
  0x2b   : > { %p3012_p0 = pnand %p3010_p13, %p3647_p8  ;;  %p3019_p1 = por %p3018_p4, %p3017_p5 }
  0x2d   : > { %p3013_p2 = pneg %p3012_p0 }
  0x2f   : > { %p3020_p3 = pnand %p3019_p1, %p3013_p2 }
  0x31   : > { %3023 = shalt.err (!%p3020_p3)
}
  0x32   : > { %2792 = dma.hbm_to_vmem [thread:$0]  (!%p3633_p6), %s4298_s1, 128, %s381_s18, [#allocation10]  }
  0x33   : > { %s4300_s3 = sld [smem:[#allocation44_spill]] }
  0x39   : > { %s3024_s17 = scalar_lea.hbm %s4300_s3, 256 }
  0x3a   : > { %p3025_p7 = scmp.ne.s32.totalorder %s4300_s3, %s3024_s17  ;;  %p3031_p1 = scmp.lt.u32.totalorder %s3024_s17, %s4300_s3 }
  0x3c   : > { %p3027_p9 = pnand %p3025_p7, %p3647_p8 }
  0x3e   : > { %p3028_p4 = pneg %p3027_p9 }
  0x40   : > { %p3033_p3 = pnand %p3031_p1, %p3028_p4 }
  0x42   : > { %3036 = shalt.err (!%p3033_p3)
}
  0x43   : > { %s3037_s18 = scalar_lea.vmem %s3629_s22, 256  ;;  %p3045_p13 = scmp.lt.s32.totalorder %s3629_s22, %s3629_s22 }
  0x44   : > { %p3038_p10 = scmp.ne.s32.totalorder %s3629_s22, %s3037_s18  ;;  %p3046_p0 = scmp.lt.s32.totalorder %s3037_s18, %s3037_s18 }
  0x46   : > { %p3040_p11 = pnand %p3038_p10, %p3647_p8  ;;  %p3047_p2 = por %p3046_p0, %p3045_p13 }
  0x48   : > { %p3041_p12 = pneg %p3040_p11 }
  0x4a   : > { %p3048_p5 = pnand %p3047_p2, %p3041_p12 }
  0x4c   : > { %3051 = shalt.err (!%p3048_p5)
}
  0x4d   : > { %s4282_s0 = smov 64   ;;  %s4284_s19 = smov 4  }
  0x4e   : > { %2798 = dma.hbm_to_vmem [thread:$0]  (!%p3633_p6), %s4300_s3, 256, %s3629_s22, [#allocation13], %s4282_s0, %s4282_s0, %s4284_s19  }
  0x4f   : > { %s4301_s5 = sld [smem:[#allocation45_spill]] }
  0x55   : > { %s3052_s17 = scalar_lea.hbm %s4301_s5, 256 }
  0x56   : > { %p3053_p7 = scmp.ne.s32.totalorder %s4301_s5, %s3052_s17  ;;  %p3059_p1 = scmp.lt.u32.totalorder %s3052_s17, %s4301_s5 }
  0x58   : > { %p3055_p9 = pnand %p3053_p7, %p3647_p8 }
  0x5a   : > { %p3056_p4 = pneg %p3055_p9 }
  0x5c   : > { %p3061_p3 = pnand %p3059_p1, %p3056_p4 }
  0x5e   : > { %3064 = shalt.err (!%p3061_p3)
}
  0x5f   : > { %s3065_s22 = scalar_lea.vmem %s3637_s25, 256  ;;  %p3073_p13 = scmp.lt.s32.totalorder %s3637_s25, %s3637_s25 }
  0x60   : > { %p3066_p10 = scmp.ne.s32.totalorder %s3637_s25, %s3065_s22  ;;  %p3074_p0 = scmp.lt.s32.totalorder %s3065_s22, %s3065_s22 }
  0x62   : > { %p3068_p11 = pnand %p3066_p10, %p3647_p8  ;;  %p3075_p2 = por %p3074_p0, %p3073_p13 }
  0x64   : > { %p3069_p12 = pneg %p3068_p11 }
  0x66   : > { %p3076_p5 = pnand %p3075_p2, %p3069_p12 }
  0x68   : > { %3079 = shalt.err (!%p3076_p5)
}
  0x69   : > { %2804 = dma.hbm_to_vmem [thread:$0]  (!%p3633_p6), %s4301_s5, 256, %s3637_s25, [#allocation16], %s4282_s0, %s4282_s0, %s4284_s19  }
  0x6a   : > { %s3491_s27 = smov [#allocation18]   ;;  %s3492_s28 = smov [#allocation21]  }
  0x6b   : > { %s455_s20 = sshll.u32 %s3491_s27, 4  ;;  %s481_s17 = sshll.u32 %s3492_s28, 4  ;;  %s456_s20 = int_to_ptr.vmem [resolvable:$true] %s455_s20  ;;  %s482_s17 = int_to_ptr.vmem [resolvable:$true] %s481_s17 }
  0x6c   : > { %s3080_s18 = scalar_lea.hbm %s4266_s7, 256 }
  0x6d   : > { %p3081_p7 = scmp.ne.s32.totalorder %s4266_s7, %s3080_s18  ;;  %p3087_p1 = scmp.lt.u32.totalorder %s3080_s18, %s4266_s7 }
  0x6f   : > { %p3083_p9 = pnand %p3081_p7, %p3647_p8 }
  0x71   : > { %p3084_p4 = pneg %p3083_p9 }
  0x73   : > { %p3089_p3 = pnand %p3087_p1, %p3084_p4 }
  0x75   : > { %3092 = shalt.err (!%p3089_p3)
}
  0x76   : > { %s3093_s25 = scalar_lea.vmem %s456_s20, 256  ;;  %p3101_p13 = scmp.lt.s32.totalorder %s456_s20, %s456_s20 }
  0x77   : > { %p3094_p10 = scmp.ne.s32.totalorder %s456_s20, %s3093_s25  ;;  %p3102_p0 = scmp.lt.s32.totalorder %s3093_s25, %s3093_s25 }
  0x79   : > { %p3096_p11 = pnand %p3094_p10, %p3647_p8  ;;  %p3103_p2 = por %p3102_p0, %p3101_p13 }
  0x7b   : > { %p3097_p12 = pneg %p3096_p11 }
  0x7d   : > { %p3104_p5 = pnand %p3103_p2, %p3097_p12 }
  0x7f   : > { %3107 = shalt.err (!%p3104_p5)
}
  0x80   : > { %2810 = dma.hbm_to_vmem [thread:$0]  (!%p3633_p6), %s4266_s7, 256, %s456_s20, [#allocation19], %s4282_s0, %s4282_s0, %s4284_s19  }
  0x81   : > { %s3108_s28 = scalar_lea.hbm %s4268_s9, 256 }
  0x82   : > { %p3109_p7 = scmp.ne.s32.totalorder %s4268_s9, %s3108_s28  ;;  %p3115_p1 = scmp.lt.u32.totalorder %s3108_s28, %s4268_s9 }
  0x84   : > { %p3111_p9 = pnand %p3109_p7, %p3647_p8 }
  0x86   : > { %p3112_p4 = pneg %p3111_p9 }
  0x88   : > { %p3117_p3 = pnand %p3115_p1, %p3112_p4 }
  0x8a   : > { %3120 = shalt.err (!%p3117_p3)
}
  0x8b   : > { %s3121_s1 = scalar_lea.vmem %s482_s17, 256  ;;  %p3129_p13 = scmp.lt.s32.totalorder %s482_s17, %s482_s17 }
  0x8c   : > { %p3122_p10 = scmp.ne.s32.totalorder %s482_s17, %s3121_s1  ;;  %p3130_p0 = scmp.lt.s32.totalorder %s3121_s1, %s3121_s1 }
  0x8e   : > { %p3124_p11 = pnand %p3122_p10, %p3647_p8  ;;  %p3131_p2 = por %p3130_p0, %p3129_p13 }
  0x90   : > { %p3125_p12 = pneg %p3124_p11 }
  0x92   : > { %p3132_p5 = pnand %p3131_p2, %p3125_p12 }
  0x94   : > { %3135 = shalt.err (!%p3132_p5)
}
  0x95   : > { %2816 = dma.hbm_to_vmem [thread:$0]  (!%p3633_p6), %s4268_s9, 256, %s482_s17, [#allocation22], %s4282_s0, %s4282_s0, %s4284_s19  }
  0x96   : > { %s3493_s3 = smov [#allocation24]   ;;  %s3494_s14 = smov [#allocation11]  }
  0x97   : > { %s507_s29 = sshll.u32 %s3493_s3, 4  ;;  %s390_s27 = sshll.u32 %s3494_s14, 4  ;;  %s508_s29 = int_to_ptr.vmem [resolvable:$true] %s507_s29  ;;  %s391_s27 = int_to_ptr.vmem [resolvable:$true] %s390_s27 }
  0x98   : > { %s3136_s26 = scalar_lea.hbm %s4270_s11, 256 }
  0x99   : > { %p3137_p7 = scmp.ne.s32.totalorder %s4270_s11, %s3136_s26  ;;  %p3143_p1 = scmp.lt.u32.totalorder %s3136_s26, %s4270_s11 }
  0x9b   : > { %p3139_p9 = pnand %p3137_p7, %p3647_p8 }
  0x9d   : > { %p3140_p4 = pneg %p3139_p9 }
  0x9f   : > { %p3145_p3 = pnand %p3143_p1, %p3140_p4 }
  0xa1   : > { %3148 = shalt.err (!%p3145_p3)
}
  0xa2   : > { %s3149_s17 = scalar_lea.vmem %s508_s29, 256  ;;  %p3157_p13 = scmp.lt.s32.totalorder %s508_s29, %s508_s29 }
  0xa3   : > { %p3150_p10 = scmp.ne.s32.totalorder %s508_s29, %s3149_s17  ;;  %p3158_p0 = scmp.lt.s32.totalorder %s3149_s17, %s3149_s17 }
  0xa5   : > { %p3152_p11 = pnand %p3150_p10, %p3647_p8  ;;  %p3159_p2 = por %p3158_p0, %p3157_p13 }
  0xa7   : > { %p3153_p12 = pneg %p3152_p11 }
  0xa9   : > { %p3160_p5 = pnand %p3159_p2, %p3153_p12 }
  0xab   : > { %3163 = shalt.err (!%p3160_p5)
}
  0xac   : > { %2822 = dma.hbm_to_vmem [thread:$0]  (!%p3633_p6), %s4270_s11, 256, %s508_s29, [#allocation25], %s4282_s0, %s4282_s0, %s4284_s19  }
  0xad   : > { %s3164_s24 = scalar_lea.hbm %s4261_s2, 384 }
  0xae   : > { %p3165_p7 = scmp.ne.s32.totalorder %s4261_s2, %s3164_s24  ;;  %p3171_p1 = scmp.lt.u32.totalorder %s3164_s24, %s4261_s2 }
  0xb0   : > { %p3167_p9 = pnand %p3165_p7, %p3647_p8 }
  0xb2   : > { %p3168_p4 = pneg %p3167_p9 }
  0xb4   : > { %p3173_p3 = pnand %p3171_p1, %p3168_p4 }
  0xb6   : > { %3176 = shalt.err (!%p3173_p3)
}
  0xb7   : > { %s3177_s20 = scalar_lea.vmem %s391_s27, 384  ;;  %p3185_p13 = scmp.lt.s32.totalorder %s391_s27, %s391_s27 }
  0xb8   : > { %p3178_p10 = scmp.ne.s32.totalorder %s391_s27, %s3177_s20  ;;  %p3186_p0 = scmp.lt.s32.totalorder %s3177_s20, %s3177_s20 }
  0xba   : > { %p3180_p11 = pnand %p3178_p10, %p3647_p8  ;;  %p3187_p2 = por %p3186_p0, %p3185_p13 }
  0xbc   : > { %p3181_p12 = pneg %p3180_p11 }
  0xbe   : > { %p3188_p5 = pnand %p3187_p2, %p3181_p12 }
  0xc0   : > { %3191 = shalt.err (!%p3188_p5)
}
  0xc1   : > { %s4286_s29 = smov 128   ;;  %s3496_s17 = smov 8  }
  0xc2   : > { %2795 = dma.hbm_to_vmem [thread:$0]  (!%p3633_p6), %s4261_s2, 384, %s391_s27, [#allocation10], %s4286_s29, %s4286_s29, %s3496_s17  }
  0xc3   : > { %s3497_s14 = smov [#allocation14]   ;;  %s3498_s24 = smov [#allocation17]  }
  0xc4   : > { %s416_s28 = sshll.u32 %s3497_s14, 4  ;;  %s442_s26 = sshll.u32 %s3498_s24, 4  ;;  %s417_s28 = int_to_ptr.vmem [resolvable:$true] %s416_s28  ;;  %s443_s26 = int_to_ptr.vmem [resolvable:$true] %s442_s26 }
  0xc5   : > { %s3192_s1 = scalar_lea.hbm %s4263_s4, 512 }
  0xc6   : > { %p3193_p7 = scmp.ne.s32.totalorder %s4263_s4, %s3192_s1  ;;  %p3199_p1 = scmp.lt.u32.totalorder %s3192_s1, %s4263_s4 }
  0xc8   : > { %p3195_p9 = pnand %p3193_p7, %p3647_p8 }
  0xca   : > { %p3196_p4 = pneg %p3195_p9 }
  0xcc   : > { %p3201_p3 = pnand %p3199_p1, %p3196_p4 }
  0xce   : > { %3204 = shalt.err (!%p3201_p3)
}
  0xcf   : > { %s3205_s27 = scalar_lea.vmem %s417_s28, 512  ;;  %p3213_p13 = scmp.lt.s32.totalorder %s417_s28, %s417_s28 }
  0xd0   : > { %p3206_p10 = scmp.ne.s32.totalorder %s417_s28, %s3205_s27  ;;  %p3214_p0 = scmp.lt.s32.totalorder %s3205_s27, %s3205_s27 }
  0xd2   : > { %p3208_p11 = pnand %p3206_p10, %p3647_p8  ;;  %p3215_p2 = por %p3214_p0, %p3213_p13 }
  0xd4   : > { %p3209_p12 = pneg %p3208_p11 }
  0xd6   : > { %p3216_p5 = pnand %p3215_p2, %p3209_p12 }
  0xd8   : > { %3219 = shalt.err (!%p3216_p5)
}
  0xd9   : > { %s4302_s0 = smov 4   ;;  %s4303_s25 = smov 64  }
  0xda   : > { %2801 = dma.hbm_to_vmem [thread:$0]  (!%p3633_p6), %s4263_s4, 512, %s417_s28, [#allocation13], %s4303_s25, %s4303_s25, %s4302_s0  }
  0xdb   : > { %s3220_s24 = scalar_lea.hbm %s4265_s6, 256 }
  0xdc   : > { %p3221_p7 = scmp.ne.s32.totalorder %s4265_s6, %s3220_s24  ;;  %p3227_p1 = scmp.lt.u32.totalorder %s3220_s24, %s4265_s6 }
  0xde   : > { %p3223_p9 = pnand %p3221_p7, %p3647_p8 }
  0xe0   : > { %p3224_p4 = pneg %p3223_p9 }
  0xe2   : > { %p3229_p3 = pnand %p3227_p1, %p3224_p4 }
  0xe4   : > { %3232 = shalt.err (!%p3229_p3)
}
  0xe5   : > { %s3233_s27 = scalar_lea.vmem %s443_s26, 256  ;;  %p3241_p13 = scmp.lt.s32.totalorder %s443_s26, %s443_s26 }
  0xe6   : > { %p3234_p10 = scmp.ne.s32.totalorder %s443_s26, %s3233_s27  ;;  %p3242_p0 = scmp.lt.s32.totalorder %s3233_s27, %s3233_s27 }
  0xe8   : > { %p3236_p11 = pnand %p3234_p10, %p3647_p8  ;;  %p3243_p2 = por %p3242_p0, %p3241_p13 }
  0xea   : > { %p3237_p12 = pneg %p3236_p11 }
  0xec   : > { %p3244_p5 = pnand %p3243_p2, %p3237_p12 }
  0xee   : > { %3247 = shalt.err (!%p3244_p5)
}
  0xef   : > { %2807 = dma.hbm_to_vmem [thread:$0]  (!%p3633_p6), %s4265_s6, 256, %s443_s26, [#allocation16], %s4303_s25, %s4303_s25, %s4302_s0  }
  0xf0   : > { %s3499_s19 = smov [#allocation20]   ;;  %s3500_s14 = smov [#allocation23]  }
  0xf1   : > { %s468_s3 = sshll.u32 %s3499_s19, 4  ;;  %s494_s24 = sshll.u32 %s3500_s14, 4  ;;  %s469_s3 = int_to_ptr.vmem [resolvable:$true] %s468_s3  ;;  %s495_s24 = int_to_ptr.vmem [resolvable:$true] %s494_s24 }
  0xf2   : > { %s3248_s1 = scalar_lea.hbm %s4267_s8, 256 }
  0xf3   : > { %p3249_p7 = scmp.ne.s32.totalorder %s4267_s8, %s3248_s1  ;;  %p3255_p1 = scmp.lt.u32.totalorder %s3248_s1, %s4267_s8 }
  0xf5   : > { %p3251_p9 = pnand %p3249_p7, %p3647_p8 }
  0xf7   : > { %p3252_p4 = pneg %p3251_p9 }
  0xf9   : > { %p3257_p3 = pnand %p3255_p1, %p3252_p4 }
  0xfb   : > { %3260 = shalt.err (!%p3257_p3)
}
  0xfc   : > { %s3261_s26 = scalar_lea.vmem %s469_s3, 256  ;;  %p3269_p13 = scmp.lt.s32.totalorder %s469_s3, %s469_s3 }
  0xfd   : > { %p3262_p10 = scmp.ne.s32.totalorder %s469_s3, %s3261_s26  ;;  %p3270_p0 = scmp.lt.s32.totalorder %s3261_s26, %s3261_s26 }
  0xff   : > { %p3264_p11 = pnand %p3262_p10, %p3647_p8  ;;  %p3271_p2 = por %p3270_p0, %p3269_p13 }
 0x101   : > { %p3265_p12 = pneg %p3264_p11 }
 0x103   : > { %p3272_p5 = pnand %p3271_p2, %p3265_p12 }
 0x105   : > { %3275 = shalt.err (!%p3272_p5)
}
 0x106   : > { %2813 = dma.hbm_to_vmem [thread:$0]  (!%p3633_p6), %s4267_s8, 256, %s469_s3, [#allocation19], %s4303_s25, %s4303_s25, %s4302_s0  }
 0x107   : > { %s3276_s18 = scalar_lea.hbm %s4269_s10, 256 }
 0x108   : > { %p3277_p7 = scmp.ne.s32.totalorder %s4269_s10, %s3276_s18  ;;  %p3283_p1 = scmp.lt.u32.totalorder %s3276_s18, %s4269_s10 }
 0x10a   : > { %p3279_p9 = pnand %p3277_p7, %p3647_p8 }
 0x10c   : > { %p3280_p4 = pneg %p3279_p9 }
 0x10e   : > { %p3285_p3 = pnand %p3283_p1, %p3280_p4 }
 0x110   : > { %3288 = shalt.err (!%p3285_p3)
}
 0x111   : > { %s3289_s28 = scalar_lea.vmem %s495_s24, 256  ;;  %p3297_p13 = scmp.lt.s32.totalorder %s495_s24, %s495_s24 }
 0x112   : > { %p3290_p10 = scmp.ne.s32.totalorder %s495_s24, %s3289_s28  ;;  %p3298_p0 = scmp.lt.s32.totalorder %s3289_s28, %s3289_s28 }
 0x114   : > { %p3292_p11 = pnand %p3290_p10, %p3647_p8  ;;  %p3299_p2 = por %p3298_p0, %p3297_p13 }
 0x116   : > { %p3293_p12 = pneg %p3292_p11 }
 0x118   : > { %p3300_p5 = pnand %p3299_p2, %p3293_p12 }
 0x11a   : > { %3303 = shalt.err (!%p3300_p5)
}
 0x11b   : > { %2819 = dma.hbm_to_vmem [thread:$0]  (!%p3633_p6), %s4269_s10, 256, %s495_s24, [#allocation22], %s4303_s25, %s4303_s25, %s4302_s0  }
 0x11c   : > { %s3501_s29 = smov [#allocation26]   ;;  %s3502_s19 = smov [#allocation27]  }
 0x11d   : > { %s520_s5 = sshll.u32 %s3501_s29, 4  ;;  %s533_s14 = sshll.u32 %s3502_s19, 4  ;;  %s521_s5 = int_to_ptr.vmem [resolvable:$true] %s520_s5  ;;  %s534_s14 = int_to_ptr.vmem [resolvable:$true] %s533_s14 }
 0x11e   : > { %s3304_s1 = scalar_lea.hbm %s4271_s12, 512 }
 0x11f   : > { %p3305_p7 = scmp.ne.s32.totalorder %s4271_s12, %s3304_s1  ;;  %p3311_p1 = scmp.lt.u32.totalorder %s3304_s1, %s4271_s12 }
 0x121   : > { %p3307_p9 = pnand %p3305_p7, %p3647_p8 }
 0x123   : > { %p3308_p4 = pneg %p3307_p9 }
 0x125   : > { %p3313_p3 = pnand %p3311_p1, %p3308_p4 }
 0x127   : > { %3316 = shalt.err (!%p3313_p3)
}
 0x128   : > { %s3317_s24 = scalar_lea.vmem %s521_s5, 512  ;;  %p3325_p13 = scmp.lt.s32.totalorder %s521_s5, %s521_s5 }
 0x129   : > { %p3318_p10 = scmp.ne.s32.totalorder %s521_s5, %s3317_s24  ;;  %p3326_p0 = scmp.lt.s32.totalorder %s3317_s24, %s3317_s24 }
 0x12b   : > { %p3320_p11 = pnand %p3318_p10, %p3647_p8  ;;  %p3327_p2 = por %p3326_p0, %p3325_p13 }
 0x12d   : > { %p3321_p12 = pneg %p3320_p11 }
 0x12f   : > { %p3328_p5 = pnand %p3327_p2, %p3321_p12 }
 0x131   : > { %3331 = shalt.err (!%p3328_p5)
}
 0x132   : > { %2825 = dma.hbm_to_vmem [thread:$0]  (!%p3633_p6), %s4271_s12, 512, %s521_s5, [#allocation25], %s4303_s25, %s4303_s25, %s4302_s0  }
 0x133   : > { %s3332_s22 = scalar_lea.hbm %s4272_s13, 256 }
 0x134   : > { %p3333_p7 = scmp.ne.s32.totalorder %s4272_s13, %s3332_s22  ;;  %p3339_p1 = scmp.lt.u32.totalorder %s3332_s22, %s4272_s13 }
 0x136   : > { %p3335_p9 = pnand %p3333_p7, %p3647_p8 }
 0x138   : > { %p3336_p4 = pneg %p3335_p9 }
 0x13a   : > { %p3341_p3 = pnand %p3339_p1, %p3336_p4 }
 0x13c   : > { %3344 = shalt.err (!%p3341_p3)
}
 0x13d   : > { %s3345_s3 = scalar_lea.vmem %s534_s14, 256  ;;  %p3353_p13 = scmp.lt.s32.totalorder %s534_s14, %s534_s14 }
 0x13e   : > { %p3346_p10 = scmp.ne.s32.totalorder %s534_s14, %s3345_s3  ;;  %p3354_p0 = scmp.lt.s32.totalorder %s3345_s3, %s3345_s3 }
 0x140   : > { %p3348_p11 = pnand %p3346_p10, %p3647_p8  ;;  %p3355_p2 = por %p3354_p0, %p3353_p13 }
 0x142   : > { %p3349_p12 = pneg %p3348_p11 }
 0x144   : > { %p3356_p5 = pnand %p3355_p2, %p3349_p12 }
 0x146   : > { %3359 = shalt.err (!%p3356_p5)
}
 0x147   : > { %s4304_s0 = smov 128   ;;  %s4305_s21 = sld [smem:[#allocation39_spill]] }
 0x148   : > { %s4306_s24 = sld [smem:[#allocation40_spill]]  ;;  %s2429_s23 = sadd.s32 4294967294, %s3484_s16  }
 0x149   : > { %2828 = dma.hbm_to_vmem [thread:$0]  (!%p3633_p6), %s4272_s13, 256, %s534_s14, [#allocation28], %s4304_s0, %s4304_s0, %s3496_s17  }
 0x14a   : > { %s3927_s26 = sadd.s32 1, %s3484_s16   ;;  %s44_s29 = sadd.s32 1, %s3480_s15 }
 0x14b   : > { %s41_s19 = ssub.s32 %s3484_s16, %s3927_s26  ;;  %p51_p8 = scmp.ne.s32.totalorder %s3480_s15, %s3476_s30 }
 0x14c   : > { %p42_p7 = scmp.eq.s32.totalorder %s41_s19, 0  ;;  %p52_p9 = scmp.eq.s32.totalorder %s3484_s16, 0 }
 0x14d   : > { %p57_p4 = scmp.ne.s32.totalorder %s3476_s30, %s4305_s21  ;;  %p360_p12 = scmp.eq.s32.totalorder %s2429_s23, 1 }
 0x14e   : > { %p354_p1 = scmp.eq.s32.totalorder %s4306_s24, 1  ;;  %p53_p3 = por %p52_p9, %p51_p8 }
 0x14f   : > { %s3939_s18 = scalar_select %p42_p7, %s3480_s15, %s44_s29  }
 0x150   : > { %p4307_p10 = scmp.eq.s32.totalorder %s4306_s24, 0  ;;  %p3947_p6 = por %p354_p1, %p51_p8 }
 0x151   : > { %p2850_p13 = scmp.lt.s32.totalorder %s3484_s16, 2  ;;  %s547_s14 = sand.u32 1, %s3480_s15  }
 0x152   : > { %p3943_p11 = por %p4307_p10, %p57_p4  ;;  %p3953_p0 = por %p360_p12, %p57_p4 }
 0x153   : > { %s4309_s17 = scalar_select %p3947_p6, 1, 0 }
 0x154   : > { %s4310_s1 = scalar_select %p3953_p0, 1, 0 }
 0x155   : > { %s2445_s20 = sshll.u32 %s547_s14, 3  ;;  %s2446_s27 = sshll.u32 %s3484_s16, 7 }
 0x156   : > { %s4311_s0 = sld [smem:[#allocation42_spill]]  ;;  %s551_s5 = scalar_lea.vmem [#allocation6], %s2445_s20 }
 0x157   : > { %s558_s21 = sshll.u32 %s551_s5, 4  ;;  %p3963_p2 = pnand %p2850_p13, %p53_p3  ;;  %s3967_s21 = int_to_ptr.vmem [resolvable:$true] %s558_s21 }
 0x158   : > { %s548_s23 = scalar_lea.sflag [#allocation7], %s547_s14 }
 0x159   : > { %p3362_p8 = pneg %p3963_p2 }
 0x15c   : > { %s3961_s25 = scalar_lea.hbm %s4311_s0, %s2446_s27  ;;  %s3365_s27 = scalar_lea.hbm %s4311_s0, 256 }
 0x15d   : > { %s3360_s29 = scalar_lea.hbm %s3961_s25, 128  ;;  %p3366_p4 = scmp.lt.u32.totalorder %s3961_s25, %s4311_s0 }
 0x15e   : > { %p3361_p5 = scmp.ne.s32.totalorder %s3961_s25, %s3360_s29  ;;  %p3367_p1 = scmp.lt.u32.totalorder %s3365_s27, %s3360_s29 }
 0x15f   : > { %p3369_p10 = scmp.lt.u32.totalorder %s3360_s29, %s3961_s25 }
 0x160   : > { %p3363_p7 = pnand %p3362_p8, %p3361_p5  ;;  %p3368_p3 = por %p3367_p1, %p3366_p4 }
 0x162   : > { %p3364_p9 = pneg %p3363_p7  ;;  %p3370_p12 = por %p3369_p10, %p3368_p3 }
 0x164   : > { %p3371_p13 = pnand %p3370_p12, %p3364_p9 }
 0x166   : > { %3374 = shalt.err (!%p3371_p13)
}
 0x167   : > { %s3375_s14 = scalar_lea.vmem %s3967_s21, 128  ;;  %s3503_s5 = smov [#allocation6]  }
 0x168   : > { %p3376_p5 = scmp.ne.s32.totalorder %s3967_s21, %s3375_s14  ;;  %s3380_s19 = sshll.u32 %s3503_s5, 4  ;;  %s3381_s19 = int_to_ptr.vmem [resolvable:$false] %s3380_s19 }
 0x169   : > { %s3382_s20 = scalar_lea.vmem %s3381_s19, 256  ;;  %p3383_p6 = scmp.lt.s32.totalorder %s3967_s21, %s3381_s19 }
 0x16a   : > { %p3378_p7 = pnand %p3376_p5, %p3362_p8  ;;  %p3384_p4 = scmp.lt.s32.totalorder %s3382_s20, %s3375_s14 }
 0x16c   : > { %p3379_p0 = pneg %p3378_p7  ;;  %p3385_p1 = por %p3384_p4, %p3383_p6 }
 0x16e   : > { %p3386_p3 = pnand %p3385_p1, %p3379_p0 }
 0x170   : > { %3389 = shalt.err (!%p3386_p3)
}
 0x171   : > { %2832 = dma.hbm_to_vmem [thread:$0]  (!%p3963_p2), %s3961_s25, 128, %s3967_s21, %s548_s23  }
 0x172   : > { %s4313_s29 = sld [smem:[#allocation41_spill]] }
 0x178   : > { %p4314_p9 = scmp.ne.s32.totalorder %s4313_s29, 0 }
 0x179   : > { %s3997_s27 = sand.u32 (!%p4314_p9), 1, %s3476_s30  }
 0x17a   : > { %567 = sbr.rel (%p4314_p9) target bundleno = 5042 (0x13b2), region = 76  ;;  %s2448_s28 = sshll.u32 (!%p4314_p9), %s3997_s27, 3 }
 0x17b   : > { %s570_s3 = scalar_lea.sflag (!%p4314_p9), [#allocation7], %s3997_s27  ;;  %s573_s14 = scalar_lea.vmem (!%p4314_p9), [#allocation6], %s2448_s28 }
 0x181   : > { %3435 = dma.done.wait (%p3943_p11), %s570_s3, 128  }
 0x182   : > { %3437 = vsyncadd (%p3943_p11), %s570_s3, 4294967168  ;;  %s4315_s25 = sld [smem:[#allocation40_spill]] }
 0x188   : > { %p4316_p6 = scmp.eq.s32.totalorder %s4315_s25, 0 }
 0x18a   : > { %3439 = dma.done.wait (%p4316_p6), [#allocation10], 512   ;;  %p4317_p0 = pmov %p4316_p6 }
 0x18c   : > { %3441 = vsyncadd (%p4317_p0), [#allocation10], 4294966784  ;;  %p4318_p2 = pmov %p4317_p0 }
 0x18d   : > { %p4319_p8 = pmov %p4317_p0 }
 0x18e   : > { %3443 = dma.done.wait (%p4318_p2), [#allocation13], 768  }
 0x18f   : > { %3445 = vsyncadd (%p4319_p8), [#allocation13], 4294966528  ;;  %p4320_p10 = pmov %p4317_p0 }
 0x190   : > { %p4321_p12 = pmov %p4317_p0 }
 0x191   : > { %3447 = dma.done.wait (%p4320_p10), [#allocation16], 512  }
 0x192   : > { %3449 = vsyncadd (%p4321_p12), [#allocation16], 4294966784  ;;  %p4322_p11 = pmov %p4317_p0 }
 0x193   : > { %p4323_p13 = pmov %p4317_p0 }
 0x194   : > { %3451 = dma.done.wait (%p4322_p11), [#allocation19], 512  }
 0x195   : > { %3453 = vsyncadd (%p4323_p13), [#allocation19], 4294966784  ;;  %p4324_p5 = pmov %p4317_p0 }
 0x196   : > { %p4325_p7 = pmov %p4317_p0 }
 0x197   : > { %3455 = dma.done.wait (%p4324_p5), [#allocation22], 512  }
 0x198   : > { %3457 = vsyncadd (%p4325_p7), [#allocation22], 4294966784  ;;  %p4326_p4 = pmov %p4317_p0 }
 0x199   : > { %p4327_p1 = pmov %p4317_p0 }
 0x19a   : > { %3459 = dma.done.wait (%p4326_p4), [#allocation25], 768  }
 0x19b   : > { %3461 = vsyncadd (%p4327_p1), [#allocation25], 4294966528  ;;  %p4328_p3 = pmov %p4317_p0 }
 0x19c   : > { %p4329_p9 = pmov %p4317_p0 }
 0x19d   : > { %3463 = dma.done.wait (%p4328_p3), [#allocation28], 256  }
 0x19e   : > { %3465 = vsyncadd (%p4329_p9), [#allocation28], 4294967040  ;;  %vm672_vm0 = vcmask 258048   ;;  %v4035_v0 = vld [vmem:[%s573_s14] sm:$0x1f]  ;;  %v2930_v7 = vld [vmem:[#allocation12] sm:$0xff]  }
 0x19f   : > { %v673_v1 = vsel %vm672_vm0, %v4035_v0, 0.0  ;;  %v3504_v8 = vmov 0.0   ;;  %vm3505_vm1 = vmmov 0   ;;  %v2931_v9 = vld [vmem:[#allocation12 + $0x8] sm:$0xff]   ;;  %vm721_vm2 = vcmask 261120   ;;  %v2932_v20 = vld [vmem:[#allocation14] sm:$0xff]  }
 0x1a0   : > { %674 = vadd.xlane.f32.xlu0 %v673_v1  ;;  %2597 = vmatprep.subr.bf16.mxu1 %v3504_v8  ;;  %1805 = vst.msk [vmem:[#allocation5] sm:$0xff] %vm721_vm2, %v3504_v8  ;;  %v2463_v14 = vld [vmem:[#allocation11] ss:$0 sm:$0xff]  ;;  %v2464_v16 = vld [vmem:[#allocation11 + $0x1] ss:$0 sm:$0xff]  ;;  %v2933_v21 = vld [vmem:[#allocation14 + $0x8] sm:$0xff]  }
 0x1a1   : > { %2601 = vmatprep.mubr.msk.bf16.mxu1 %vm3505_vm1, %v3504_v8  ;;  %2598 = vmatpush3.bf16.msra.mxu1 %v2930_v7  ;;  %v2934_v22 = vld [vmem:[#allocation14 + $0x10] sm:$0xff]   ;;  %v2935_v23 = vld [vmem:[#allocation14 + $0x18] sm:$0xff]   ;;  %vm810_vm3 = vcmask 523264   ;;  %v2936_v51 = vld [vmem:[#allocation15] sm:$0xff]   ;;  %vm1019_vm4 = vcmask 61440   ;;  %s3506_s22 = smov 104  }
 0x1a2   : > { %2617 = vmatprep.subr.bf16.mxu0 %v3504_v8  ;;  %2599 = vmatprep.subr.bf16.mxu1 %v3504_v8  ;;  %v2465_v24 = vld [vmem:[#allocation11 + $0x2] ss:$0 sm:$0xff]  ;;  %v2469_v37 = vld [vmem:[#allocation11 + $0x3] ss:$0 sm:$0xff]  ;;  %v2937_v52 = vld [vmem:[#allocation15 + $0x8] sm:$0xff]   ;;  %s3507_s21 = smov 96  }
 0x1a3   : > { %2621 = vmatprep.mubr.msk.bf16.mxu0 %vm3505_vm1, %v3504_v8  ;;  %2618 = vmatpush3.bf16.msra.mxu0 %v2936_v51  ;;  %v2475_v57 = vld [vmem:[#allocation11 + $0x4] ss:$0 sm:$0xff]  ;;  %v2476_v59 = vld [vmem:[#allocation11 + $0x5] ss:$0 sm:$0xff]  ;;  %v2938_v62 = vld [vmem:[#allocation17] sm:$0xff]   ;;  %s3508_s24 = smov 112  }
 0x1a4   : > { %2619 = vmatprep.subr.bf16.mxu0 %v3504_v8  ;;  %v946_v1 = vld [vmem:[#allocation9] sm:$0x1f]  ;;  %s3509_s23 = smov 8   ;;  %s3510_s5 = smov 120   ;;  %vm1025_vm5 = vcmask 127040   ;;  %vm1041_vm6 = vcmask 192640  }
 0x1a5   : > { %2600 = vmatpush3.bf16.msra.mxu1 %v2931_v9  ;;  %s3511_s19 = smov 16   ;;  %s3512_s20 = smov 24   ;;  %vm1046_vm7 = vcmask 258240   ;;  %vm1059_vm8 = vcmask 323840   ;;  %vm1064_vm9 = vcmask 389440   ;;  %vm1077_vm10 = vcmask 455040  }
 0x1a6   : > { %2605 = vmatprep.subr.bf16.mxu1 %v3504_v8  ;;  %s3513_s29 = smov 32   ;;  %vm1082_vm11 = vcmask 520640   ;;  %vm1096_vm12 = vcmask 130048   ;;  %s3514_s3 = smov 80   ;;  %vm1143_vm13 = vcmask 36864   ;;  %vm1165_vm14 = vcmask 1041408  }
 0x1a7   : > { %2620 = vmatpush3.bf16.msra.mxu0 %v2937_v52  ;;  %s3515_s14 = smov 56   ;;  %vm1166_vm15 = vcmask 1042432   ;;  %p4331_p0 = scmp.ne.s32.totalorder %s4309_s17, 0 }
 0x1a8   : > { %2625 = vmatprep.subr.bf16.mxu0 %v3504_v8 }
 0x22d   : > { %v675_v2 = vpop.xlane.xlu0 %674 }
 0x22e   : > { %v677_v3 = vmul.f32 0.03125, %v675_v2  ;;  %v947_v2 = vpack.c.bf16 %v946_v1, %v946_v1 }
 0x230   : > { %v678_v4 = vsub.f32 %v4035_v0, %v677_v3  ;;  %v2477_v3 = vld [vmem:[#allocation11 + $0x6] ss:$0 sm:$0xff] }
 0x232   : > { %v679_v5 = vmul.f32 %v678_v4, %v678_v4 }
 0x234   : > { %v680_v6 = vsel %vm672_vm0, %v679_v5, 0.0  ;;  %v2484_v5 = vld [vmem:[#allocation11 + $0x7] ss:$0 sm:$0xff] }
 0x235   : > { %681 = vadd.xlane.f32.xlu0 %v680_v6 }
 0x2c2   : > { %v682_v10 = vpop.xlane.xlu0 %681 }
 0x2c3   : > { %v683_v11 = vmul.f32 0.03125, %v682_v10 }
 0x2c5   : > { %v684_v12 = vadd.f32 1e-05, %v683_v11 }
 0x2c7   : > { %2954 = vrsqrt.f32 %v684_v12 }
 0x2d1   : > { %v2955_v13 = vpop.eup %2954 }
 0x2d2   : > { %v686_v15 = vmul.f32 %v2955_v13, %v678_v4 }
 0x2d4   : > { %v692_v17 = vmul.f32 %v2463_v14, %v686_v15  ;;  %v2485_v15 = vld [vmem:[#allocation11 + $0x8] ss:$0 sm:$0xff] }
 0x2d6   : > { %v698_v18 = vadd.f32 %v2464_v16, %v692_v17 }
 0x2d8   : > { %v699_v19 = vpack.c.bf16 %v698_v18, %v698_v18 }
 0x2da   : > { %2602 = vmatmul.mubr.msk.bf16.vlgmr.msra.gmra.mrb[0].mxu1 %vm721_vm2, %v699_v19 }
 0x2db   : > { %2613 = vmatprep.mubr.msk.bf16.mxu1 %vm3505_vm1, %v3504_v8  ;;  %2606 = vmatpush3.bf16.msra.mxu1 %v2932_v20 }
 0x2dc   : > { %2607 = vmatprep.subr.bf16.mxu1 %v3504_v8 }
 0x2df   : > { %2608 = vmatpush3.bf16.msra.mxu1 %v2933_v21 }
 0x2e0   : > { %2609 = vmatprep.subr.bf16.mxu1 %v3504_v8 }
 0x2e3   : > { %2610 = vmatpush3.bf16.msra.mxu1 %v2934_v22 }
 0x2e4   : > { %2611 = vmatprep.subr.bf16.mxu1 %v3504_v8 }
 0x2e7   : > { %2612 = vmatpush3.bf16.msra.mxu1 %v2935_v23 }
 0x2e8   : > { %2633 = vmatprep.subr.bf16.mxu1 %v3504_v8 }
 0x3ad   : > { %v759_v25 = vpop.f32.mrb[0].mxu1 }
 0x3ae   : > { %v760_v26 = vadd.f32 %v2465_v24, %v759_v25  ;;  %v2603_v27 = vpop.f32.mrb[1].mxu1 }
 0x3af   : > { %v762_v28 = vpop.f32.mrb[2].mxu1 }
 0x3b0   : > { %v765_v29 = vsub.f32 0.0, %v760_v26  ;;  %v2604_v30 = vpop.f32.mrb[3].mxu1 }
 0x3b2   : > { %v766_v31 = vmul.f32 1.442695, %v765_v29 }
 0x3b4   : > { %2956 = vpow2.f32 %v766_v31 }
 0x3be   : > { %v2957_v32 = vpop.eup %2956 }
 0x3bf   : > { %v768_v33 = vadd.f32 1.0, %v2957_v32 }
 0x3c1   : > { %2958 = vrcp.f32 %v768_v33 }
 0x3cb   : > { %v2959_v34 = vpop.eup %2958 }
 0x3cc   : > { %v771_v35 = vmul.f32 %v2959_v34, %v760_v26 }
 0x3ce   : > { %v772_v36 = vpack.c.bf16 %v771_v35, %v771_v35 }
 0x3d0   : > { %2614 = vmatmul.mubr.msk.bf16.vlgmr.msra.gmra.mrb[4].mxu1 %vm810_vm3, %v772_v36 }
 0x3d1   : > { %2635 = vmatprep.mubr.msk.bf16.mxu1 %vm3505_vm1, %v3504_v8 }
 0x4a3   : > { %v848_v38 = vpop.f32.mrb[4].mxu1 }
 0x4a4   : > { %v849_v39 = vadd.f32 %v2469_v37, %v848_v38  ;;  %v2615_v40 = vpop.f32.mrb[5].mxu1 }
 0x4a5   : > { %v851_v41 = vpop.f32.mrb[6].mxu1 }
 0x4a6   : > { %v854_v42 = vmul.f32 0.5, %v849_v39  ;;  %v2616_v43 = vpop.f32.mrb[7].mxu1 }
 0x4a8   : > { %v4062_v44 = vadd.f32 %v854_v42, %v4035_v0  ;;  %v2939_v0 = vld [vmem:[#allocation17 + $0x8] sm:$0xff]  }
 0x4aa   : > { %v856_v45 = vsel %vm672_vm0, %v4062_v44, 0.0 }
 0x4ab   : > { %857 = vadd.xlane.f32.xlu1 %v856_v45 }
 0x538   : > { %v858_v46 = vpop.xlane.xlu1 %857 }
 0x539   : > { %v859_v47 = vmul.f32 0.03125, %v858_v46 }
 0x53b   : > { %v860_v48 = vsub.f32 %v4062_v44, %v859_v47 }
 0x53d   : > { %v861_v49 = vmul.f32 %v860_v48, %v860_v48 }
 0x53f   : > { %v862_v50 = vsel %vm672_vm0, %v861_v49, 0.0 }
 0x540   : > { %863 = vadd.xlane.f32.xlu1 %v862_v50 }
 0x5cd   : > { %v864_v53 = vpop.xlane.xlu1 %863 }
 0x5ce   : > { %v865_v54 = vmul.f32 0.03125, %v864_v53 }
 0x5d0   : > { %v866_v55 = vadd.f32 1e-05, %v865_v54 }
 0x5d2   : > { %2960 = vrsqrt.f32 %v866_v55 }
 0x5dc   : > { %v2961_v56 = vpop.eup %2960 }
 0x5dd   : > { %v868_v58 = vmul.f32 %v2961_v56, %v860_v48 }
 0x5df   : > { %v874_v60 = vmul.f32 %v2475_v57, %v868_v58 }
 0x5e1   : > { %v880_v61 = vadd.f32 %v2476_v59, %v874_v60 }
 0x5e3   : > { %v881_v63 = vpack.c.bf16 %v880_v61, %v880_v61 }
 0x5e5   : > { %2622 = vmatmul.mubr.msk.bf16.vlgmr.msra.gmra.mrb[0].mxu0 %vm721_vm2, %v881_v63 }
 0x5e6   : > { %2626 = vmatpush3.bf16.msra.mxu0 %v2938_v62  ;;  %2629 = vmatprep.mubr.msk.bf16.mxu0 %vm3505_vm1, %v3504_v8 }
 0x5e7   : > { %2627 = vmatprep.subr.bf16.mxu0 %v3504_v8 }
 0x5ea   : > { %2628 = vmatpush3.bf16.msra.mxu0 %v2939_v0 }
 0x5eb   : > { %2639 = vmatprep.subr.bf16.mxu0 %v3504_v8 }
 0x5ed   : > { %2630 = vmatmul.mubr.msk.bf16.vlgmr.msra.gmra.mrb[4].mxu0 %vm721_vm2, %v947_v2 }
 0x5ee   : > { %2641 = vmatprep.mubr.msk.bf16.mxu0 %vm3505_vm1, %v3504_v8 }
 0x6b8   : > { %v940_v4 = vpop.f32.mrb[0].mxu0 }
 0x6b9   : > { %v4078_v6 = vadd.f32 %v2477_v3, %v940_v4  ;;  %v2623_v7 = vpop.f32.mrb[1].mxu0 }
 0x6ba   : > { %v943_v9 = vpop.f32.mrb[2].mxu0 }
 0x6bb   : > { %1048 = vrot.lane.b32.xlu1 %v4078_v6, %s3506_s22  ;;  %1028 = vrot.lane.b32.xlu0 %v4078_v6, %s3507_s21  ;;  %v2624_v10 = vpop.f32.mrb[3].mxu0  ;;  %v1012_v11 = vadd.f32 %v2484_v5, %v4078_v6  ;;  %v1018_v17 = vadd.f32 %v2485_v15, %v4078_v6  ;;  %s3516_s22 = smov 64  }
 0x6bd   : > { %1020 = vst.msk [vmem:[#allocation2] sm:$0x1f] %vm1019_vm4, %v1012_v11 }
 0x6bf   : > { %1066 = vrot.lane.b32.xlu0 %v4078_v6, %s3508_s24  ;;  %1038 = vrot.lane.b32.xlu1 %v1012_v11, %s3509_s23 }
 0x6c0   : > { %v1001_v12 = vpop.f32.mrb[4].mxu0 }
 0x6c1   : > { %v2631_v13 = vpop.f32.mrb[5].mxu0 }
 0x6c2   : > { %v1004_v14 = vpop.f32.mrb[6].mxu0 }
 0x6c3   : > { %1084 = vrot.lane.b32.xlu0 %v4078_v6, %s3510_s5  ;;  %1033 = vrot.lane.b32.xlu1 %v1001_v12, %s3509_s23  ;;  %v2632_v16 = vpop.f32.mrb[7].mxu0  ;;  %s669_s5 = scalar_lea.vmem [#allocation29], %s2448_s28  ;;  %s3520_s28 = smov [#allocation29]  }
 0x6c7   : > { %1022 = vrot.lane.b32.xlu0 %v1018_v17, %s3509_s23  ;;  %1052 = vrot.lane.b32.xlu1 %v1001_v12, %s3511_s19 }
 0x6cb   : > { %1043 = vrot.lane.b32.xlu0 %v1018_v17, %s3511_s19  ;;  %1070 = vrot.lane.b32.xlu1 %v1001_v12, %s3512_s20 }
 0x6cf   : > { %1061 = vrot.lane.b32.xlu0 %v1018_v17, %s3512_s20  ;;  %1088 = vrot.lane.b32.xlu1 %v1001_v12, %s3513_s29 }
 0x6d3   : > { %1079 = vrot.lane.b32.xlu0 %v1018_v17, %s3513_s29  ;;  %1056 = vrot.lane.b32.xlu1 %v1012_v11, %s3511_s19 }
 0x6d7   : > { %1074 = vrot.lane.b32.xlu1 %v1012_v11, %s3512_s20 }
 0x72d   : > { %v1049_v18 = vpop.permute.xlu1 %1048  ;;  %v1029_v19 = vpop.permute.xlu0 %1028 }
 0x72e   : > { %1031 = vst.msk [vmem:[#allocation3] sm:$0x1f] %vm1019_vm4, %v1029_v19 }
 0x731   : > { %v1067_v20 = vpop.permute.xlu0 %1066  ;;  %v1039_v21 = vpop.permute.xlu1 %1038 }
 0x735   : > { %v1085_v22 = vpop.permute.xlu0 %1084  ;;  %v1034_v23 = vpop.permute.xlu1 %1033 }
 0x736   : > { %1036 = vst.msk [vmem:[#allocation3] sm:$0x1f] %vm1025_vm5, %v1034_v23  ;;  %v1157_v23 = vpack.c.bf16 %v4078_v6, %v4078_v6 }
 0x737   : > { %1051 = vst.msk [vmem:[#allocation3] sm:$0x1f] %vm1041_vm6, %v1049_v18 }
 0x739   : > { %v1023_v24 = vpop.permute.xlu0 %1022  ;;  %v1053_v25 = vpop.permute.xlu1 %1052 }
 0x73a   : > { %1026 = vst.msk [vmem:[#allocation2] sm:$0x1f] %vm1025_vm5, %v1023_v24 }
 0x73b   : > { %1055 = vst.msk [vmem:[#allocation3] sm:$0x1f] %vm1046_vm7, %v1053_v25 }
 0x73c   : > { %1042 = vst.msk [vmem:[#allocation2] sm:$0x1f] %vm1041_vm6, %v1039_v21 }
 0x73d   : > { %1069 = vst.msk [vmem:[#allocation3] sm:$0x1f] %vm1059_vm8, %v1067_v20  ;;  %v1044_v26 = vpop.permute.xlu0 %1043  ;;  %v1071_v27 = vpop.permute.xlu1 %1070 }
 0x73e   : > { %1047 = vst.msk [vmem:[#allocation2] sm:$0x1f] %vm1046_vm7, %v1044_v26 }
 0x73f   : > { %1073 = vst.msk [vmem:[#allocation3] sm:$0x1f] %vm1064_vm9, %v1071_v27 }
 0x740   : > { %1087 = vst.msk [vmem:[#allocation3] sm:$0x1f] %vm1077_vm10, %v1085_v22 }
 0x741   : > { %v1089_v28 = vpop.permute.xlu1 %1088  ;;  %v1062_v29 = vpop.permute.xlu0 %1061 }
 0x742   : > { %1091 = vst.msk [vmem:[#allocation3] sm:$0x1f] %vm1082_vm11, %v1089_v28 }
 0x745   : > { %v1057_v30 = vpop.permute.xlu1 %1056  ;;  %v1080_v34 = vpop.permute.xlu0 %1079 }
 0x746   : > { %1060 = vst.msk [vmem:[#allocation2] sm:$0x1f] %vm1059_vm8, %v1057_v30  ;;  %vm1161_vm8 = vcmask 39936  }
 0x747   : > { %1065 = vst.msk [vmem:[#allocation2] sm:$0x1f] %vm1064_vm9, %v1062_v29 }
 0x749   : > { %v1075_v31 = vpop.permute.xlu1 %1074  ;;  %v1214_v32 = vld [vmem:[#allocation3] sm:$0x1f] }
 0x74a   : > { %v1093_v33 = vld [vmem:[#allocation3] sm:$0x1f]  ;;  %1078 = vst.msk [vmem:[#allocation2] sm:$0x1f] %vm1077_vm10, %v1075_v31  ;;  %v1216_v35 = vpack.c.bf16 %v1214_v32, %v1214_v32 }
 0x74b   : > { %v1095_v36 = vpack.c.bf16 %v1093_v33, %v1093_v33  ;;  %1083 = vst.msk [vmem:[#allocation2] sm:$0x1f] %vm1082_vm11, %v1080_v34  ;;  %v1336_v37 = vld [vmem:[#allocation3] sm:$0x1f] }
 0x74c   : > { %1221 = vrot.lane.b32.xlu1 %v1216_v35, %s3508_s24  ;;  %v1338_v39 = vpack.c.bf16 %v1336_v37, %v1336_v37  ;;  %v1458_v40 = vld [vmem:[#allocation3] sm:$0x1f] }
 0x74d   : > { %v1101_v38 = vsel %vm1096_vm12, %v1095_v36, 0  ;;  %v1460_v41 = vpack.c.bf16 %v1458_v40, %v1458_v40 }
 0x74e   : > { %2634 = vmatpush3.bf16.xpose.msra.mxu1 %v1101_v38 }
 0x74f   : > { %2645 = vmatprep.subr.bf16.mxu1 %v3504_v8 }
 0x750   : > { %1343 = vrot.lane.b32.xlu1 %v1338_v39, %s3507_s21 }
 0x752   : > { %v1213_v42 = vld [vmem:[#allocation2] sm:$0x1f] }
 0x753   : > { %v1092_v43 = vld [vmem:[#allocation2] sm:$0x1f]  ;;  %v1215_v45 = vpack.c.bf16 %v1213_v42, %v1213_v42 }
 0x754   : > { %v1094_v46 = vpack.c.bf16 %v1092_v43, %v1092_v43  ;;  %1465 = vrot.lane.b32.xlu1 %v1460_v41, %s3514_s3  ;;  %v1335_v47 = vld [vmem:[#allocation2] sm:$0x1f]  ;;  %v3519_v41 = vmov 65535  }
 0x755   : > { %1218 = vrot.lane.b32.xlu0 %v1215_v45, %s3508_s24  ;;  %v1337_v48 = vpack.c.bf16 %v1335_v47, %v1335_v47  ;;  %v1457_v49 = vld [vmem:[#allocation2] sm:$0x1f]  ;;  %s3518_s24 = smov 48   ;;  %v1167_v42 = vsel %vm1165_vm14, 4294967295, %v3519_v41  ;;  %v2945_v41 = vld [vmem:[#allocation21 + $0x8] sm:$0xff]  }
 0x756   : > { %2636 = vmatmul.mubr.msk.bf16.vlgmr.msra.gmra.mrb[8].mxu1 %vm1096_vm12, %v1094_v46  ;;  %v1459_v50 = vpack.c.bf16 %v1457_v49, %v1457_v49  ;;  %v1168_v45 = vsel %vm1166_vm15, %v1167_v42, 0 }
 0x757   : > { %2647 = vmatprep.mubr.msk.bf16.mxu1 %vm3505_vm1, %v3504_v8 }
 0x759   : > { %1340 = vrot.lane.b32.xlu0 %v1337_v48, %s3507_s21  ;;  %s3517_s21 = smov 40  }
 0x75d   : > { %1462 = vrot.lane.b32.xlu0 %v1459_v50, %s3514_s3  ;;  %s4330_s3 = sld [smem:[#allocation46_spill]] }
 0x7be   : > { %v1222_v51 = vpop.permute.xlu1 %1221 }
 0x7bf   : > { %v1227_v52 = vsel %vm1096_vm12, %v1222_v51, 0 }
 0x7c0   : > { %2646 = vmatpush3.bf16.xpose.msra.mxu1 %v1227_v52 }
 0x7c1   : > { %2657 = vmatprep.subr.bf16.mxu1 %v3504_v8 }
 0x7c2   : > { %v1344_v53 = vpop.permute.xlu1 %1343 }
 0x7c3   : > { %v1349_v55 = vsel %vm1096_vm12, %v1344_v53, 0 }
 0x7c6   : > { %v1466_v56 = vpop.permute.xlu1 %1465 }
 0x7c7   : > { %v1219_v54 = vpop.permute.xlu0 %1218  ;;  %v1471_v58 = vsel %vm1096_vm12, %v1466_v56, 0 }
 0x7c8   : > { %2648 = vmatmul.mubr.msk.bf16.vlgmr.msra.gmra.mrb[12].mxu1 %vm1096_vm12, %v1219_v54 }
 0x7c9   : > { %2658 = vmatpush3.bf16.xpose.msra.mxu1 %v1349_v55  ;;  %2659 = vmatprep.mubr.msk.bf16.mxu1 %vm3505_vm1, %v3504_v8 }
 0x7ca   : > { %2669 = vmatprep.subr.bf16.mxu1 %v3504_v8 }
 0x7cb   : > { %v1341_v57 = vpop.permute.xlu0 %1340 }
 0x7cf   : > { %v1463_v59 = vpop.permute.xlu0 %1462 }
 0x7d0   : > { %2660 = vmatmul.mubr.msk.bf16.vlgmr.msra.gmra.mrb[16].mxu1 %vm1096_vm12, %v1341_v57 }
 0x7d1   : > { %2670 = vmatpush3.bf16.xpose.msra.mxu1 %v1471_v58  ;;  %2671 = vmatprep.mubr.msk.bf16.mxu1 %vm3505_vm1, %v3504_v8 }
 0x7d2   : > { %2681 = vmatprep.subr.bf16.mxu1 %v3504_v8 }
 0x7d8   : > { %2672 = vmatmul.mubr.msk.bf16.vlgmr.msra.gmra.mrb[20].mxu1 %vm1096_vm12, %v1463_v59 }
 0x7d9   : > { %2685 = vmatprep.mubr.msk.bf16.mxu1 %vm3505_vm1, %v3504_v8 }
 0x829   : > { %v1137_v60 = vpop.f32.mrb[8].mxu1 }
 0x82a   : > { %v2637_v61 = vpop.f32.mrb[9].mxu1  ;;  %v1144_v62 = vsel %vm1143_vm13, %v1137_v60, -inf }
 0x82b   : > { %1145 = vmax.xlane.f32.xlu1 %v1144_v62  ;;  %v1140_v63 = vpop.f32.mrb[10].mxu1 }
 0x82c   : > { %v2638_v0 = vpop.f32.mrb[11].mxu1 }
 0x89b   : > { %v1263_v1 = vpop.f32.mrb[12].mxu1 }
 0x89c   : > { %v2649_v2 = vpop.f32.mrb[13].mxu1  ;;  %v1269_v3 = vsel %vm1143_vm13, %v1263_v1, -inf }
 0x89d   : > { %1270 = vmax.xlane.f32.xlu0 %v1269_v3  ;;  %v1266_v4 = vpop.f32.mrb[14].mxu1 }
 0x89e   : > { %v2650_v5 = vpop.f32.mrb[15].mxu1 }
 0x8a3   : > { %v1385_v7 = vpop.f32.mrb[16].mxu1 }
 0x8a4   : > { %v2661_v9 = vpop.f32.mrb[17].mxu1  ;;  %v1391_v10 = vsel %vm1143_vm13, %v1385_v7, -inf }
 0x8a5   : > { %1392 = vmax.xlane.f32.xlu0 %v1391_v10  ;;  %v1388_v11 = vpop.f32.mrb[18].mxu1 }
 0x8a6   : > { %v2662_v12 = vpop.f32.mrb[19].mxu1 }
 0x8a7   : > { %v2940_v12 = vld [vmem:[#allocation18] sm:$0xff]  }
 0x8a8   : > { %2682 = vmatpush3.bf16.msra.mxu1 %v2940_v12 }
 0x8a9   : > { %2683 = vmatprep.subr.bf16.mxu1 %v3504_v8 }
 0x8ab   : > { %v1507_v13 = vpop.f32.mrb[20].mxu1 }
 0x8ac   : > { %v2673_v14 = vpop.f32.mrb[21].mxu1  ;;  %v1513_v15 = vsel %vm1143_vm13, %v1507_v13, -inf }
 0x8ad   : > { %1514 = vmax.xlane.f32.xlu0 %v1513_v15  ;;  %v1510_v16 = vpop.f32.mrb[22].mxu1 }
 0x8ae   : > { %v2674_v17 = vpop.f32.mrb[23].mxu1 }
 0x8b8   : > { %v1146_v18 = vpop.xlane.xlu1 %1145 }
 0x8b9   : > { %v1147_v19 = vsub.f32 %v1137_v60, %v1146_v18 }
 0x8bb   : > { %v1148_v20 = vmul.f32 1.442695, %v1147_v19 }
 0x8bd   : > { %2962 = vpow2.f32 %v1148_v20 }
 0x8c7   : > { %v2963_v21 = vpop.eup %2962 }
 0x8c8   : > { %v1150_v22 = vsel %vm1143_vm13, %v2963_v21, 0.0 }
 0x8c9   : > { %1151 = vadd.xlane.f32.xlu1 %v1150_v22 }
 0x8da   : > { %1282 = vrot.lane.b32.xlu1 %v1157_v23, %s3515_s14 }
 0x92a   : > { %v1271_v24 = vpop.xlane.xlu0 %1270 }
 0x92b   : > { %v1272_v25 = vsub.f32 %v1263_v1, %v1271_v24 }
 0x92d   : > { %v1273_v26 = vmul.f32 1.442695, %v1272_v25 }
 0x92f   : > { %2964 = vpow2.f32 %v1273_v26 }
 0x932   : > { %v1393_v27 = vpop.xlane.xlu0 %1392 }
 0x933   : > { %v1394_v28 = vsub.f32 %v1385_v7, %v1393_v27 }
 0x935   : > { %v1395_v29 = vmul.f32 1.442695, %v1394_v28  ;;  %v2497_v28 = vld [vmem:[#allocation11 + $0x9] ss:$0 sm:$0xff] }
 0x937   : > { %2966 = vpow2.f32 %v1395_v29 }
 0x939   : > { %v2965_v30 = vpop.eup %2964 }
 0x93a   : > { %v1515_v31 = vpop.xlane.xlu0 %1514  ;;  %v1275_v32 = vsel %vm1143_vm13, %v2965_v30, 0.0 }
 0x93b   : > { %v1516_v33 = vsub.f32 %v1507_v13, %v1515_v31  ;;  %1276 = vadd.xlane.f32.xlu0 %v1275_v32  ;;  %v2941_v13 = vld [vmem:[#allocation18 + $0x8] sm:$0xff]  }
 0x93c   : > { %2684 = vmatpush3.bf16.msra.mxu1 %v2941_v13 }
 0x93d   : > { %v1517_v34 = vmul.f32 1.442695, %v1516_v33  ;;  %2697 = vmatprep.subr.bf16.mxu1 %v3504_v8 }
 0x93f   : > { %2968 = vpow2.f32 %v1517_v34 }
 0x941   : > { %v2967_v35 = vpop.eup %2966 }
 0x942   : > { %v1397_v6 = vsel %vm1143_vm13, %v2967_v35, 0.0 }
 0x943   : > { %1398 = vadd.xlane.f32.xlu1 %v1397_v6 }
 0x949   : > { %v2969_v36 = vpop.eup %2968 }
 0x94a   : > { %v1519_v37 = vsel %vm1143_vm13, %v2969_v36, 0.0 }
 0x94b   : > { %1520 = vadd.xlane.f32.xlu1 %v1519_v37 }
 0x951   : > { %1159 = vrot.lane.b32.xlu0 %v1157_v23, %s3516_s22  ;;  %s2222_s22 = scalar_lea.sflag [#allocation8], %s3997_s27 }
 0x955   : > { %1526 = vrot.lane.b32.xlu0 %v1157_v23, %s3517_s21 }
 0x956   : > { %v1152_v38 = vpop.xlane.xlu1 %1151 }
 0x957   : > { %2970 = vrcp.f32 %v1152_v38 }
 0x95a   : > { %v1283_v46 = vpop.permute.xlu1 %1282 }
 0x95b   : > { %v1288_v51 = vand.u32 %v1283_v46, %v1168_v45 }
 0x95c   : > { %1404 = vrot.lane.b32.xlu1 %v1157_v23, %s3518_s24 }
 0x961   : > { %v2971_v40 = vpop.eup %2970 }
 0x962   : > { %v1155_v43 = vmul.f32 %v2971_v40, %v2963_v21  ;;  %v2943_v40 = vld [vmem:[#allocation21] sm:$0xff]  }
 0x964   : > { %v1156_v50 = vpack.c.bf16 %v1155_v43, %v1155_v43 }
 0x9c8   : > { %v1277_v39 = vpop.xlane.xlu0 %1276 }
 0x9c9   : > { %2972 = vrcp.f32 %v1277_v39  ;;  %v2942_v39 = vld [vmem:[#allocation20] sm:$0xff]  }
 0x9cc   : > { %v1160_v47 = vpop.permute.xlu0 %1159 }
 0x9cd   : > { %v1170_v48 = vand.u32 %v1168_v45, %v1160_v47  ;;  %v2498_v47 = vld [vmem:[#allocation11 + $0xa] ss:$0 sm:$0xff] }
 0x9cf   : > { %2640 = vmatpush3.bf16.msra.mxu0 %v1170_v48 }
 0x9d0   : > { %v1399_v49 = vpop.xlane.xlu1 %1398  ;;  %2651 = vmatprep.subr.bf16.mxu0 %v3504_v8  ;;  %v1527_v60 = vpop.permute.xlu0 %1526 }
 0x9d1   : > { %2974 = vrcp.f32 %v1399_v49  ;;  %v1532_v62 = vand.u32 %v1527_v60, %v1168_v45  ;;  %v2499_v49 = vld [vmem:[#allocation11 + $0xb] ss:$0 sm:$0xff] }
 0x9d2   : > { %2642 = vmatmul.mubr.msk.bf16.vlgmr.msra.gmra.mrb[8].mxu0 %vm1161_vm8, %v1156_v50 }
 0x9d3   : > { %v2973_v52 = vpop.eup %2972  ;;  %2652 = vmatpush3.bf16.msra.mxu0 %v1288_v51  ;;  %2653 = vmatprep.mubr.msk.bf16.mxu0 %vm3505_vm1, %v3504_v8 }
 0x9d4   : > { %v1280_v53 = vmul.f32 %v2973_v52, %v2965_v30  ;;  %2663 = vmatprep.subr.bf16.mxu0 %v3504_v8 }
 0x9d6   : > { %v1281_v55 = vpack.c.bf16 %v1280_v53, %v1280_v53  ;;  %v2946_v53 = vld [vmem:[#allocation23] sm:$0xff]  }
 0x9d8   : > { %v1521_v54 = vpop.xlane.xlu1 %1520 }
 0x9d9   : > { %2976 = vrcp.f32 %v1521_v54  ;;  %v2947_v54 = vld [vmem:[#allocation23 + $0x8] sm:$0xff]  }
 0x9da   : > { %2654 = vmatmul.mubr.msk.bf16.vlgmr.msra.gmra.mrb[12].mxu0 %vm1161_vm8, %v1281_v55  ;;  %v2504_v55 = vld [vmem:[#allocation11 + $0xd] ss:$0 sm:$0xff] }
 0x9db   : > { %v2975_v56 = vpop.eup %2974  ;;  %2665 = vmatprep.mubr.msk.bf16.mxu0 %vm3505_vm1, %v3504_v8 }
 0x9dc   : > { %v1402_v57 = vmul.f32 %v2975_v56, %v2967_v35  ;;  %v1405_v58 = vpop.permute.xlu1 %1404 }
 0x9dd   : > { %v1410_v59 = vand.u32 %v1405_v58, %v1168_v45 }
 0x9de   : > { %v1403_v61 = vpack.c.bf16 %v1402_v57, %v1402_v57 }
 0x9df   : > { %2664 = vmatpush3.bf16.msra.mxu0 %v1410_v59 }
 0x9e0   : > { %2675 = vmatprep.subr.bf16.mxu0 %v3504_v8 }
 0x9e2   : > { %2666 = vmatmul.mubr.msk.bf16.vlgmr.msra.gmra.mrb[16].mxu0 %vm1161_vm8, %v1403_v61 }
 0x9e3   : > { %v2977_v63 = vpop.eup %2976  ;;  %2676 = vmatpush3.bf16.msra.mxu0 %v1532_v62  ;;  %2677 = vmatprep.mubr.msk.bf16.mxu0 %vm3505_vm1, %v3504_v8 }
 0x9e4   : > { %v1524_v0 = vmul.f32 %v2977_v63, %v2969_v36  ;;  %2689 = vmatprep.subr.bf16.mxu0 %v3504_v8 }
 0x9e6   : > { %v1525_v1 = vpack.c.bf16 %v1524_v0, %v1524_v0 }
 0x9ea   : > { %2678 = vmatmul.mubr.msk.bf16.vlgmr.msra.gmra.mrb[20].mxu0 %vm1161_vm8, %v1525_v1 }
 0x9eb   : > { %2693 = vmatprep.mubr.msk.bf16.mxu0 %vm3505_vm1, %v3504_v8  ;;  %2690 = vmatpush3.bf16.msra.mxu0 %v2942_v39  ;;  %v2516_v39 = vld [vmem:[#allocation27 + $0x8] ss:$0 sm:$0xff] }
 0x9ec   : > { %2691 = vmatprep.subr.bf16.mxu0 %v3504_v8 }
 0xaa5   : > { %v1206_v2 = vpop.f32.mrb[8].mxu0 }
 0xaa6   : > { %1212 = vst.msk [vmem:[#allocation4] sm:$0x1f] %vm1019_vm4, %v1206_v2  ;;  %v2643_v3 = vpop.f32.mrb[9].mxu0  ;;  %vm1806_vm4 = vcmask 260096  }
 0xaa7   : > { %v1209_v4 = vpop.f32.mrb[10].mxu0  ;;  %1807 = vst.msk [vmem:[#allocation5 + $0xd] sm:$0x7f] %vm1806_vm4, %v3504_v8 }
 0xaa8   : > { %v2644_v5 = vpop.f32.mrb[11].mxu0 }
 0xaa9   : > { %v2500_v5 = vld [vmem:[#allocation11 + $0xc] ss:$0 sm:$0xff] }
 0xaad   : > { %v1324_v7 = vpop.f32.mrb[12].mxu0 }
 0xaae   : > { %1331 = vrot.lane.b32.xlu1 %v1324_v7, %s3509_s23  ;;  %v2655_v9 = vpop.f32.mrb[13].mxu0  ;;  %v2508_v7 = vld [vmem:[#allocation27] ss:$0 sm:$0xff]  ;;  %s2544_s23 = sshll.u32 %s4315_s25, 7  ;;  %s3394_s25 = sshll.u32 %s3520_s28, 4  ;;  %s3395_s25 = int_to_ptr.vmem [resolvable:$false] %s3394_s25 }
 0xaaf   : > { %v1327_v10 = vpop.f32.mrb[14].mxu0  ;;  %v1810_v9 = vld [vmem:[#allocation5 + $0x1] sm:$0x1f]  ;;  %s4214_s14 = scalar_lea.hbm %s4330_s3, %s2544_s23  ;;  %s3396_s24 = scalar_lea.vmem %s3395_s25, 256 }
 0xab0   : > { %v2656_v11 = vpop.f32.mrb[15].mxu0  ;;  %v2509_v10 = vld [vmem:[#allocation27 + $0x1] ss:$0 sm:$0xff] }
 0xab1   : > { %v1818_v11 = vld [vmem:[#allocation5 + $0x2] sm:$0x1f] }
 0xab5   : > { %v1446_v14 = vpop.f32.mrb[16].mxu0 }
 0xab6   : > { %1453 = vrot.lane.b32.xlu0 %v1446_v14, %s3511_s19  ;;  %v2667_v15 = vpop.f32.mrb[17].mxu0  ;;  %s2235_s19 = sshll.u32 %s669_s5, 4  ;;  %s4216_s19 = int_to_ptr.vmem [resolvable:$true] %s2235_s19 }
 0xab7   : > { %v1449_v16 = vpop.f32.mrb[18].mxu0  ;;  %v1815_v15 = vmul.f32 %v2508_v7, %v1810_v9  ;;  %v2524_v9 = vld [vmem:[#allocation11 + $0xf] ss:$0 sm:$0xff]  ;;  %s3390_s21 = scalar_lea.vmem %s4216_s19, 128  ;;  %p3397_p10 = scmp.lt.s32.totalorder %s4216_s19, %s3395_s25 }
 0xab8   : > { %v2668_v17 = vpop.f32.mrb[19].mxu0  ;;  %v1823_v16 = vmul.f32 %v2509_v10, %v1818_v11  ;;  %p3391_p6 = scmp.ne.s32.totalorder %s4216_s19, %s3390_s21  ;;  %p3398_p12 = scmp.lt.s32.totalorder %s3396_s24, %s3390_s21 }
 0xab9   : > { %v2510_v17 = vld [vmem:[#allocation27 + $0x2] ss:$0 sm:$0xff] }
 0xaba   : > { %p3392_p2 = pnand %p3391_p6, %p4331_p0  ;;  %p3399_p11 = por %p3398_p12, %p3397_p10 }
 0xabc   : > { %p3393_p8 = pneg %p3392_p2 }
 0xabd   : > { %v1568_v18 = vpop.f32.mrb[20].mxu0 }
 0xabe   : > { %1575 = vrot.lane.b32.xlu1 %v1568_v18, %s3512_s20  ;;  %v2679_v19 = vpop.f32.mrb[21].mxu0  ;;  %v1826_v18 = vld [vmem:[#allocation5 + $0x3] sm:$0x1f]  ;;  %p3400_p13 = pnand %p3399_p11, %p3393_p8 }
 0xabf   : > { %v1571_v20 = vpop.f32.mrb[22].mxu0  ;;  %v1824_v19 = vadd.f32 %v1823_v16, %v1815_v15 }
 0xac0   : > { %v2680_v21 = vpop.f32.mrb[23].mxu0  ;;  %v1831_v20 = vmul.f32 %v2510_v17, %v1826_v18 }
 0xac1   : > { %v2511_v21 = vld [vmem:[#allocation27 + $0x3] ss:$0 sm:$0xff] }
 0xb20   : > { %v1332_v22 = vpop.permute.xlu1 %1331 }
 0xb21   : > { %1334 = vst.msk [vmem:[#allocation4] sm:$0x1f] %vm1025_vm5, %v1332_v22  ;;  %v1832_v22 = vadd.f32 %v1831_v20, %v1824_v19  ;;  %v2528_v20 = vld [vmem:[#allocation11 + $0x10] ss:$0 sm:$0xff] }
 0xb28   : > { %v1454_v23 = vpop.permute.xlu0 %1453 }
 0xb29   : > { %1456 = vst.msk [vmem:[#allocation4] sm:$0x1f] %vm1041_vm6, %v1454_v23 }
 0xb30   : > { %v1576_v24 = vpop.permute.xlu1 %1575 }
 0xb31   : > { %1578 = vst.msk [vmem:[#allocation4] sm:$0x1f] %vm1046_vm7, %v1576_v24  ;;  %v2512_v24 = vld [vmem:[#allocation27 + $0x4] ss:$0 sm:$0xff] }
 0xb38   : > { %v1579_v25 = vld [vmem:[#allocation4] sm:$0x1f] }
 0xb39   : > { %v1580_v26 = vpack.c.bf16 %v1579_v25, %v1579_v25 }
 0xb3b   : > { %2686 = vmatmul.mubr.msk.bf16.vlgmr.msra.gmra.mrb[24].mxu1 %vm721_vm2, %v1580_v26 }
 0xb3c   : > { %2701 = vmatprep.mubr.msk.bf16.mxu1 %vm3505_vm1, %v3504_v8  ;;  %2698 = vmatpush3.bf16.msra.mxu1 %v2943_v40 }
 0xb3d   : > { %2699 = vmatprep.subr.bf16.mxu1 %v3504_v8 }
 0xb40   : > { %2700 = vmatpush3.bf16.msra.mxu1 %v2945_v41 }
 0xb41   : > { %2713 = vmatprep.subr.bf16.mxu1 %v3504_v8 }
 0xc0e   : > { %v1634_v27 = vpop.f32.mrb[24].mxu1 }
 0xc0f   : > { %v1640_v29 = vadd.f32 %v1634_v27, %v4062_v44  ;;  %v2687_v30 = vpop.f32.mrb[25].mxu1  ;;  %v2944_v44 = vld [vmem:[#allocation20 + $0x8] sm:$0xff]   ;;  %v2513_v27 = vld [vmem:[#allocation27 + $0x5] ss:$0 sm:$0xff] }
 0xc10   : > { %v1637_v31 = vpop.f32.mrb[26].mxu1  ;;  %2692 = vmatpush3.bf16.msra.mxu0 %v2944_v44 }
 0xc11   : > { %v4174_v32 = vadd.f32 %v2497_v28, %v1640_v29  ;;  %v2688_v33 = vpop.f32.mrb[27].mxu1  ;;  %2705 = vmatprep.subr.bf16.mxu0 %v3504_v8  ;;  %v2514_v31 = vld [vmem:[#allocation27 + $0x6] ss:$0 sm:$0xff] }
 0xc13   : > { %v1647_v34 = vsel %vm672_vm0, %v4174_v32, 0.0 }
 0xc14   : > { %1648 = vadd.xlane.f32.xlu0 %v1647_v34 }
 0xca1   : > { %v1649_v35 = vpop.xlane.xlu0 %1648 }
 0xca2   : > { %v1650_v6 = vmul.f32 0.03125, %v1649_v35 }
 0xca4   : > { %v1651_v36 = vsub.f32 %v4174_v32, %v1650_v6  ;;  %v2515_v6 = vld [vmem:[#allocation27 + $0x7] ss:$0 sm:$0xff] }
 0xca6   : > { %v1652_v37 = vmul.f32 %v1651_v36, %v1651_v36 }
 0xca8   : > { %v1653_v38 = vsel %vm672_vm0, %v1652_v37, 0.0 }
 0xca9   : > { %1654 = vadd.xlane.f32.xlu1 %v1653_v38 }
 0xd36   : > { %v1655_v42 = vpop.xlane.xlu1 %1654 }
 0xd37   : > { %v1656_v43 = vmul.f32 0.03125, %v1655_v42  ;;  %v2517_v42 = vld [vmem:[#allocation27 + $0x9] ss:$0 sm:$0xff] }
 0xd39   : > { %v1657_v45 = vadd.f32 1e-05, %v1656_v43 }
 0xd3b   : > { %2978 = vrsqrt.f32 %v1657_v45 }
 0xd45   : > { %v2979_v46 = vpop.eup %2978 }
 0xd46   : > { %v1659_v48 = vmul.f32 %v2979_v46, %v1651_v36 }
 0xd48   : > { %v1665_v50 = vmul.f32 %v2498_v47, %v1659_v48  ;;  %v2518_v47 = vld [vmem:[#allocation27 + $0xa] ss:$0 sm:$0xff] }
 0xd4a   : > { %v1671_v51 = vadd.f32 %v2499_v49, %v1665_v50 }
 0xd4c   : > { %v1672_v52 = vpack.c.bf16 %v1671_v51, %v1671_v51  ;;  %v2519_v51 = vld [vmem:[#allocation27 + $0xb] ss:$0 sm:$0xff] }
 0xd4e   : > { %2694 = vmatmul.mubr.msk.bf16.vlgmr.msra.gmra.mrb[24].mxu0 %vm721_vm2, %v1672_v52  ;;  %2702 = vmatmul.mubr.msk.bf16.vlgmr.msra.gmra.mrb[28].mxu1 %vm721_vm2, %v1672_v52 }
 0xd4f   : > { %2709 = vmatprep.mubr.msk.bf16.mxu0 %vm3505_vm1, %v3504_v8  ;;  %2717 = vmatprep.mubr.msk.bf16.mxu1 %vm3505_vm1, %v3504_v8 }
 0xd50   : > { %2706 = vmatpush3.bf16.msra.mxu0 %v2946_v53  ;;  %v2520_v53 = vld [vmem:[#allocation27 + $0xc] ss:$0 sm:$0xff] }
 0xd51   : > { %2707 = vmatprep.subr.bf16.mxu0 %v3504_v8 }
 0xd54   : > { %2708 = vmatpush3.bf16.msra.mxu0 %v2947_v54  ;;  %v1906_v54 = vld [vmem:[#allocation5 + $0xd] sm:$0x1f] }
 0xd55   : > { %2721 = vmatprep.subr.bf16.mxu0 %v3504_v8 }
 0xe21   : > { %v1731_v56 = vpop.f32.mrb[24].mxu0  ;;  %v1792_v57 = vpop.f32.mrb[28].mxu1 }
 0xe22   : > { %v1793_v58 = vadd.f32 %v2504_v55, %v1792_v57  ;;  %v2695_v59 = vpop.f32.mrb[25].mxu0  ;;  %v2703_v60 = vpop.f32.mrb[29].mxu1  ;;  %v1732_v12 = vadd.f32 %v2500_v5, %v1731_v56  ;;  %v2521_v57 = vld [vmem:[#allocation27 + $0xd] ss:$0 sm:$0xff]  ;;  %v2523_v5 = vld [vmem:[#allocation11 + $0xe] ss:$0 sm:$0xff] }
 0xe23   : > { %v1734_v61 = vpop.f32.mrb[26].mxu0  ;;  %v1795_v62 = vpop.f32.mrb[30].mxu1 }
 0xe24   : > { %v1798_v63 = vsub.f32 0.0, %v1793_v58  ;;  %v2696_v0 = vpop.f32.mrb[27].mxu0  ;;  %v2704_v1 = vpop.f32.mrb[31].mxu1  ;;  %v1914_v58 = vld [vmem:[#allocation5 + $0xe] sm:$0x1f]  ;;  %v1911_v61 = vmul.f32 %v2520_v53, %v1906_v54 }
 0xe25   : > { %v2522_v62 = vld [vmem:[#allocation27 + $0xe] ss:$0 sm:$0xff]  ;;  %v1919_v1 = vmul.f32 %v2521_v57, %v1914_v58 }
 0xe26   : > { %v1799_v2 = vmul.f32 1.442695, %v1798_v63  ;;  %v1922_v63 = vld [vmem:[#allocation5 + $0xf] sm:$0x1f] }
 0xe28   : > { %2980 = vpow2.f32 %v1799_v2 }
 0xe32   : > { %v2981_v3 = vpop.eup %2980 }
 0xe33   : > { %v1801_v4 = vadd.f32 1.0, %v2981_v3  ;;  %v1927_v3 = vmul.f32 %v2522_v62, %v1922_v63 }
 0xe35   : > { %2982 = vrcp.f32 %v1801_v4 }
 0xe3f   : > { %v2983_v13 = vpop.eup %2982 }
 0xe40   : > { %v1804_v14 = vmul.f32 %v2983_v13, %v1732_v12 }
 0xe42   : > { %1808 = vst.msk [vmem:[#allocation5 + $0x8] sm:$0x1f] %vm672_vm0, %v1804_v14 }
 0xe49   : > { %v1834_v23 = vld [vmem:[#allocation5 + $0x4] sm:$0x1f]  ;;  %v1874_v40 = vld [vmem:[#allocation5 + $0x9] sm:$0x1f] }
 0xe4a   : > { %v1842_v25 = vld [vmem:[#allocation5 + $0x5] sm:$0x1f]  ;;  %v1839_v26 = vmul.f32 %v2511_v21, %v1834_v23  ;;  %v1882_v43 = vld [vmem:[#allocation5 + $0xa] sm:$0x1f]  ;;  %v1879_v46 = vmul.f32 %v2516_v39, %v1874_v40  ;;  %v2530_v39 = vld [vmem:[#allocation11 + $0x12] ss:$0 sm:$0xff] }
 0xe4b   : > { %v1850_v28 = vld [vmem:[#allocation5 + $0x6] sm:$0x1f]  ;;  %v1847_v30 = vmul.f32 %v2512_v24, %v1842_v25  ;;  %v1890_v48 = vld [vmem:[#allocation5 + $0xb] sm:$0x1f]  ;;  %v1887_v50 = vmul.f32 %v2517_v42, %v1882_v43  ;;  %v2951_v43 = vld [vmem:[#allocation26 + $0x8] sm:$0xff]  }
 0xe4c   : > { %v1840_v29 = vadd.f32 %v1839_v26, %v1832_v22  ;;  %v1858_v33 = vld [vmem:[#allocation5 + $0x7] sm:$0x1f]  ;;  %v1855_v35 = vmul.f32 %v2513_v27, %v1850_v28  ;;  %v1898_v52 = vld [vmem:[#allocation5 + $0xc] sm:$0x1f]  ;;  %v1895_v56 = vmul.f32 %v2518_v47, %v1890_v48  ;;  %v2531_v47 = vld [vmem:[#allocation11 + $0x13] ss:$0 sm:$0xff] }
 0xe4d   : > { %v1866_v36 = vld [vmem:[#allocation5 + $0x8] sm:$0x1f]  ;;  %v1863_v38 = vmul.f32 %v2514_v31, %v1858_v33  ;;  %v1903_v60 = vmul.f32 %v2519_v51, %v1898_v52  ;;  %v2948_v33 = vld [vmem:[#allocation24] sm:$0xff]  }
 0xe4e   : > { %v1848_v34 = vadd.f32 %v1847_v30, %v1840_v29  ;;  %v1871_v41 = vmul.f32 %v2515_v6, %v1866_v36  ;;  %2714 = vmatpush3.bf16.msra.mxu1 %v2948_v33  ;;  %v2950_v42 = vld [vmem:[#allocation26] sm:$0xff]  }
 0xe4f   : > { %2715 = vmatprep.subr.bf16.mxu1 %v3504_v8 }
 0xe50   : > { %v1856_v37 = vadd.f32 %v1855_v35, %v1848_v34  ;;  %v2949_v34 = vld [vmem:[#allocation24 + $0x8] sm:$0xff]  }
 0xe52   : > { %v1864_v44 = vadd.f32 %v1863_v38, %v1856_v37  ;;  %2716 = vmatpush3.bf16.msra.mxu1 %v2949_v34  ;;  %v2529_v37 = vld [vmem:[#allocation11 + $0x11] ss:$0 sm:$0xff] }
 0xe54   : > { %v1872_v45 = vadd.f32 %v1871_v41, %v1864_v44 }
 0xe56   : > { %v1880_v49 = vadd.f32 %v1879_v46, %v1872_v45  ;;  %v2952_v45 = vld [vmem:[#allocation26 + $0x10] sm:$0xff]   ;;  %v2953_v46 = vld [vmem:[#allocation26 + $0x18] sm:$0xff]  }
 0xe58   : > { %v1888_v55 = vadd.f32 %v1887_v50, %v1880_v49 }
 0xe5a   : > { %v1896_v59 = vadd.f32 %v1895_v56, %v1888_v55 }
 0xe5c   : > { %v1904_v0 = vadd.f32 %v1903_v60, %v1896_v59 }
 0xe5e   : > { %v1912_v2 = vadd.f32 %v1911_v61, %v1904_v0 }
 0xe60   : > { %v1920_v4 = vadd.f32 %v1919_v1, %v1912_v2 }
 0xe62   : > { %v1928_v7 = vadd.f32 %v1927_v3, %v1920_v4 }
 0xe64   : > { %v1934_v10 = vmul.f32 %v2523_v5, %v1928_v7 }
 0xe66   : > { %v1940_v11 = vadd.f32 %v2524_v9, %v1934_v10 }
 0xe68   : > { %v1941_v12 = vsub.f32 0.0, %v1940_v11 }
 0xe6a   : > { %v1942_v13 = vmul.f32 1.442695, %v1941_v12 }
 0xe6c   : > { %2984 = vpow2.f32 %v1942_v13 }
 0xe76   : > { %v2985_v14 = vpop.eup %2984 }
 0xe77   : > { %v1944_v15 = vadd.f32 1.0, %v2985_v14 }
 0xe79   : > { %2986 = vrcp.f32 %v1944_v15  ;;  %v2541_v15 = vld [vmem:[#allocation11 + $0x15] ss:$0 sm:$0xff] }
 0xe83   : > { %v2987_v16 = vpop.eup %2986 }
 0xe84   : > { %v1947_v17 = vmul.f32 %v2987_v16, %v1940_v11 }
 0xe86   : > { %v1948_v18 = vpack.c.bf16 %v1947_v17, %v1947_v17  ;;  %v2542_v17 = vld [vmem:[#allocation11 + $0x16] ss:$0 sm:$0xff] }
 0xe88   : > { %2710 = vmatmul.mubr.msk.bf16.vlgmr.msra.gmra.mrb[28].mxu0 %vm721_vm2, %v1948_v18 }
 0xe89   : > { %2729 = vmatprep.mubr.msk.bf16.mxu0 %vm3505_vm1, %v3504_v8  ;;  %2722 = vmatpush3.bf16.msra.mxu0 %v2950_v42 }
 0xe8a   : > { %2723 = vmatprep.subr.bf16.mxu0 %v3504_v8 }
 0xe8d   : > { %2724 = vmatpush3.bf16.msra.mxu0 %v2951_v43 }
 0xe8e   : > { %2725 = vmatprep.subr.bf16.mxu0 %v3504_v8 }
 0xe91   : > { %2726 = vmatpush3.bf16.msra.mxu0 %v2952_v45 }
 0xe92   : > { %2727 = vmatprep.subr.bf16.mxu0 %v3504_v8  ;;  %v2535_v8 = vld [vmem:[#allocation11 + $0x14] ss:$0 sm:$0xff] }
 0xe95   : > { %2728 = vmatpush3.bf16.msra.mxu0 %v2953_v46 }
 0xf5b   : > { %v2002_v19 = vpop.f32.mrb[28].mxu0 }
 0xf5c   : > { %v2008_v21 = vadd.f32 %v2002_v19, %v4174_v32  ;;  %v2711_v22 = vpop.f32.mrb[29].mxu0 }
 0xf5d   : > { %v2005_v23 = vpop.f32.mrb[30].mxu0 }
 0xf5e   : > { %v2014_v24 = vadd.f32 %v2528_v20, %v2008_v21  ;;  %v2712_v25 = vpop.f32.mrb[31].mxu0 }
 0xf60   : > { %v2015_v26 = vsel %vm672_vm0, %v2014_v24, 0.0 }
 0xf61   : > { %2016 = vadd.xlane.f32.xlu0 %v2015_v26 }
 0xfee   : > { %v2017_v27 = vpop.xlane.xlu0 %2016 }
 0xfef   : > { %v2018_v28 = vmul.f32 0.03125, %v2017_v27 }
 0xff1   : > { %v2019_v29 = vsub.f32 %v2014_v24, %v2018_v28 }
 0xff3   : > { %v2020_v30 = vmul.f32 %v2019_v29, %v2019_v29 }
 0xff5   : > { %v2021_v31 = vsel %vm672_vm0, %v2020_v30, 0.0 }
 0xff6   : > { %2022 = vadd.xlane.f32.xlu0 %v2021_v31 }
0x1083   : > { %v2023_v32 = vpop.xlane.xlu0 %2022 }
0x1084   : > { %v2024_v35 = vmul.f32 0.03125, %v2023_v32 }
0x1086   : > { %v2025_v6 = vadd.f32 1e-05, %v2024_v35 }
0x1088   : > { %2988 = vrsqrt.f32 %v2025_v6 }
0x1092   : > { %v2989_v36 = vpop.eup %2988 }
0x1093   : > { %v2027_v38 = vmul.f32 %v2989_v36, %v2019_v29 }
0x1095   : > { %v2033_v40 = vmul.f32 %v2529_v37, %v2027_v38 }
0x1097   : > { %v2039_v44 = vadd.f32 %v2530_v39, %v2033_v40 }
0x1099   : > { %v2040_v41 = vpack.c.bf16 %v2039_v44, %v2039_v44 }
0x109b   : > { %2718 = vmatmul.mubr.msk.bf16.vlgmr.msra.gmra.mrb[32].mxu1 %vm721_vm2, %v2040_v41 }
0x116e   : > { %v2099_v48 = vpop.f32.mrb[32].mxu1 }
0x116f   : > { %v2100_v49 = vadd.f32 %v2531_v47, %v2099_v48  ;;  %v2719_v50 = vpop.f32.mrb[33].mxu1 }
0x1170   : > { %v2102_v51 = vpop.f32.mrb[34].mxu1 }
0x1171   : > { %v2105_v52 = vsub.f32 0.0, %v2100_v49  ;;  %v2720_v53 = vpop.f32.mrb[35].mxu1 }
0x1173   : > { %v2106_v54 = vmul.f32 1.442695, %v2105_v52 }
0x1175   : > { %2990 = vpow2.f32 %v2106_v54 }
0x117f   : > { %v2991_v55 = vpop.eup %2990 }
0x1180   : > { %v2108_v56 = vadd.f32 1.0, %v2991_v55 }
0x1182   : > { %2992 = vrcp.f32 %v2108_v56 }
0x118c   : > { %v2993_v57 = vpop.eup %2992 }
0x118d   : > { %v2111_v58 = vmul.f32 %v2993_v57, %v2100_v49 }
0x118f   : > { %v2112_v59 = vpack.c.bf16 %v2111_v58, %v2111_v58 }
0x1191   : > { %2730 = vmatmul.mubr.msk.bf16.vlgmr.msra.gmra.mrb[32].mxu0 %vm810_vm3, %v2112_v59 }
0x1264   : > { %v2187_v60 = vpop.f32.mrb[32].mxu0 }
0x1265   : > { %v2188_v61 = vadd.f32 %v2535_v8, %v2187_v60  ;;  %v2731_v62 = vpop.f32.mrb[33].mxu0 }
0x1266   : > { %v2190_v63 = vpop.f32.mrb[34].mxu0 }
0x1267   : > { %v2193_v0 = vmul.f32 0.5, %v2188_v61  ;;  %v2732_v1 = vpop.f32.mrb[35].mxu0 }
0x1269   : > { %v2194_v2 = vadd.f32 %v2193_v0, %v2014_v24 }
0x126b   : > { %v2195_v3 = vsel %vm672_vm0, %v2194_v2, 0.0 }
0x126c   : > { %2196 = vadd.xlane.f32.xlu0 %v2195_v3 }
0x12f9   : > { %v2197_v4 = vpop.xlane.xlu0 %2196 }
0x12fa   : > { %v2198_v5 = vmul.f32 0.03125, %v2197_v4 }
0x12fc   : > { %v2199_v7 = vsub.f32 %v2194_v2, %v2198_v5 }
0x12fe   : > { %v2200_v9 = vmul.f32 %v2199_v7, %v2199_v7 }
0x1300   : > { %v2201_v10 = vsel %vm672_vm0, %v2200_v9, 0.0 }
0x1301   : > { %2202 = vadd.xlane.f32.xlu1 %v2201_v10 }
0x138e   : > { %v2203_v11 = vpop.xlane.xlu1 %2202 }
0x138f   : > { %v2204_v12 = vmul.f32 0.03125, %v2203_v11 }
0x1391   : > { %v2205_v13 = vadd.f32 1e-05, %v2204_v12 }
0x1393   : > { %2994 = vrsqrt.f32 %v2205_v13 }
0x139d   : > { %v2995_v14 = vpop.eup %2994 }
0x139e   : > { %v2207_v16 = vmul.f32 %v2995_v14, %v2199_v7 }
0x13a0   : > { %v2213_v18 = vmul.f32 %v2541_v15, %v2207_v16 }
0x13a2   : > { %v2219_v19 = vadd.f32 %v2542_v17, %v2213_v18 }
0x13a4   : > { %2220 = vst.msk [vmem:[%s669_s5] sm:$0x1f] %vm672_vm0, %v2219_v19 }
0x13a5   : > { %3403 = shalt.err (!%p3400_p13)
}
0x13a6   : > { %s3404_s27 = scalar_lea.hbm %s4214_s14, 128  ;;  %s3408_s20 = scalar_lea.hbm %s4330_s3, 256 }
0x13a7   : > { %p3405_p5 = scmp.ne.s32.totalorder %s4214_s14, %s3404_s27  ;;  %p3409_p1 = scmp.lt.u32.totalorder %s4214_s14, %s4330_s3 }
0x13a8   : > { %p3410_p3 = scmp.lt.u32.totalorder %s3408_s20, %s3404_s27  ;;  %p3412_p6 = scmp.lt.u32.totalorder %s3404_s27, %s4214_s14 }
0x13a9   : > { %p3406_p7 = pnand %p3405_p5, %p4331_p0 }
0x13aa   : > { %p3411_p9 = por %p3410_p3, %p3409_p1 }
0x13ab   : > { %p3407_p4 = pneg %p3406_p7 }
0x13ac   : > { %p3413_p2 = por %p3412_p6, %p3411_p9 }
0x13ae   : > { %p3414_p8 = pnand %p3413_p2, %p3407_p4 }
0x13b0   : > { %3417 = shalt.err (!%p3414_p8)
}
0x13b1   : > { %2787 = dma.vmem_to_hbm [thread:$0]  (%p4331_p0), %s4216_s19, 128, %s4214_s14, %s2222_s22  }
0x13b2 PF: > { %s4332_s21 = sld [smem:[#allocation39_spill]]  ;;  %p4333_p10 = scmp.ne.s32.totalorder %s4310_s1, 0 }
0x13b3   : > { %p4334_p12 = scmp.ge.s32.totalorder %s3484_s16, 2 }
0x13b5   : > { %p2834_p11 = pnand %p4334_p12, %p4333_p10 }
0x13b8   : > { %s2247_s25 = sand.u32 1, %s4332_s21  }
0x13b9   : > { %s2248_s24 = scalar_lea.sflag [#allocation8], %s2247_s25 }
0x13ba   : > { %3467 = dma.done.wait (!%p2834_p11), %s2248_s24, 128  }
0x13bb   : > { %3469 = vsyncadd (!%p2834_p11), %s2248_s24, 4294967168  ;;  %p34_p13 = scmp.ge.s32.totalorder %s3927_s26, 4   ;;  %s4335_s29 = smov %s3476_s30 }
0x13bc   : > { %s4336_s30 = smov %s3480_s15  ;;  %s4337_s15 = smov %s3939_s18 }
0x13bd   : > { %s4338_s16 = smov %s3927_s26  ;;  %36 = sbr.rel (!%p34_p13) target bundleno = 18 (0x12), region = 173 }
0x13c4   :  { %2253 = vsyncpa [#allocation7], 1 }
0x13c5   :  { %2255 = vsyncpa [#allocation7 + $0x1], 1 }
0x13c6   :  { %2256 = vsyncpa [#allocation10], 1 }
0x13c7   :  { %2257 = vsyncpa [#allocation13], 1 }
0x13c8   :  { %2258 = vsyncpa [#allocation16], 1 }
0x13c9   :  { %2259 = vsyncpa [#allocation19], 1 }
0x13ca   :  { %2260 = vsyncpa [#allocation22], 1 }
0x13cb   :  { %2261 = vsyncpa [#allocation25], 1 }
0x13cc   :  { %2262 = vsyncpa [#allocation28], 1 }
0x13cd   :  { %2263 = vsyncpa [#allocation8], 1 }
0x13ce   :  { %2265 = vsyncpa [#allocation8 + $0x1], 1 }

</bundles_post_ra>
